<compile_context>
chip_gen: v6e
topology: v6e:2x2x1
jax: 0.10.0
libtpu: 0.0.40
codegen_flags: <defaults>
</compile_context>

<pallas_src>
import jax
import jax.numpy as jnp
from jax.experimental import pallas as pl
from jax.experimental.pallas import tpu as pltpu

BN_EPS = 1e-5


def _vmem_limit_bytes():
    """Per-generation VMEM limit (~3/4 of physical), with a safe fallback."""
    try:
        info = pltpu.get_tpu_info()
        cap = getattr(info, "vmem_capacity_bytes", 0)
        if cap:
            return int(cap) * 3 // 4
    except Exception:
        pass
    return 32 * 1024 * 1024


def _make_fused_kernel(K, stride, has_bias, has_bn, has_act, inv_count, eps):
    """Builds the fused conv(+bias)(+BN)(+ReLU) kernel (static config baked in)."""

    def kernel(x_ref, w_ref, b_ref, g_ref, beta_ref, o_ref, s_sum, s_sq):
        n = pl.program_id(0)
        nb = pl.num_programs(0)
        _, Ho, Wo, Cout = o_ref.shape          # output block = whole batch output
        Cin = x_ref.shape[-1]

        if has_bn:
            @pl.when(n == 0)
            def _init():
                s_sum[...] = jnp.zeros_like(s_sum)
                s_sq[...] = jnp.zeros_like(s_sq)

        # ---- conv for batch element n: accumulate locally, store once -------
        if has_bias:
            acc = jnp.broadcast_to(b_ref[...], (Ho * Wo, Cout)).astype(jnp.float32)
        else:
            acc = jnp.zeros((Ho * Wo, Cout), jnp.float32)

        for dy in range(K):
            for dx in range(K):
                if stride == 1:
                    patch = x_ref[0, dy:dy + Ho, dx:dx + Wo, :]
                else:
                    # stride>1: compute only the needed (strided) outputs.
                    xv = x_ref[0]
                    patch = xv[dy:dy + stride * (Ho - 1) + 1:stride,
                               dx:dx + stride * (Wo - 1) + 1:stride, :]
                acc = acc + jnp.dot(patch.reshape(Ho * Wo, Cin),
                                    w_ref[dy * K + dx],
                                    preferred_element_type=jnp.float32)

        if has_bn:
            # per-channel batch statistics, accumulated over the batch grid
            s_sum[...] += jnp.sum(acc, axis=0, keepdims=True)
            s_sq[...] += jnp.sum(acc * acc, axis=0, keepdims=True)
            o_ref[n] = acc.reshape(Ho, Wo, Cout)        # raw conv output (resident)

            @pl.when(n == nb - 1)
            def _finalize():
                mean = s_sum[...] * inv_count                       # (1, Cout)
                var = s_sq[...] * inv_count - mean * mean           # biased (PyTorch)
                inv = jax.lax.rsqrt(var + eps)
                scale = (g_ref[...] * inv).reshape(1, 1, 1, Cout)
                shift = (beta_ref[...] - mean * g_ref[...] * inv).reshape(1, 1, 1, Cout)
                y = o_ref[...] * scale + shift
                if has_act:
                    y = jnp.maximum(y, 0.0)
                o_ref[...] = y
        else:
            out = jnp.maximum(acc, 0.0) if has_act else acc
            o_ref[n] = out.reshape(Ho, Wo, Cout)

    return kernel


def conv_bn_act(x_nchw, w_oihw, b, gamma, beta, *, stride=1, padding=1,
                has_bn=True, has_act=True, eps=BN_EPS):
    """Forward of the PyTorch `Conv` module (Conv2d -> BatchNorm2d -> ReLU)."""
    x = jnp.transpose(x_nchw, (0, 2, 3, 1)).astype(jnp.float32)     # NCHW -> NHWC
    N, H, W, Cin = x.shape
    Cout, _, K, _ = w_oihw.shape
    # (Cout, Cin, K, K) -> (K*K, Cin, Cout) so w_ref[tap] is a (Cin, Cout) matmul RHS
    w = jnp.transpose(w_oihw, (2, 3, 1, 0)).reshape(K * K, Cin, Cout).astype(jnp.float32)

    # pad the channel (lane) dim up to 8; zero channels contribute nothing
    if Cin < 8:
        pc = 8 - Cin
        x = jnp.pad(x, ((0, 0), (0, 0), (0, 0), (0, pc)))
        w = jnp.pad(w, ((0, 0), (0, pc), (0, 0)))
        Cin = 8

    xp = jnp.pad(x, ((0, 0), (padding, padding), (padding, padding), (0, 0)))
    Hp, Wp = H + 2 * padding, W + 2 * padding
    Ho = (H + 2 * padding - K) // stride + 1
    Wo = (W + 2 * padding - K) // stride + 1

    has_bias = b is not None
    b2 = (b if has_bias else jnp.zeros((Cout,))).reshape(1, Cout).astype(jnp.float32)
    g2 = (gamma if gamma is not None else jnp.ones((Cout,))).reshape(1, Cout).astype(jnp.float32)
    be2 = (beta if beta is not None else jnp.zeros((Cout,))).reshape(1, Cout).astype(jnp.float32)

    kernel = _make_fused_kernel(K, stride, has_bias, has_bn, has_act,
                                1.0 / float(N * Ho * Wo), float(eps))

    y = pl.pallas_call(
        kernel,
        out_shape=jax.ShapeDtypeStruct((N, Ho, Wo, Cout), jnp.float32),
        grid=(N,),
        in_specs=[
            pl.BlockSpec((1, Hp, Wp, Cin), lambda n: (n, 0, 0, 0)),     # streamed
            pl.BlockSpec((K * K, Cin, Cout), lambda n: (0, 0, 0)),      # weights
            pl.BlockSpec((1, Cout), lambda n: (0, 0)),                  # conv bias
            pl.BlockSpec((1, Cout), lambda n: (0, 0)),                  # bn gamma
            pl.BlockSpec((1, Cout), lambda n: (0, 0)),                  # bn beta
        ],
        # whole-batch output stays VMEM-resident across the grid (one writeback)
        out_specs=pl.BlockSpec((N, Ho, Wo, Cout), lambda n: (0, 0, 0, 0)),
        scratch_shapes=[pltpu.VMEM((1, Cout), jnp.float32),   # channel sum
                        pltpu.VMEM((1, Cout), jnp.float32)],  # channel sum of squares
        compiler_params=pltpu.CompilerParams(
            dimension_semantics=("arbitrary",),   # output revisited / stats accumulated
            vmem_limit_bytes=_vmem_limit_bytes()),
    )(xp, w, b2, g2, be2)

    return jnp.transpose(y, (0, 3, 1, 2))        # NHWC -> NCHW


# ------------------------------ pure-JAX reference ---------------------------
def _reference(x, w, b, gamma, beta, stride, padding, eps):
    y = jax.lax.conv_general_dilated(
        x, w, window_strides=(stride, stride),
        padding=[(padding, padding), (padding, padding)],
        dimension_numbers=("NCHW", "OIHW", "NCHW"))
    y = y + b.reshape(1, -1, 1, 1)
    mean = jnp.mean(y, axis=(0, 2, 3), keepdims=True)
    var = jnp.var(y, axis=(0, 2, 3), keepdims=True)       # biased, as PyTorch BN
    y = (y - mean) * jax.lax.rsqrt(var + eps)
    y = y * gamma.reshape(1, -1, 1, 1) + beta.reshape(1, -1, 1, 1)
    return jnp.maximum(y, 0.0)


if __name__ == "__main__":
    key = jax.random.PRNGKey(0)
    kx, kw, kb, kg, kbe = jax.random.split(key, 5)

    N, Cin, H, W = 2, 4, 16, 16
    Cout, Kf, stride, pad = 32, 3, 1, 1

    x = jax.random.normal(kx, (N, Cin, H, W), jnp.float32)
    w = jax.random.normal(kw, (Cout, Cin, Kf, Kf), jnp.float32) / jnp.sqrt(Cin * Kf * Kf)
    b = 0.1 * jax.random.normal(kb, (Cout,), jnp.float32)
    gamma = 1.0 + 0.1 * jax.random.normal(kg, (Cout,), jnp.float32)
    beta = 0.1 * jax.random.normal(kbe, (Cout,), jnp.float32)

    fwd = jax.jit(lambda xx, ww, bb, gg, be: conv_bn_act(
        xx, ww, bb, gg, be, stride=stride, padding=pad))
    out = jax.block_until_ready(fwd(x, w, b, gamma, beta))
    assert out.shape == (N, Cout, H, W) and out.dtype == jnp.float32

    ref = _reference(x, w, b, gamma, beta, stride, pad, BN_EPS)
    max_diff = float(jnp.max(jnp.abs(out - ref)))
    assert bool(jnp.allclose(out, ref, rtol=3e-2, atol=3e-2)), f"max diff {max_diff}"

    print("KERNEL_OK")
</pallas_src>

<mosaic_0001>
module attributes {stable_mosaic.version = 11 : i64} {
  func.func @kernel(%arg0: i32, %arg1: memref<1x18x18x8xf32, #tpu.memory_space<vmem>>, %arg2: memref<9x8x32xf32, #tpu.memory_space<vmem>>, %arg3: memref<1x32xf32, #tpu.memory_space<vmem>>, %arg4: memref<1x32xf32, #tpu.memory_space<vmem>>, %arg5: memref<1x32xf32, #tpu.memory_space<vmem>>, %arg6: memref<2x16x16x32xf32, #tpu.memory_space<vmem>>, %arg7: memref<1x32xf32, #tpu.memory_space<vmem>>, %arg8: memref<1x32xf32, #tpu.memory_space<vmem>>) attributes {dimension_semantics = [#tpu.dimension_semantics<arbitrary>], iteration_bounds = array<i64: 2>, scalar_prefetch = 0 : i64, scratch_operands = 2 : i64, tpu.core_type = #tpu.core_type<tc>, window_params = [{transform_indices = @transform_0, window_bounds = array<i64: 1, 18, 18, 8>}, {pipeline_mode = #tpu.pipeline_mode<synchronous>, transform_indices = @transform_1, window_bounds = array<i64: 9, 8, 32>}, {pipeline_mode = #tpu.pipeline_mode<synchronous>, transform_indices = @transform_2, window_bounds = array<i64: 1, 32>}, {pipeline_mode = #tpu.pipeline_mode<synchronous>, transform_indices = @transform_3, window_bounds = array<i64: 1, 32>}, {pipeline_mode = #tpu.pipeline_mode<synchronous>, transform_indices = @transform_4, window_bounds = array<i64: 1, 32>}, {pipeline_mode = #tpu.pipeline_mode<synchronous>, transform_indices = @transform_5, window_bounds = array<i64: 2, 16, 16, 32>}]} {
    %c0_i32 = arith.constant 0 : i32
    %0 = arith.cmpi eq, %arg0, %c0_i32 : i32
    %1 = arith.extui %0 : i1 to i32
    %c0_i32_0 = arith.constant 0 : i32
    %2 = arith.cmpi ne, %1, %c0_i32_0 : i32
    scf.if %2 {
      %cst_79 = arith.constant 0.000000e+00 : f32
      %88 = vector.broadcast %cst_79 : f32 to vector<1x32xf32>
      %c0_80 = arith.constant 0 : index
      %c0_81 = arith.constant 0 : index
      %89 = vector.load %arg7[%c0_80, %c0_81] : memref<1x32xf32, #tpu.memory_space<vmem>>, vector<1x32xf32>
      tpu.vector_store %arg7[%c0_80, %c0_81], %88 {strides = array<i32>} : memref<1x32xf32, #tpu.memory_space<vmem>>, vector<1x32xf32>,
      %cst_82 = arith.constant 0.000000e+00 : f32
      %90 = vector.broadcast %cst_82 : f32 to vector<1x32xf32>
      %c0_83 = arith.constant 0 : index
      %c0_84 = arith.constant 0 : index
      %91 = vector.load %arg8[%c0_83, %c0_84] : memref<1x32xf32, #tpu.memory_space<vmem>>, vector<1x32xf32>
      tpu.vector_store %arg8[%c0_83, %c0_84], %90 {strides = array<i32>} : memref<1x32xf32, #tpu.memory_space<vmem>>, vector<1x32xf32>,
    } else {
    }
    %c0 = arith.constant 0 : index
    %c0_1 = arith.constant 0 : index
    %3 = vector.load %arg3[%c0, %c0_1] : memref<1x32xf32, #tpu.memory_space<vmem>>, vector<1x32xf32>
    %4 = vector.shape_cast %3 : vector<1x32xf32> to vector<1x32xf32>
    %5 = vector.broadcast %4 : vector<1x32xf32> to vector<256x32xf32>
    %c0_2 = arith.constant 0 : index
    %c0_3 = arith.constant 0 : index
    %c0_4 = arith.constant 0 : index
    %c0_5 = arith.constant 0 : index
    %6 = vector.load %arg1[%c0_2, %c0_3, %c0_4, %c0_5] : memref<1x18x18x8xf32, #tpu.memory_space<vmem>>, vector<1x16x16x8xf32>
    %7 = vector.shape_cast %6 : vector<1x16x16x8xf32> to vector<16x16x8xf32>
    %8 = vector.shape_cast %7 : vector<16x16x8xf32> to vector<256x8xf32>
    %c0_6 = arith.constant 0 : index
    %c0_7 = arith.constant 0 : index
    %c0_8 = arith.constant 0 : index
    %9 = vector.load %arg2[%c0_6, %c0_7, %c0_8] : memref<9x8x32xf32, #tpu.memory_space<vmem>>, vector<1x8x32xf32>
    %10 = vector.shape_cast %9 : vector<1x8x32xf32> to vector<8x32xf32>
    %cst = arith.constant dense<0.000000e+00> : vector<256x32xf32>
    %11 = tpu.matmul %8, %10, %cst {dimension_numbers = #tpu.dot_dimension_numbers<[1], [0], [0], [1], [0, 0, 1, 1], [], []>} : vector<256x8xf32>, vector<8x32xf32>, vector<256x32xf32> -> vector<256x32xf32>
    %12 = arith.addf %5, %11 : vector<256x32xf32>
    %c0_9 = arith.constant 0 : index
    %c0_10 = arith.constant 0 : index
    %c1 = arith.constant 1 : index
    %c0_11 = arith.constant 0 : index
    %13 = vector.load %arg1[%c0_9, %c0_10, %c1, %c0_11] : memref<1x18x18x8xf32, #tpu.memory_space<vmem>>, vector<1x16x16x8xf32>
    %14 = vector.shape_cast %13 : vector<1x16x16x8xf32> to vector<16x16x8xf32>
    %15 = vector.shape_cast %14 : vector<16x16x8xf32> to vector<256x8xf32>
    %c1_12 = arith.constant 1 : index
    %c0_13 = arith.constant 0 : index
    %c0_14 = arith.constant 0 : index
    %16 = vector.load %arg2[%c1_12, %c0_13, %c0_14] : memref<9x8x32xf32, #tpu.memory_space<vmem>>, vector<1x8x32xf32>
    %17 = vector.shape_cast %16 : vector<1x8x32xf32> to vector<8x32xf32>
    %cst_15 = arith.constant dense<0.000000e+00> : vector<256x32xf32>
    %18 = tpu.matmul %15, %17, %cst_15 {dimension_numbers = #tpu.dot_dimension_numbers<[1], [0], [0], [1], [0, 0, 1, 1], [], []>} : vector<256x8xf32>, vector<8x32xf32>, vector<256x32xf32> -> vector<256x32xf32>
    %19 = arith.addf %12, %18 : vector<256x32xf32>
    %c0_16 = arith.constant 0 : index
    %c0_17 = arith.constant 0 : index
    %c2 = arith.constant 2 : index
    %c0_18 = arith.constant 0 : index
    %20 = vector.load %arg1[%c0_16, %c0_17, %c2, %c0_18] : memref<1x18x18x8xf32, #tpu.memory_space<vmem>>, vector<1x16x16x8xf32>
    %21 = vector.shape_cast %20 : vector<1x16x16x8xf32> to vector<16x16x8xf32>
    %22 = vector.shape_cast %21 : vector<16x16x8xf32> to vector<256x8xf32>
    %c2_19 = arith.constant 2 : index
    %c0_20 = arith.constant 0 : index
    %c0_21 = arith.constant 0 : index
    %23 = vector.load %arg2[%c2_19, %c0_20, %c0_21] : memref<9x8x32xf32, #tpu.memory_space<vmem>>, vector<1x8x32xf32>
    %24 = vector.shape_cast %23 : vector<1x8x32xf32> to vector<8x32xf32>
    %cst_22 = arith.constant dense<0.000000e+00> : vector<256x32xf32>
    %25 = tpu.matmul %22, %24, %cst_22 {dimension_numbers = #tpu.dot_dimension_numbers<[1], [0], [0], [1], [0, 0, 1, 1], [], []>} : vector<256x8xf32>, vector<8x32xf32>, vector<256x32xf32> -> vector<256x32xf32>
    %26 = arith.addf %19, %25 : vector<256x32xf32>
    %c0_23 = arith.constant 0 : index
    %c1_24 = arith.constant 1 : index
    %c0_25 = arith.constant 0 : index
    %c0_26 = arith.constant 0 : index
    %27 = vector.load %arg1[%c0_23, %c1_24, %c0_25, %c0_26] : memref<1x18x18x8xf32, #tpu.memory_space<vmem>>, vector<1x16x16x8xf32>
    %28 = vector.shape_cast %27 : vector<1x16x16x8xf32> to vector<16x16x8xf32>
    %29 = vector.shape_cast %28 : vector<16x16x8xf32> to vector<256x8xf32>
    %c3 = arith.constant 3 : index
    %c0_27 = arith.constant 0 : index
    %c0_28 = arith.constant 0 : index
    %30 = vector.load %arg2[%c3, %c0_27, %c0_28] : memref<9x8x32xf32, #tpu.memory_space<vmem>>, vector<1x8x32xf32>
    %31 = vector.shape_cast %30 : vector<1x8x32xf32> to vector<8x32xf32>
    %cst_29 = arith.constant dense<0.000000e+00> : vector<256x32xf32>
    %32 = tpu.matmul %29, %31, %cst_29 {dimension_numbers = #tpu.dot_dimension_numbers<[1], [0], [0], [1], [0, 0, 1, 1], [], []>} : vector<256x8xf32>, vector<8x32xf32>, vector<256x32xf32> -> vector<256x32xf32>
    %33 = arith.addf %26, %32 : vector<256x32xf32>
    %c0_30 = arith.constant 0 : index
    %c1_31 = arith.constant 1 : index
    %c1_32 = arith.constant 1 : index
    %c0_33 = arith.constant 0 : index
    %34 = vector.load %arg1[%c0_30, %c1_31, %c1_32, %c0_33] : memref<1x18x18x8xf32, #tpu.memory_space<vmem>>, vector<1x16x16x8xf32>
    %35 = vector.shape_cast %34 : vector<1x16x16x8xf32> to vector<16x16x8xf32>
    %36 = vector.shape_cast %35 : vector<16x16x8xf32> to vector<256x8xf32>
    %c4 = arith.constant 4 : index
    %c0_34 = arith.constant 0 : index
    %c0_35 = arith.constant 0 : index
    %37 = vector.load %arg2[%c4, %c0_34, %c0_35] : memref<9x8x32xf32, #tpu.memory_space<vmem>>, vector<1x8x32xf32>
    %38 = vector.shape_cast %37 : vector<1x8x32xf32> to vector<8x32xf32>
    %cst_36 = arith.constant dense<0.000000e+00> : vector<256x32xf32>
    %39 = tpu.matmul %36, %38, %cst_36 {dimension_numbers = #tpu.dot_dimension_numbers<[1], [0], [0], [1], [0, 0, 1, 1], [], []>} : vector<256x8xf32>, vector<8x32xf32>, vector<256x32xf32> -> vector<256x32xf32>
    %40 = arith.addf %33, %39 : vector<256x32xf32>
    %c0_37 = arith.constant 0 : index
    %c1_38 = arith.constant 1 : index
    %c2_39 = arith.constant 2 : index
    %c0_40 = arith.constant 0 : index
    %41 = vector.load %arg1[%c0_37, %c1_38, %c2_39, %c0_40] : memref<1x18x18x8xf32, #tpu.memory_space<vmem>>, vector<1x16x16x8xf32>
    %42 = vector.shape_cast %41 : vector<1x16x16x8xf32> to vector<16x16x8xf32>
    %43 = vector.shape_cast %42 : vector<16x16x8xf32> to vector<256x8xf32>
    %c5 = arith.constant 5 : index
    %c0_41 = arith.constant 0 : index
    %c0_42 = arith.constant 0 : index
    %44 = vector.load %arg2[%c5, %c0_41, %c0_42] : memref<9x8x32xf32, #tpu.memory_space<vmem>>, vector<1x8x32xf32>
    %45 = vector.shape_cast %44 : vector<1x8x32xf32> to vector<8x32xf32>
    %cst_43 = arith.constant dense<0.000000e+00> : vector<256x32xf32>
    %46 = tpu.matmul %43, %45, %cst_43 {dimension_numbers = #tpu.dot_dimension_numbers<[1], [0], [0], [1], [0, 0, 1, 1], [], []>} : vector<256x8xf32>, vector<8x32xf32>, vector<256x32xf32> -> vector<256x32xf32>
    %47 = arith.addf %40, %46 : vector<256x32xf32>
    %c0_44 = arith.constant 0 : index
    %c2_45 = arith.constant 2 : index
    %c0_46 = arith.constant 0 : index
    %c0_47 = arith.constant 0 : index
    %48 = vector.load %arg1[%c0_44, %c2_45, %c0_46, %c0_47] : memref<1x18x18x8xf32, #tpu.memory_space<vmem>>, vector<1x16x16x8xf32>
    %49 = vector.shape_cast %48 : vector<1x16x16x8xf32> to vector<16x16x8xf32>
    %50 = vector.shape_cast %49 : vector<16x16x8xf32> to vector<256x8xf32>
    %c6 = arith.constant 6 : index
    %c0_48 = arith.constant 0 : index
    %c0_49 = arith.constant 0 : index
    %51 = vector.load %arg2[%c6, %c0_48, %c0_49] : memref<9x8x32xf32, #tpu.memory_space<vmem>>, vector<1x8x32xf32>
    %52 = vector.shape_cast %51 : vector<1x8x32xf32> to vector<8x32xf32>
    %cst_50 = arith.constant dense<0.000000e+00> : vector<256x32xf32>
    %53 = tpu.matmul %50, %52, %cst_50 {dimension_numbers = #tpu.dot_dimension_numbers<[1], [0], [0], [1], [0, 0, 1, 1], [], []>} : vector<256x8xf32>, vector<8x32xf32>, vector<256x32xf32> -> vector<256x32xf32>
    %54 = arith.addf %47, %53 : vector<256x32xf32>
    %c0_51 = arith.constant 0 : index
    %c2_52 = arith.constant 2 : index
    %c1_53 = arith.constant 1 : index
    %c0_54 = arith.constant 0 : index
    %55 = vector.load %arg1[%c0_51, %c2_52, %c1_53, %c0_54] : memref<1x18x18x8xf32, #tpu.memory_space<vmem>>, vector<1x16x16x8xf32>
    %56 = vector.shape_cast %55 : vector<1x16x16x8xf32> to vector<16x16x8xf32>
    %57 = vector.shape_cast %56 : vector<16x16x8xf32> to vector<256x8xf32>
    %c7 = arith.constant 7 : index
    %c0_55 = arith.constant 0 : index
    %c0_56 = arith.constant 0 : index
    %58 = vector.load %arg2[%c7, %c0_55, %c0_56] : memref<9x8x32xf32, #tpu.memory_space<vmem>>, vector<1x8x32xf32>
    %59 = vector.shape_cast %58 : vector<1x8x32xf32> to vector<8x32xf32>
    %cst_57 = arith.constant dense<0.000000e+00> : vector<256x32xf32>
    %60 = tpu.matmul %57, %59, %cst_57 {dimension_numbers = #tpu.dot_dimension_numbers<[1], [0], [0], [1], [0, 0, 1, 1], [], []>} : vector<256x8xf32>, vector<8x32xf32>, vector<256x32xf32> -> vector<256x32xf32>
    %61 = arith.addf %54, %60 : vector<256x32xf32>
    %c0_58 = arith.constant 0 : index
    %c2_59 = arith.constant 2 : index
    %c2_60 = arith.constant 2 : index
    %c0_61 = arith.constant 0 : index
    %62 = vector.load %arg1[%c0_58, %c2_59, %c2_60, %c0_61] : memref<1x18x18x8xf32, #tpu.memory_space<vmem>>, vector<1x16x16x8xf32>
    %63 = vector.shape_cast %62 : vector<1x16x16x8xf32> to vector<16x16x8xf32>
    %64 = vector.shape_cast %63 : vector<16x16x8xf32> to vector<256x8xf32>
    %c8 = arith.constant 8 : index
    %c0_62 = arith.constant 0 : index
    %c0_63 = arith.constant 0 : index
    %65 = vector.load %arg2[%c8, %c0_62, %c0_63] : memref<9x8x32xf32, #tpu.memory_space<vmem>>, vector<1x8x32xf32>
    %66 = vector.shape_cast %65 : vector<1x8x32xf32> to vector<8x32xf32>
    %cst_64 = arith.constant dense<0.000000e+00> : vector<256x32xf32>
    %67 = tpu.matmul %64, %66, %cst_64 {dimension_numbers = #tpu.dot_dimension_numbers<[1], [0], [0], [1], [0, 0, 1, 1], [], []>} : vector<256x8xf32>, vector<8x32xf32>, vector<256x32xf32> -> vector<256x32xf32>
    %68 = arith.addf %61, %67 : vector<256x32xf32>
    %c0_65 = arith.constant 0 : index
    %c0_66 = arith.constant 0 : index
    %69 = vector.load %arg7[%c0_65, %c0_66] : memref<1x32xf32, #tpu.memory_space<vmem>>, vector<1x32xf32>
    %cst_67 = arith.constant dense<0.000000e+00> : vector<32xf32>
    %70 = vector.multi_reduction <add>, %68, %cst_67 [0] : vector<256x32xf32> to vector<32xf32>
    %71 = vector.shape_cast %70 : vector<32xf32> to vector<1x32xf32>
    %72 = arith.addf %69, %71 : vector<1x32xf32>
    %c0_68 = arith.constant 0 : index
    %c0_69 = arith.constant 0 : index
    %73 = vector.load %arg7[%c0_68, %c0_69] : memref<1x32xf32, #tpu.memory_space<vmem>>, vector<1x32xf32>
    tpu.vector_store %arg7[%c0_68, %c0_69], %72 {strides = array<i32>} : memref<1x32xf32, #tpu.memory_space<vmem>>, vector<1x32xf32>,
    %c0_70 = arith.constant 0 : index
    %c0_71 = arith.constant 0 : index
    %74 = vector.load %arg8[%c0_70, %c0_71] : memref<1x32xf32, #tpu.memory_space<vmem>>, vector<1x32xf32>
    %75 = arith.mulf %68, %68 : vector<256x32xf32>
    %cst_72 = arith.constant dense<0.000000e+00> : vector<32xf32>
    %76 = vector.multi_reduction <add>, %75, %cst_72 [0] : vector<256x32xf32> to vector<32xf32>
    %77 = vector.shape_cast %76 : vector<32xf32> to vector<1x32xf32>
    %78 = arith.addf %74, %77 : vector<1x32xf32>
    %c0_73 = arith.constant 0 : index
    %c0_74 = arith.constant 0 : index
    %79 = vector.load %arg8[%c0_73, %c0_74] : memref<1x32xf32, #tpu.memory_space<vmem>>, vector<1x32xf32>
    tpu.vector_store %arg8[%c0_73, %c0_74], %78 {strides = array<i32>} : memref<1x32xf32, #tpu.memory_space<vmem>>, vector<1x32xf32>,
    %80 = vector.shape_cast %68 : vector<256x32xf32> to vector<16x16x32xf32>
    %81 = arith.index_cast %arg0 : i32 to index
    %c0_75 = arith.constant 0 : index
    %c0_76 = arith.constant 0 : index
    %c0_77 = arith.constant 0 : index
    %82 = vector.load %arg6[%81, %c0_75, %c0_76, %c0_77] : memref<2x16x16x32xf32, #tpu.memory_space<vmem>>, vector<1x16x16x32xf32>
    %83 = vector.shape_cast %82 : vector<1x16x16x32xf32> to vector<16x16x32xf32>
    %84 = vector.shape_cast %80 : vector<16x16x32xf32> to vector<1x16x16x32xf32>
    tpu.vector_store %arg6[%81, %c0_75, %c0_76, %c0_77], %84 {strides = array<i32>} : memref<2x16x16x32xf32, #tpu.memory_space<vmem>>, vector<1x16x16x32xf32>,
    %c1_i32 = arith.constant 1 : i32
    %85 = arith.cmpi eq, %arg0, %c1_i32 : i32
    %86 = arith.extui %85 : i1 to i32
    %c0_i32_78 = arith.constant 0 : i32
    %87 = arith.cmpi ne, %86, %c0_i32_78 : i32
    scf.if %87 {
      %c0_79 = arith.constant 0 : index
      %c0_80 = arith.constant 0 : index
      %88 = vector.load %arg7[%c0_79, %c0_80] : memref<1x32xf32, #tpu.memory_space<vmem>>, vector<1x32xf32>
      %cst_81 = arith.constant 0.001953125 : f32
      %89 = vector.broadcast %cst_81 : f32 to vector<1x32xf32>
      %90 = arith.mulf %88, %89 : vector<1x32xf32>
      %c0_82 = arith.constant 0 : index
      %c0_83 = arith.constant 0 : index
      %91 = vector.load %arg8[%c0_82, %c0_83] : memref<1x32xf32, #tpu.memory_space<vmem>>, vector<1x32xf32>
      %cst_84 = arith.constant 0.001953125 : f32
      %92 = vector.broadcast %cst_84 : f32 to vector<1x32xf32>
      %93 = arith.mulf %91, %92 : vector<1x32xf32>
      %94 = arith.mulf %90, %90 : vector<1x32xf32>
      %95 = arith.subf %93, %94 : vector<1x32xf32>
      %cst_85 = arith.constant 9.99999974E-6 : f32
      %96 = vector.broadcast %cst_85 : f32 to vector<1x32xf32>
      %97 = arith.addf %95, %96 : vector<1x32xf32>
      %98 = math.rsqrt %97 : vector<1x32xf32>
      %c0_86 = arith.constant 0 : index
      %c0_87 = arith.constant 0 : index
      %99 = vector.load %arg4[%c0_86, %c0_87] : memref<1x32xf32, #tpu.memory_space<vmem>>, vector<1x32xf32>
      %100 = arith.mulf %99, %98 : vector<1x32xf32>
      %101 = vector.shape_cast %100 : vector<1x32xf32> to vector<1x1x1x32xf32>
      %c0_88 = arith.constant 0 : index
      %c0_89 = arith.constant 0 : index
      %102 = vector.load %arg5[%c0_88, %c0_89] : memref<1x32xf32, #tpu.memory_space<vmem>>, vector<1x32xf32>
      %c0_90 = arith.constant 0 : index
      %c0_91 = arith.constant 0 : index
      %103 = vector.load %arg4[%c0_90, %c0_91] : memref<1x32xf32, #tpu.memory_space<vmem>>, vector<1x32xf32>
      %104 = arith.mulf %90, %103 : vector<1x32xf32>
      %105 = arith.mulf %104, %98 : vector<1x32xf32>
      %106 = arith.subf %102, %105 : vector<1x32xf32>
      %107 = vector.shape_cast %106 : vector<1x32xf32> to vector<1x1x1x32xf32>
      %c0_92 = arith.constant 0 : index
      %c0_93 = arith.constant 0 : index
      %c0_94 = arith.constant 0 : index
      %c0_95 = arith.constant 0 : index
      %108 = vector.load %arg6[%c0_92, %c0_93, %c0_94, %c0_95] : memref<2x16x16x32xf32, #tpu.memory_space<vmem>>, vector<2x16x16x32xf32>
      %109 = vector.broadcast %101 : vector<1x1x1x32xf32> to vector<2x16x16x32xf32>
      %110 = arith.mulf %108, %109 : vector<2x16x16x32xf32>
      %111 = vector.broadcast %107 : vector<1x1x1x32xf32> to vector<2x16x16x32xf32>
      %112 = arith.addf %110, %111 : vector<2x16x16x32xf32>
      %cst_96 = arith.constant 0.000000e+00 : f32
      %113 = vector.broadcast %cst_96 : f32 to vector<2x16x16x32xf32>
      %114 = arith.maximumf %112, %113 : vector<2x16x16x32xf32>
      %c0_97 = arith.constant 0 : index
      %c0_98 = arith.constant 0 : index
      %c0_99 = arith.constant 0 : index
      %c0_100 = arith.constant 0 : index
      %115 = vector.load %arg6[%c0_97, %c0_98, %c0_99, %c0_100] : memref<2x16x16x32xf32, #tpu.memory_space<vmem>>, vector<2x16x16x32xf32>
      tpu.vector_store %arg6[%c0_97, %c0_98, %c0_99, %c0_100], %114 {strides = array<i32>} : memref<2x16x16x32xf32, #tpu.memory_space<vmem>>, vector<2x16x16x32xf32>,
    } else {
    }
    return
  }
  func.func @transform_0(%arg0: i32) -> (i32, i32, i32, i32) {
    %c0_i32 = arith.constant 0 : i32
    %c0_i32_0 = arith.constant 0 : i32
    %c0_i32_1 = arith.constant 0 : i32
    %c0_i32_2 = arith.constant 0 : i32
    return %arg0, %c0_i32, %c0_i32_0, %c0_i32_1 : i32, i32, i32, i32
  }
  func.func @transform_1(%arg0: i32) -> (i32, i32, i32) {
    %c0_i32 = arith.constant 0 : i32
    %c0_i32_0 = arith.constant 0 : i32
    %c0_i32_1 = arith.constant 0 : i32
    %c0_i32_2 = arith.constant 0 : i32
    return %c0_i32, %c0_i32_0, %c0_i32_1 : i32, i32, i32
  }
  func.func @transform_2(%arg0: i32) -> (i32, i32) {
    %c0_i32 = arith.constant 0 : i32
    %c0_i32_0 = arith.constant 0 : i32
    %c0_i32_1 = arith.constant 0 : i32
    return %c0_i32, %c0_i32_0 : i32, i32
  }
  func.func @transform_3(%arg0: i32) -> (i32, i32) {
    %c0_i32 = arith.constant 0 : i32
    %c0_i32_0 = arith.constant 0 : i32
    %c0_i32_1 = arith.constant 0 : i32
    return %c0_i32, %c0_i32_0 : i32, i32
  }
  func.func @transform_4(%arg0: i32) -> (i32, i32) {
    %c0_i32 = arith.constant 0 : i32
    %c0_i32_0 = arith.constant 0 : i32
    %c0_i32_1 = arith.constant 0 : i32
    return %c0_i32, %c0_i32_0 : i32, i32
  }
  func.func @transform_5(%arg0: i32) -> (i32, i32, i32, i32) {
    %c0_i32 = arith.constant 0 : i32
    %c0_i32_0 = arith.constant 0 : i32
    %c0_i32_1 = arith.constant 0 : i32
    %c0_i32_2 = arith.constant 0 : i32
    %c0_i32_3 = arith.constant 0 : i32
    return %c0_i32, %c0_i32_0, %c0_i32_1, %c0_i32_2 : i32, i32, i32, i32
  }
}

</mosaic_0001>

<bundles_post_ra>
// kernel: _lambda_.1
= control target key start
LH: loop header
LB: loop body
LE: loop exit
PB: predicated region body
PF: predicated region fallthrough
CT: control target
= control target key end

     0   :  { %10 = vsyncpa [#allocation5], 0  ;;  %s5663_s18 = smov 0   ;;  %s7472_s0 = inlined_call_operand.vmem [shape: f32[2,18,18,8], index: 0, kind: input, shape index: {}]   ;;  %s7473_s1 = inlined_call_operand.vmem [shape: f32[9,8,32], index: 1, kind: input, shape index: {}]   ;;  %s7474_s2 = inlined_call_operand.vmem [shape: f32[1,32], index: 2, kind: input, shape index: {}]   ;;  %s7475_s3 = inlined_call_operand.vmem [shape: f32[1,32], index: 3, kind: input, shape index: {}]   ;;  %s7476_s4 = inlined_call_operand.vmem [shape: f32[1,32], index: 4, kind: input, shape index: {}]   ;;  %s7477_s5 = inlined_call_operand.hbm [shape: f32[2,16,16,32], index: 5, kind: output, shape index: {}]  }
   0x1 LB: > { %s5669_s19 = sadd.s32 4294967295, %s5627_s18   ;;  %p4325_p0 = scmp.ge.s32.totalorder %s5627_s18, 1  ;;  %s5627_s18 = sphi %s5663_s18, %s16_s18  }
   0x2   : > { %p183_p1 = scmp.lt.s32.totalorder %s5627_s18, 3 }
   0x4   : > { %p184_p2 = pnand %p4325_p0, %p183_p1 }
   0x6   : > { %187 = sbr.rel (%p184_p2) target bundleno = 633 (0x279), region = 40 }
   0xb   : > { %p206_p3 = scmp.lt.s32.totalorder %s5669_s19, 1  ;;  %p4327_p4 = scmp.ne.s32.totalorder %s5669_s19, 0 }
   0xd   : > { %s207_s20 = scalar_select %p206_p3, %s5669_s19, 1 }
   0xe   : > { %214 = sbr.rel (%p4327_p4) target bundleno = 21 (0x15), region = 44 }
   0xf   : > { %s5572_s21 = smul.u32 432, %s207_s20 }
  0x11   : > { %s5678_s24 = scalar_lea.vmem %s7472_s0, %s5572_s21 }
  0x13   : > { %vm215_vm0 = vcmask 253952   ;;  %v5629_v0 = vmov 0.0  }
  0x14   : > { %216 = vst.msk [vmem:[#allocation2] sm:$0x1] %vm215_vm0, %v5629_v0  ;;  %217 = vst.msk [vmem:[#allocation3] sm:$0x1] %vm215_vm0, %v5629_v0 }
  0x15 PF: > { %v257_v1 = vld [vmem:[%s7473_s1] sm:$0xff]  ;;  %vm258_vm1 = vcmask 64512   ;;  %v5689_v4 = vld [vmem:[%s5678_s24 + $0xc8] sm:$0xff]  ;;  %v4394_v7 = vld [vmem:[%s7473_s1 + $0x10] sm:$0xff]  ;;  %s4817_s22 = sshll.u32 %s5669_s19, 8  ;;  %vm3711_vm2 = vcmask 261120  }
  0x16   : > { %v5685_v2 = vld [vmem:[%s5678_s24 + $0xc0] sm:$0xff]  ;;  %5570 = vmatprep.subr.mxu1 %v257_v1  ;;  %5120 = vmatprep.subr.mxu0 %v257_v1  ;;  %v4361_v5 = vld [vmem:[%s7473_s1 + $0x8] sm:$0xff]  ;;  %v5702_v8 = vld [vmem:[%s5678_s24 + $0xd8] sm:$0xff]  ;;  %s7024_s23 = scalar_lea.vmem [#allocation4], %s4817_s22  ;;  %vm3782_vm3 = vcmask 253952   ;;  %p4818_p5 = scmp.ne.s32.totalorder %s5669_s19, 1 }
  0x17   : > { %v225_v3 = vld [vmem:[%s5678_s24] sm:$0xff]  ;;  %5571 = vmatpush3.msra.mxu1 %v257_v1  ;;  %5146 = vmatprep.mubr.msk.f32.mxu1 %vm258_vm1, %v5685_v2  ;;  %v226_v6 = vld [vmem:[%s5678_s24 + $0x8] sm:$0xff]  ;;  %v5707_v9 = vld [vmem:[%s5678_s24 + $0x18] sm:$0xff] }
  0x18   : > { %5121 = vmatpush3.msra.mxu0 %v257_v1  ;;  %5122 = vmatprep.mubr.msk.f32.mxu0 %vm258_vm1, %v225_v3  ;;  %v5711_v10 = vld [vmem:[%s5678_s24 + $0xe0] sm:$0xff]  ;;  %v5719_v12 = vld [vmem:[%s5678_s24 + $0xf0] sm:$0xff]  ;;  %v5733_v14 = vld [vmem:[%s5678_s24 + $0xf8] sm:$0xff] }
  0x19   : > { %5147 = vmatmul.mubr.msk.f32.vlgmr.msra.gmra.mxu1 %vm258_vm1, %v5689_v4  ;;  %5170 = vmatprep.subr.mxu1 %v4361_v5  ;;  %v5716_v11 = vld [vmem:[%s5678_s24 + $0x20] sm:$0xff]  ;;  %v5724_v13 = vld [vmem:[%s5678_s24 + $0x30] sm:$0xff]  ;;  %v5738_v15 = vld [vmem:[%s5678_s24 + $0x38] sm:$0xff] }
  0x1a   : > { %5123 = vmatmul.mubr.msk.f32.vlgmr.msra.gmra.mxu0 %vm258_vm1, %v226_v6  ;;  %5171 = vmatpush3.msra.mxu1 %v4361_v5  ;;  %v5741_v16 = vld [vmem:[%s5678_s24 + $0x108] sm:$0xff]  ;;  %v4459_v18 = vld [vmem:[%s7473_s1 + $0x18] sm:$0xff]  ;;  %v5756_v19 = vld [vmem:[%s5678_s24 + $0x110] sm:$0xff] }
  0x1b   : > { %5220 = vmatprep.subr.mxu0 %v4394_v7  ;;  %5149 = vmatprep.mubr.msk.f32.mxu1 %vm258_vm1, %v5702_v8  ;;  %v5744_v17 = vld [vmem:[%s5678_s24 + $0x48] sm:$0xff]  ;;  %v4524_v20 = vld [vmem:[%s7473_s1 + $0x20] sm:$0xff]  ;;  %v5764_v21 = vld [vmem:[%s5678_s24 + $0x50] sm:$0xff] }
  0x1c   : > { %5221 = vmatpush3.msra.mxu0 %v4394_v7  ;;  %5125 = vmatprep.mubr.msk.f32.mxu0 %vm258_vm1, %v5707_v9  ;;  %v5767_v22 = vld [vmem:[%s5678_s24 + $0x120] sm:$0xff]  ;;  %v5779_v24 = vld [vmem:[%s5678_s24 + $0x128] sm:$0xff]  ;;  %v5787_v26 = vld [vmem:[%s5678_s24 + $0x138] sm:$0xff] }
  0x1d   : > { %5150 = vmatmul.mubr.msk.f32.gmra.mxu1 %vm258_vm1, %v5711_v10  ;;  %5270 = vmatprep.subr.mxu1 %v4459_v18  ;;  %v5770_v23 = vld [vmem:[%s5678_s24 + $0x60] sm:$0xff]  ;;  %v5784_v25 = vld [vmem:[%s5678_s24 + $0x68] sm:$0xff]  ;;  %v5790_v27 = vld [vmem:[%s5678_s24 + $0x78] sm:$0xff] }
  0x1e   : > { %5126 = vmatmul.mubr.msk.f32.gmra.mxu0 %vm258_vm1, %v5716_v11  ;;  %5152 = vmatprep.mubr.msk.f32.mxu1 %vm258_vm1, %v5719_v12  ;;  %v5799_v28 = vld [vmem:[%s5678_s24 + $0x140] sm:$0xff]  ;;  %v5807_v30 = vld [vmem:[%s5678_s24 + $0x150] sm:$0xff]  ;;  %v5819_v32 = vld [vmem:[%s5678_s24 + $0x158] sm:$0xff] }
  0x1f   : > { %5128 = vmatprep.mubr.msk.f32.mxu0 %vm258_vm1, %v5724_v13  ;;  %5320 = vmatprep.subr.mxu0 %v4524_v20  ;;  %v5804_v29 = vld [vmem:[%s5678_s24 + $0x80] sm:$0xff]  ;;  %v5810_v31 = vld [vmem:[%s5678_s24 + $0x90] sm:$0xff]  ;;  %v5824_v33 = vld [vmem:[%s5678_s24 + $0x98] sm:$0xff] }
  0x20   : > { %v5827_v34 = vld [vmem:[%s5678_s24 + $0x168] sm:$0xff]  ;;  %v5839_v36 = vld [vmem:[%s5678_s24 + $0x170] sm:$0xff]  ;;  %v5857_v42 = vld [vmem:[%s5678_s24 + $0x19] sm:$0xff] }
  0x21   : > { %5153 = vmatmul.mubr.msk.f32.gmra.mxu1 %vm258_vm1, %v5733_v14  ;;  %v5830_v35 = vld [vmem:[%s5678_s24 + $0xa8] sm:$0xff]  ;;  %7529 = vst [vmem:[#allocation7_spill] sm:$0xff] %v5839_v36  ;;  %v5844_v37 = vld [vmem:[%s5678_s24 + $0xb0] sm:$0xff]  ;;  %v5861_v43 = vld [vmem:[%s5678_s24 + $0x1a] sm:$0xff] }
  0x22   : > { %5129 = vmatmul.mubr.msk.f32.gmra.mxu0 %vm258_vm1, %v5738_v15  ;;  %5155 = vmatprep.mubr.msk.f32.mxu1 %vm258_vm1, %v5741_v16  ;;  %v612_v38 = vld [vmem:[%s5678_s24 + $0x1] sm:$0xff]  ;;  %v613_v40 = vld [vmem:[%s5678_s24 + $0x9] sm:$0xff]  ;;  %7530 = vst [vmem:[#allocation8_spill] sm:$0xff] %v5861_v43  ;;  %v5883_v48 = vld [vmem:[%s5678_s24 + $0x31] sm:$0xff] }
  0x23   : > { %5131 = vmatprep.mubr.msk.f32.mxu0 %vm258_vm1, %v5744_v17  ;;  %v999_v39 = vld [vmem:[%s5678_s24 + $0x2] sm:$0xff]  ;;  %v1000_v41 = vld [vmem:[%s5678_s24 + $0xa] sm:$0xff]  ;;  %v5888_v49 = vld [vmem:[%s5678_s24 + $0x32] sm:$0xff] }
  0x24   : > { %v5866_v44 = vld [vmem:[%s7473_s1 + $0x28] sm:$0xff]  ;;  %v5875_v46 = vld [vmem:[%s7473_s1 + $0x30] sm:$0xff]  ;;  %7532 = vst [vmem:[#allocation10_spill] sm:$0xff] %v5888_v49  ;;  %v5899_v50 = vld [vmem:[%s5678_s24 + $0x39] sm:$0xff] }
  0x25   : > { %5156 = vmatmul.mubr.msk.f32.gmra.mxu1 %vm258_vm1, %v5756_v19  ;;  %v5870_v45 = vld [vmem:[%s5678_s24 + $0x21] sm:$0xff]  ;;  %v5907_v52 = vld [vmem:[%s5678_s24 + $0x49] sm:$0xff]  ;;  %v5919_v54 = vld [vmem:[%s5678_s24 + $0x51] sm:$0xff] }
  0x26   : > { %5132 = vmatmul.mubr.msk.f32.gmra.mxu0 %vm258_vm1, %v5764_v21  ;;  %5158 = vmatprep.mubr.msk.f32.mxu1 %vm258_vm1, %v5767_v22  ;;  %v5880_v47 = vld [vmem:[%s5678_s24 + $0x22] sm:$0xff]  ;;  %v5904_v51 = vld [vmem:[%s5678_s24 + $0x3a] sm:$0xff]  ;;  %v5910_v53 = vld [vmem:[%s5678_s24 + $0x4a] sm:$0xff] }
  0x27   : > { %5134 = vmatprep.mubr.msk.f32.mxu0 %vm258_vm1, %v5770_v23  ;;  %7531 = vst [vmem:[#allocation9_spill] sm:$0xff] %v5880_v47  ;;  %7533 = vst [vmem:[#allocation11_spill] sm:$0xff] %v5904_v51  ;;  %v5924_v55 = vld [vmem:[%s5678_s24 + $0x52] sm:$0xff]  ;;  %v5927_v56 = vld [vmem:[%s5678_s24 + $0x61] sm:$0xff] }
  0x28   : > { %7534 = vst [vmem:[#allocation12_spill] sm:$0xff] %v5910_v53  ;;  %7535 = vst [vmem:[#allocation13_spill] sm:$0xff] %v5924_v55  ;;  %v5930_v57 = vld [vmem:[%s5678_s24 + $0x62] sm:$0xff]  ;;  %v5944_v59 = vld [vmem:[%s5678_s24 + $0x6a] sm:$0xff] }
  0x29   : > { %5159 = vmatmul.mubr.msk.f32.gmra.mxu1 %vm258_vm1, %v5779_v24  ;;  %7536 = vst [vmem:[#allocation14_spill] sm:$0xff] %v5930_v57  ;;  %v5939_v58 = vld [vmem:[%s5678_s24 + $0x69] sm:$0xff]  ;;  %7537 = vst [vmem:[#allocation15_spill] sm:$0xff] %v5944_v59  ;;  %v5947_v60 = vld [vmem:[%s5678_s24 + $0x79] sm:$0xff] }
  0x2a   : > { %5135 = vmatmul.mubr.msk.f32.gmra.mxu0 %vm258_vm1, %v5784_v25  ;;  %5161 = vmatprep.mubr.msk.f32.mxu1 %vm258_vm1, %v5787_v26  ;;  %v5950_v61 = vld [vmem:[%s5678_s24 + $0x7a] sm:$0xff]  ;;  %v5964_v63 = vld [vmem:[%s5678_s24 + $0x82] sm:$0xff]  ;;  %v5967_v0 = vld [vmem:[%s5678_s24 + $0x91] sm:$0xff] }
  0x2b   : > { %5137 = vmatprep.mubr.msk.f32.mxu0 %vm258_vm1, %v5790_v27  ;;  %7538 = vst [vmem:[#allocation16_spill] sm:$0xff] %v5950_v61  ;;  %v5959_v62 = vld [vmem:[%s5678_s24 + $0x81] sm:$0xff]  ;;  %7539 = vst [vmem:[#allocation17_spill] sm:$0xff] %v5964_v63  ;;  %v5970_v1 = vld [vmem:[%s5678_s24 + $0x92] sm:$0xff] }
  0x2c   : > { %7540 = vst [vmem:[#allocation18_spill] sm:$0xff] %v5970_v1  ;;  %v5979_v3 = vld [vmem:[%s5678_s24 + $0x99] sm:$0xff]  ;;  %v5987_v6 = vld [vmem:[%s5678_s24 + $0xa9] sm:$0xff] }
  0x2d   : > { %5162 = vmatmul.mubr.msk.f32.gmra.mxu1 %vm258_vm1, %v5799_v28  ;;  %v5984_v5 = vld [vmem:[%s5678_s24 + $0x9a] sm:$0xff]  ;;  %v5990_v7 = vld [vmem:[%s5678_s24 + $0xaa] sm:$0xff] }
  0x2e   : > { %5138 = vmatmul.mubr.msk.f32.gmra.mxu0 %vm258_vm1, %v5804_v29  ;;  %5164 = vmatprep.mubr.msk.f32.mxu1 %vm258_vm1, %v5807_v30  ;;  %7541 = vst [vmem:[#allocation19_spill] sm:$0xff] %v5984_v5  ;;  %7542 = vst [vmem:[#allocation20_spill] sm:$0xff] %v5990_v7 }
  0x2f   : > { %5140 = vmatprep.mubr.msk.f32.mxu0 %vm258_vm1, %v5810_v31 }
  0x31   : > { %5165 = vmatmul.mubr.msk.f32.gmra.mxu1 %vm258_vm1, %v5819_v32 }
  0x32   : > { %5141 = vmatmul.mubr.msk.f32.gmra.mxu0 %vm258_vm1, %v5824_v33  ;;  %5167 = vmatprep.mubr.msk.f32.mxu1 %vm258_vm1, %v5827_v34 }
  0x33   : > { %5143 = vmatprep.mubr.msk.f32.mxu0 %vm258_vm1, %v5830_v35 }
  0x35   : > { %5168 = vmatmul.mubr.msk.f32.gmra.mxu1 %vm258_vm1, %v5839_v36  ;;  %v6150_v36 = vld [vmem:[%s5678_s24 + $0x16a] sm:$0xff] }
  0x36   : > { %5144 = vmatmul.mubr.msk.f32.gmra.mxu0 %vm258_vm1, %v5844_v37  ;;  %5172 = vmatprep.mubr.msk.f32.mxu1 %vm258_vm1, %v612_v38  ;;  %v6007_v38 = vld [vmem:[%s5678_s24 + $0xc1] sm:$0xff]  ;;  %7557 = vst [vmem:[#allocation35_spill] sm:$0xff] %v6150_v36 }
  0x37   : > { %5222 = vmatprep.mubr.msk.f32.mxu0 %vm258_vm1, %v999_v39  ;;  %v6010_v39 = vld [vmem:[%s5678_s24 + $0xc2] sm:$0xff] }
  0x38   : > { %7544 = vst [vmem:[#allocation22_spill] sm:$0xff] %v6010_v39 }
  0x39   : > { %5173 = vmatmul.mubr.msk.f32.vlgmr.msra.gmra.mxu1 %vm258_vm1, %v613_v40  ;;  %v6019_v40 = vld [vmem:[%s5678_s24 + $0xc9] sm:$0xff] }
  0x3a   : > { %5223 = vmatmul.mubr.msk.f32.vlgmr.msra.gmra.mxu0 %vm258_vm1, %v1000_v41  ;;  %5271 = vmatpush3.msra.mxu1 %v4459_v18  ;;  %v5999_v18 = vld [vmem:[%s5678_s24 + $0xb1] sm:$0xff] }
  0x3b   : > { %5175 = vmatprep.mubr.msk.f32.mxu1 %vm258_vm1, %v5857_v42  ;;  %5321 = vmatpush3.msra.mxu0 %v4524_v20  ;;  %v6004_v20 = vld [vmem:[%s5678_s24 + $0xb2] sm:$0xff]  ;;  %v6024_v41 = vld [vmem:[%s5678_s24 + $0xca] sm:$0xff] }
  0x3c   : > { %5225 = vmatprep.mubr.msk.f32.mxu0 %vm258_vm1, %v5861_v43  ;;  %5370 = vmatprep.subr.mxu1 %v5866_v44  ;;  %7543 = vst [vmem:[#allocation21_spill] sm:$0xff] %v6004_v20  ;;  %7545 = vst [vmem:[#allocation23_spill] sm:$0xff] %v6024_v41  ;;  %v6147_v43 = vld [vmem:[%s5678_s24 + $0x169] sm:$0xff] }
  0x3d   : > { %5176 = vmatmul.mubr.msk.f32.gmra.mxu1 %vm258_vm1, %v5870_v45  ;;  %5420 = vmatprep.subr.mxu0 %v5875_v46 }
  0x3e   : > { %5226 = vmatmul.mubr.msk.f32.gmra.mxu0 %vm258_vm1, %v5880_v47  ;;  %5178 = vmatprep.mubr.msk.f32.mxu1 %vm258_vm1, %v5883_v48  ;;  %v6130_v47 = vld [vmem:[%s5678_s24 + $0x152] sm:$0xff] }
  0x3f   : > { %5228 = vmatprep.mubr.msk.f32.mxu0 %vm258_vm1, %v5888_v49  ;;  %v6127_v49 = vld [vmem:[%s5678_s24 + $0x151] sm:$0xff]  ;;  %7556 = vst [vmem:[#allocation34_spill] sm:$0xff] %v6130_v47 }
  0x41   : > { %5179 = vmatmul.mubr.msk.f32.gmra.mxu1 %vm258_vm1, %v5899_v50 }
  0x42   : > { %5229 = vmatmul.mubr.msk.f32.gmra.mxu0 %vm258_vm1, %v5904_v51  ;;  %5181 = vmatprep.mubr.msk.f32.mxu1 %vm258_vm1, %v5907_v52  ;;  %v6110_v51 = vld [vmem:[%s5678_s24 + $0x13a] sm:$0xff] }
  0x43   : > { %5231 = vmatprep.mubr.msk.f32.mxu0 %vm258_vm1, %v5910_v53  ;;  %v6107_v53 = vld [vmem:[%s5678_s24 + $0x139] sm:$0xff]  ;;  %7554 = vst [vmem:[#allocation32_spill] sm:$0xff] %v6110_v51 }
  0x45   : > { %5182 = vmatmul.mubr.msk.f32.gmra.mxu1 %vm258_vm1, %v5919_v54 }
  0x46   : > { %5232 = vmatmul.mubr.msk.f32.gmra.mxu0 %vm258_vm1, %v5924_v55  ;;  %5184 = vmatprep.mubr.msk.f32.mxu1 %vm258_vm1, %v5927_v56  ;;  %v6090_v55 = vld [vmem:[%s5678_s24 + $0x122] sm:$0xff] }
  0x47   : > { %5234 = vmatprep.mubr.msk.f32.mxu0 %vm258_vm1, %v5930_v57  ;;  %v6087_v57 = vld [vmem:[%s5678_s24 + $0x121] sm:$0xff]  ;;  %7552 = vst [vmem:[#allocation30_spill] sm:$0xff] %v6090_v55 }
  0x49   : > { %5185 = vmatmul.mubr.msk.f32.gmra.mxu1 %vm258_vm1, %v5939_v58 }
  0x4a   : > { %5235 = vmatmul.mubr.msk.f32.gmra.mxu0 %vm258_vm1, %v5944_v59  ;;  %5187 = vmatprep.mubr.msk.f32.mxu1 %vm258_vm1, %v5947_v60  ;;  %v6070_v59 = vld [vmem:[%s5678_s24 + $0x10a] sm:$0xff] }
  0x4b   : > { %5237 = vmatprep.mubr.msk.f32.mxu0 %vm258_vm1, %v5950_v61  ;;  %v6067_v61 = vld [vmem:[%s5678_s24 + $0x109] sm:$0xff]  ;;  %7550 = vst [vmem:[#allocation28_spill] sm:$0xff] %v6070_v59 }
  0x4d   : > { %5188 = vmatmul.mubr.msk.f32.gmra.mxu1 %vm258_vm1, %v5959_v62 }
  0x4e   : > { %5238 = vmatmul.mubr.msk.f32.gmra.mxu0 %vm258_vm1, %v5964_v63  ;;  %5190 = vmatprep.mubr.msk.f32.mxu1 %vm258_vm1, %v5967_v0  ;;  %v6050_v63 = vld [vmem:[%s5678_s24 + $0xf2] sm:$0xff] }
  0x4f   : > { %5240 = vmatprep.mubr.msk.f32.mxu0 %vm258_vm1, %v5970_v1  ;;  %v6047_v1 = vld [vmem:[%s5678_s24 + $0xf1] sm:$0xff]  ;;  %7548 = vst [vmem:[#allocation26_spill] sm:$0xff] %v6050_v63 }
  0x51   : > { %5191 = vmatmul.mubr.msk.f32.gmra.mxu1 %vm258_vm1, %v5979_v3 }
  0x52   : > { %5241 = vmatmul.mubr.msk.f32.gmra.mxu0 %vm258_vm1, %v5984_v5  ;;  %5193 = vmatprep.mubr.msk.f32.mxu1 %vm258_vm1, %v5987_v6  ;;  %v6030_v5 = vld [vmem:[%s5678_s24 + $0xda] sm:$0xff] }
  0x53   : > { %5243 = vmatprep.mubr.msk.f32.mxu0 %vm258_vm1, %v5990_v7  ;;  %v6027_v7 = vld [vmem:[%s5678_s24 + $0xd9] sm:$0xff]  ;;  %7546 = vst [vmem:[#allocation24_spill] sm:$0xff] %v6030_v5 }
  0x55   : > { %5194 = vmatmul.mubr.msk.f32.gmra.mxu1 %vm258_vm1, %v5999_v18 }
  0x56   : > { %5244 = vmatmul.mubr.msk.f32.gmra.mxu0 %vm258_vm1, %v6004_v20  ;;  %5196 = vmatprep.mubr.msk.f32.mxu1 %vm258_vm1, %v6007_v38  ;;  %v6039_v20 = vld [vmem:[%s5678_s24 + $0xe1] sm:$0xff] }
  0x57   : > { %5246 = vmatprep.mubr.msk.f32.mxu0 %vm258_vm1, %v6010_v39  ;;  %v6044_v39 = vld [vmem:[%s5678_s24 + $0xe2] sm:$0xff] }
  0x58   : > { %7547 = vst [vmem:[#allocation25_spill] sm:$0xff] %v6044_v39 }
  0x59   : > { %5197 = vmatmul.mubr.msk.f32.gmra.mxu1 %vm258_vm1, %v6019_v40 }
  0x5a   : > { %5247 = vmatmul.mubr.msk.f32.gmra.mxu0 %vm258_vm1, %v6024_v41  ;;  %5199 = vmatprep.mubr.msk.f32.mxu1 %vm258_vm1, %v6027_v7  ;;  %v6059_v41 = vld [vmem:[%s5678_s24 + $0xf9] sm:$0xff] }
  0x5b   : > { %5249 = vmatprep.mubr.msk.f32.mxu0 %vm258_vm1, %v6030_v5  ;;  %v6064_v5 = vld [vmem:[%s5678_s24 + $0xfa] sm:$0xff] }
  0x5c   : > { %7549 = vst [vmem:[#allocation27_spill] sm:$0xff] %v6064_v5 }
  0x5d   : > { %5200 = vmatmul.mubr.msk.f32.gmra.mxu1 %vm258_vm1, %v6039_v20 }
  0x5e   : > { %5250 = vmatmul.mubr.msk.f32.gmra.mxu0 %vm258_vm1, %v6044_v39  ;;  %5202 = vmatprep.mubr.msk.f32.mxu1 %vm258_vm1, %v6047_v1  ;;  %v6079_v39 = vld [vmem:[%s5678_s24 + $0x111] sm:$0xff] }
  0x5f   : > { %5252 = vmatprep.mubr.msk.f32.mxu0 %vm258_vm1, %v6050_v63  ;;  %v6084_v63 = vld [vmem:[%s5678_s24 + $0x112] sm:$0xff] }
  0x60   : > { %7551 = vst [vmem:[#allocation29_spill] sm:$0xff] %v6084_v63 }
  0x61   : > { %5203 = vmatmul.mubr.msk.f32.gmra.mxu1 %vm258_vm1, %v6059_v41 }
  0x62   : > { %5253 = vmatmul.mubr.msk.f32.gmra.mxu0 %vm258_vm1, %v6064_v5  ;;  %5205 = vmatprep.mubr.msk.f32.mxu1 %vm258_vm1, %v6067_v61  ;;  %v6099_v5 = vld [vmem:[%s5678_s24 + $0x129] sm:$0xff] }
  0x63   : > { %5255 = vmatprep.mubr.msk.f32.mxu0 %vm258_vm1, %v6070_v59  ;;  %v6104_v59 = vld [vmem:[%s5678_s24 + $0x12a] sm:$0xff] }
  0x64   : > { %7553 = vst [vmem:[#allocation31_spill] sm:$0xff] %v6104_v59 }
  0x65   : > { %5206 = vmatmul.mubr.msk.f32.gmra.mxu1 %vm258_vm1, %v6079_v39 }
  0x66   : > { %5256 = vmatmul.mubr.msk.f32.gmra.mxu0 %vm258_vm1, %v6084_v63  ;;  %5208 = vmatprep.mubr.msk.f32.mxu1 %vm258_vm1, %v6087_v57  ;;  %v6119_v63 = vld [vmem:[%s5678_s24 + $0x141] sm:$0xff] }
  0x67   : > { %5258 = vmatprep.mubr.msk.f32.mxu0 %vm258_vm1, %v6090_v55  ;;  %v6124_v55 = vld [vmem:[%s5678_s24 + $0x142] sm:$0xff] }
  0x68   : > { %7555 = vst [vmem:[#allocation33_spill] sm:$0xff] %v6124_v55 }
  0x69   : > { %5209 = vmatmul.mubr.msk.f32.gmra.mxu1 %vm258_vm1, %v6099_v5 }
  0x6a   : > { %5259 = vmatmul.mubr.msk.f32.gmra.mxu0 %vm258_vm1, %v6104_v59  ;;  %5211 = vmatprep.mubr.msk.f32.mxu1 %vm258_vm1, %v6107_v53  ;;  %v6139_v59 = vld [vmem:[%s5678_s24 + $0x159] sm:$0xff] }
  0x6b   : > { %5261 = vmatprep.mubr.msk.f32.mxu0 %vm258_vm1, %v6110_v51  ;;  %v6144_v51 = vld [vmem:[%s5678_s24 + $0x15a] sm:$0xff] }
  0x6d   : > { %5212 = vmatmul.mubr.msk.f32.gmra.mxu1 %vm258_vm1, %v6119_v63 }
  0x6e   : > { %5262 = vmatmul.mubr.msk.f32.gmra.mxu0 %vm258_vm1, %v6124_v55  ;;  %5214 = vmatprep.mubr.msk.f32.mxu1 %vm258_vm1, %v6127_v49  ;;  %v6159_v55 = vld [vmem:[%s5678_s24 + $0x171] sm:$0xff] }
  0x6f   : > { %5264 = vmatprep.mubr.msk.f32.mxu0 %vm258_vm1, %v6130_v47  ;;  %v6164_v47 = vld [vmem:[%s5678_s24 + $0x172] sm:$0xff] }
  0x71   : > { %5215 = vmatmul.mubr.msk.f32.gmra.mxu1 %vm258_vm1, %v6139_v59 }
  0x72   : > { %5265 = vmatmul.mubr.msk.f32.gmra.mxu0 %vm258_vm1, %v6144_v51  ;;  %5217 = vmatprep.mubr.msk.f32.mxu1 %vm258_vm1, %v6147_v43 }
  0x73   : > { %5267 = vmatprep.mubr.msk.f32.mxu0 %vm258_vm1, %v6150_v36  ;;  %v6179_v36 = vld [vmem:[%s7473_s1 + $0x38] sm:$0xff] }
  0x75   : > { %5218 = vmatmul.mubr.msk.f32.gmra.mxu1 %vm258_vm1, %v6159_v55 }
  0x76   : > { %5268 = vmatmul.mubr.msk.f32.gmra.mxu0 %vm258_vm1, %v6164_v47  ;;  %5272 = vmatprep.mubr.msk.f32.mxu1 %vm258_vm1, %v5707_v9  ;;  %v6187_v9 = vld [vmem:[%s7473_s1 + $0x40] sm:$0xff] }
  0x77   : > { %5322 = vmatprep.mubr.msk.f32.mxu0 %vm258_vm1, %v5857_v42  ;;  %v6304_v42 = vld [vmem:[%s5678_s24 + $0x181] sm:$0xff] }
  0x78   : > { %7558 = vst [vmem:[#allocation36_spill] sm:$0xff] %v6304_v42 }
  0x79   : > { %5273 = vmatmul.mubr.msk.f32.vlgmr.msra.gmra.mxu1 %vm258_vm1, %v5716_v11  ;;  %v6301_v11 = vld [vmem:[%s5678_s24 + $0x180] sm:$0xff] }
  0x7a   : > { %5323 = vmatmul.mubr.msk.f32.vlgmr.msra.gmra.mxu0 %vm258_vm1, %v5870_v45  ;;  %5371 = vmatpush3.msra.mxu1 %v5866_v44  ;;  %v7559_v44 = vld [vmem:[#allocation7_spill] sm:$0xff] }
  0x7b   : > { %5275 = vmatprep.mubr.msk.f32.mxu1 %vm258_vm1, %v5724_v13  ;;  %5421 = vmatpush3.msra.mxu0 %v5875_v46  ;;  %v6313_v45 = vld [vmem:[%s5678_s24 + $0x188] sm:$0xff] }
  0x7c   : > { %5325 = vmatprep.mubr.msk.f32.mxu0 %vm258_vm1, %v5883_v48  ;;  %5470 = vmatprep.subr.mxu1 %v6179_v36  ;;  %v6318_v46 = vld [vmem:[%s5678_s24 + $0x189] sm:$0xff] }
  0x7d   : > { %5276 = vmatmul.mubr.msk.f32.gmra.mxu1 %vm258_vm1, %v5738_v15  ;;  %5520 = vmatprep.subr.mxu0 %v6187_v9  ;;  %7560 = vst [vmem:[#allocation7_spill] sm:$0xff] %v6318_v46 }
  0x7e   : > { %5326 = vmatmul.mubr.msk.f32.gmra.mxu0 %vm258_vm1, %v5899_v50  ;;  %5278 = vmatprep.mubr.msk.f32.mxu1 %vm258_vm1, %v5744_v17 }
  0x7f   : > { %5328 = vmatprep.mubr.msk.f32.mxu0 %vm258_vm1, %v5907_v52 }
  0x81   : > { %5279 = vmatmul.mubr.msk.f32.gmra.mxu1 %vm258_vm1, %v5764_v21 }
  0x82   : > { %5329 = vmatmul.mubr.msk.f32.gmra.mxu0 %vm258_vm1, %v5919_v54  ;;  %5281 = vmatprep.mubr.msk.f32.mxu1 %vm258_vm1, %v5770_v23 }
  0x83   : > { %5331 = vmatprep.mubr.msk.f32.mxu0 %vm258_vm1, %v5927_v56 }
  0x85   : > { %5282 = vmatmul.mubr.msk.f32.gmra.mxu1 %vm258_vm1, %v5784_v25 }
  0x86   : > { %5332 = vmatmul.mubr.msk.f32.gmra.mxu0 %vm258_vm1, %v5939_v58  ;;  %5284 = vmatprep.mubr.msk.f32.mxu1 %vm258_vm1, %v5790_v27 }
  0x87   : > { %5334 = vmatprep.mubr.msk.f32.mxu0 %vm258_vm1, %v5947_v60 }
  0x89   : > { %5285 = vmatmul.mubr.msk.f32.gmra.mxu1 %vm258_vm1, %v5804_v29 }
  0x8a   : > { %5335 = vmatmul.mubr.msk.f32.gmra.mxu0 %vm258_vm1, %v5959_v62  ;;  %5287 = vmatprep.mubr.msk.f32.mxu1 %vm258_vm1, %v5810_v31 }
  0x8b   : > { %5337 = vmatprep.mubr.msk.f32.mxu0 %vm258_vm1, %v5967_v0 }
  0x8d   : > { %5288 = vmatmul.mubr.msk.f32.gmra.mxu1 %vm258_vm1, %v5824_v33 }
  0x8e   : > { %5338 = vmatmul.mubr.msk.f32.gmra.mxu0 %vm258_vm1, %v5979_v3  ;;  %5290 = vmatprep.mubr.msk.f32.mxu1 %vm258_vm1, %v5830_v35 }
  0x8f   : > { %5340 = vmatprep.mubr.msk.f32.mxu0 %vm258_vm1, %v5987_v6 }
  0x91   : > { %5291 = vmatmul.mubr.msk.f32.gmra.mxu1 %vm258_vm1, %v5844_v37 }
  0x92   : > { %5341 = vmatmul.mubr.msk.f32.gmra.mxu0 %vm258_vm1, %v5999_v18  ;;  %5293 = vmatprep.mubr.msk.f32.mxu1 %vm258_vm1, %v5685_v2 }
  0x93   : > { %5343 = vmatprep.mubr.msk.f32.mxu0 %vm258_vm1, %v6007_v38 }
  0x95   : > { %5294 = vmatmul.mubr.msk.f32.gmra.mxu1 %vm258_vm1, %v5689_v4 }
  0x96   : > { %5344 = vmatmul.mubr.msk.f32.gmra.mxu0 %vm258_vm1, %v6019_v40  ;;  %5296 = vmatprep.mubr.msk.f32.mxu1 %vm258_vm1, %v5702_v8 }
  0x97   : > { %5346 = vmatprep.mubr.msk.f32.mxu0 %vm258_vm1, %v6027_v7 }
  0x99   : > { %5297 = vmatmul.mubr.msk.f32.gmra.mxu1 %vm258_vm1, %v5711_v10 }
  0x9a   : > { %5347 = vmatmul.mubr.msk.f32.gmra.mxu0 %vm258_vm1, %v6039_v20  ;;  %5299 = vmatprep.mubr.msk.f32.mxu1 %vm258_vm1, %v5719_v12 }
  0x9b   : > { %5349 = vmatprep.mubr.msk.f32.mxu0 %vm258_vm1, %v6047_v1 }
  0x9d   : > { %5300 = vmatmul.mubr.msk.f32.gmra.mxu1 %vm258_vm1, %v5733_v14 }
  0x9e   : > { %5350 = vmatmul.mubr.msk.f32.gmra.mxu0 %vm258_vm1, %v6059_v41  ;;  %5302 = vmatprep.mubr.msk.f32.mxu1 %vm258_vm1, %v5741_v16 }
  0x9f   : > { %5352 = vmatprep.mubr.msk.f32.mxu0 %vm258_vm1, %v6067_v61  ;;  %v7580_v61 = vld [vmem:[#allocation27_spill] sm:$0xff] }
  0xa1   : > { %5303 = vmatmul.mubr.msk.f32.gmra.mxu1 %vm258_vm1, %v5756_v19 }
  0xa2   : > { %5353 = vmatmul.mubr.msk.f32.gmra.mxu0 %vm258_vm1, %v6079_v39  ;;  %5305 = vmatprep.mubr.msk.f32.mxu1 %vm258_vm1, %v5767_v22 }
  0xa3   : > { %5355 = vmatprep.mubr.msk.f32.mxu0 %vm258_vm1, %v6087_v57 }
  0xa5   : > { %5306 = vmatmul.mubr.msk.f32.gmra.mxu1 %vm258_vm1, %v5779_v24 }
  0xa6   : > { %5356 = vmatmul.mubr.msk.f32.gmra.mxu0 %vm258_vm1, %v6099_v5  ;;  %5308 = vmatprep.mubr.msk.f32.mxu1 %vm258_vm1, %v5787_v26 }
  0xa7   : > { %5358 = vmatprep.mubr.msk.f32.mxu0 %vm258_vm1, %v6107_v53  ;;  %v7563_v53 = vld [vmem:[#allocation10_spill] sm:$0xff] }
  0xa9   : > { %5309 = vmatmul.mubr.msk.f32.gmra.mxu1 %vm258_vm1, %v5799_v28 }
  0xaa   : > { %5359 = vmatmul.mubr.msk.f32.gmra.mxu0 %vm258_vm1, %v6119_v63  ;;  %5311 = vmatprep.mubr.msk.f32.mxu1 %vm258_vm1, %v5807_v30 }
  0xab   : > { %5361 = vmatprep.mubr.msk.f32.mxu0 %vm258_vm1, %v6127_v49  ;;  %v7562_v49 = vld [vmem:[#allocation9_spill] sm:$0xff] }
  0xad   : > { %5312 = vmatmul.mubr.msk.f32.gmra.mxu1 %vm258_vm1, %v5819_v32 }
  0xae   : > { %5362 = vmatmul.mubr.msk.f32.gmra.mxu0 %vm258_vm1, %v6139_v59  ;;  %5314 = vmatprep.mubr.msk.f32.mxu1 %vm258_vm1, %v5827_v34 }
  0xaf   : > { %5364 = vmatprep.mubr.msk.f32.mxu0 %vm258_vm1, %v6147_v43  ;;  %v7561_v43 = vld [vmem:[#allocation8_spill] sm:$0xff] }
  0xb1   : > { %5315 = vmatmul.mubr.msk.f32.gmra.mxu1 %vm258_vm1, %v7559_v44 }
  0xb2   : > { %5365 = vmatmul.mubr.msk.f32.gmra.mxu0 %vm258_vm1, %v6159_v55  ;;  %5317 = vmatprep.mubr.msk.f32.mxu1 %vm258_vm1, %v6301_v11  ;;  %v7564_v55 = vld [vmem:[#allocation11_spill] sm:$0xff] }
  0xb3   : > { %5367 = vmatprep.mubr.msk.f32.mxu0 %vm258_vm1, %v6304_v42  ;;  %v7589_v42 = vld [vmem:[#allocation33_spill] sm:$0xff] }
  0xb5   : > { %5318 = vmatmul.mubr.msk.f32.gmra.mxu1 %vm258_vm1, %v6313_v45 }
  0xb6   : > { %5368 = vmatmul.mubr.msk.f32.gmra.mxu0 %vm258_vm1, %v6318_v46  ;;  %5372 = vmatprep.mubr.msk.f32.mxu1 %vm258_vm1, %v7561_v43 }
  0xb7   : > { %5422 = vmatprep.mubr.msk.f32.mxu0 %vm258_vm1, %v5724_v13  ;;  %v7565_v13 = vld [vmem:[#allocation12_spill] sm:$0xff] }
  0xb9   : > { %5373 = vmatmul.mubr.msk.f32.vlgmr.msra.gmra.mxu1 %vm258_vm1, %v7562_v49 }
  0xba   : > { %5423 = vmatmul.mubr.msk.f32.vlgmr.msra.gmra.mxu0 %vm258_vm1, %v5738_v15  ;;  %5471 = vmatpush3.msra.mxu1 %v6179_v36  ;;  %v7566_v15 = vld [vmem:[#allocation13_spill] sm:$0xff]  ;;  %v7567_v36 = vld [vmem:[#allocation14_spill] sm:$0xff] }
  0xbb   : > { %5375 = vmatprep.mubr.msk.f32.mxu1 %vm258_vm1, %v7563_v53  ;;  %5521 = vmatpush3.msra.mxu0 %v6187_v9  ;;  %v7582_v9 = vld [vmem:[#allocation29_spill] sm:$0xff] }
  0xbc   : > { %5425 = vmatprep.mubr.msk.f32.mxu0 %vm258_vm1, %v5744_v17  ;;  %v7568_v17 = vld [vmem:[#allocation15_spill] sm:$0xff] }
  0xbd   : > { %5376 = vmatmul.mubr.msk.f32.gmra.mxu1 %vm258_vm1, %v7564_v55 }
  0xbe   : > { %5426 = vmatmul.mubr.msk.f32.gmra.mxu0 %vm258_vm1, %v5764_v21  ;;  %5378 = vmatprep.mubr.msk.f32.mxu1 %vm258_vm1, %v7565_v13  ;;  %v7569_v21 = vld [vmem:[#allocation16_spill] sm:$0xff] }
  0xbf   : > { %5428 = vmatprep.mubr.msk.f32.mxu0 %vm258_vm1, %v5770_v23  ;;  %v7570_v23 = vld [vmem:[#allocation17_spill] sm:$0xff] }
  0xc1   : > { %5379 = vmatmul.mubr.msk.f32.gmra.mxu1 %vm258_vm1, %v7566_v15 }
  0xc2   : > { %5429 = vmatmul.mubr.msk.f32.gmra.mxu0 %vm258_vm1, %v5784_v25  ;;  %5381 = vmatprep.mubr.msk.f32.mxu1 %vm258_vm1, %v7567_v36  ;;  %v7571_v25 = vld [vmem:[#allocation18_spill] sm:$0xff] }
  0xc3   : > { %5431 = vmatprep.mubr.msk.f32.mxu0 %vm258_vm1, %v5790_v27  ;;  %v7572_v27 = vld [vmem:[#allocation19_spill] sm:$0xff] }
  0xc5   : > { %5382 = vmatmul.mubr.msk.f32.gmra.mxu1 %vm258_vm1, %v7568_v17 }
  0xc6   : > { %5432 = vmatmul.mubr.msk.f32.gmra.mxu0 %vm258_vm1, %v5804_v29  ;;  %5384 = vmatprep.mubr.msk.f32.mxu1 %vm258_vm1, %v7569_v21  ;;  %v7573_v29 = vld [vmem:[#allocation20_spill] sm:$0xff] }
  0xc7   : > { %5434 = vmatprep.mubr.msk.f32.mxu0 %vm258_vm1, %v5810_v31  ;;  %v7574_v31 = vld [vmem:[#allocation21_spill] sm:$0xff] }
  0xc9   : > { %5385 = vmatmul.mubr.msk.f32.gmra.mxu1 %vm258_vm1, %v7570_v23 }
  0xca   : > { %5435 = vmatmul.mubr.msk.f32.gmra.mxu0 %vm258_vm1, %v5824_v33  ;;  %5387 = vmatprep.mubr.msk.f32.mxu1 %vm258_vm1, %v7571_v25  ;;  %v7575_v33 = vld [vmem:[#allocation22_spill] sm:$0xff] }
  0xcb   : > { %5437 = vmatprep.mubr.msk.f32.mxu0 %vm258_vm1, %v5830_v35  ;;  %v7576_v35 = vld [vmem:[#allocation23_spill] sm:$0xff] }
  0xcd   : > { %5388 = vmatmul.mubr.msk.f32.gmra.mxu1 %vm258_vm1, %v7572_v27 }
  0xce   : > { %5438 = vmatmul.mubr.msk.f32.gmra.mxu0 %vm258_vm1, %v5844_v37  ;;  %5390 = vmatprep.mubr.msk.f32.mxu1 %vm258_vm1, %v7573_v29  ;;  %v7577_v37 = vld [vmem:[#allocation24_spill] sm:$0xff] }
  0xcf   : > { %5440 = vmatprep.mubr.msk.f32.mxu0 %vm258_vm1, %v5685_v2 }
  0xd1   : > { %5391 = vmatmul.mubr.msk.f32.gmra.mxu1 %vm258_vm1, %v7574_v31 }
  0xd2   : > { %5441 = vmatmul.mubr.msk.f32.gmra.mxu0 %vm258_vm1, %v5689_v4  ;;  %5393 = vmatprep.mubr.msk.f32.mxu1 %vm258_vm1, %v7575_v33  ;;  %v7578_v4 = vld [vmem:[#allocation25_spill] sm:$0xff] }
  0xd3   : > { %5443 = vmatprep.mubr.msk.f32.mxu0 %vm258_vm1, %v5702_v8  ;;  %v7579_v8 = vld [vmem:[#allocation26_spill] sm:$0xff] }
  0xd5   : > { %5394 = vmatmul.mubr.msk.f32.gmra.mxu1 %vm258_vm1, %v7576_v35 }
  0xd6   : > { %5444 = vmatmul.mubr.msk.f32.gmra.mxu0 %vm258_vm1, %v5711_v10  ;;  %5396 = vmatprep.mubr.msk.f32.mxu1 %vm258_vm1, %v7577_v37 }
  0xd7   : > { %5446 = vmatprep.mubr.msk.f32.mxu0 %vm258_vm1, %v5719_v12 }
  0xd9   : > { %v6394_v2 = vpop.f32.mrf.mxu1  ;;  %5397 = vmatmul.mubr.msk.f32.gmra.mxu1 %vm258_vm1, %v7578_v4 }
  0xda   : > { %v6398_v57 = vpop.f32.mrf.mxu0  ;;  %5447 = vmatmul.mubr.msk.f32.gmra.mxu0 %vm258_vm1, %v5733_v14  ;;  %5399 = vmatprep.mubr.msk.f32.mxu1 %vm258_vm1, %v7579_v8  ;;  %v7581_v14 = vld [vmem:[#allocation28_spill] sm:$0xff] }
  0xdb   : > { %v6404_v10 = vpop.f32.mrf.mxu1  ;;  %5449 = vmatprep.mubr.msk.f32.mxu0 %vm258_vm1, %v5741_v16 }
  0xdc   : > { %v6408_v59 = vpop.f32.mrf.mxu0 }
  0xdd   : > { %v6410_v12 = vpop.f32.mrf.mxu1  ;;  %5400 = vmatmul.mubr.msk.f32.gmra.mxu1 %vm258_vm1, %v7580_v61 }
  0xde   : > { %v6414_v63 = vpop.f32.mrf.mxu0  ;;  %5450 = vmatmul.mubr.msk.f32.gmra.mxu0 %vm258_vm1, %v5756_v19  ;;  %5402 = vmatprep.mubr.msk.f32.mxu1 %vm258_vm1, %v7581_v14  ;;  %v7583_v19 = vld [vmem:[#allocation30_spill] sm:$0xff]  ;;  %v7585_v14 = vld [vmem:[#allocation31_spill] sm:$0xff] }
  0xdf   : > { %v6420_v5 = vpop.f32.mrf.mxu1  ;;  %5452 = vmatprep.mubr.msk.f32.mxu0 %vm258_vm1, %v5767_v22 }
  0xe0   : > { %v6424_v16 = vpop.f32.mrf.mxu0 }
  0xe1   : > { %v6426_v39 = vpop.f32.mrf.mxu1  ;;  %5403 = vmatmul.mubr.msk.f32.gmra.mxu1 %vm258_vm1, %v7582_v9 }
  0xe2   : > { %v6430_v43 = vpop.f32.mrf.mxu0  ;;  %5453 = vmatmul.mubr.msk.f32.gmra.mxu0 %vm258_vm1, %v5779_v24  ;;  %5405 = vmatprep.mubr.msk.f32.mxu1 %vm258_vm1, %v7583_v19  ;;  %v7586_v24 = vld [vmem:[#allocation32_spill] sm:$0xff] }
  0xe3   : > { %v6436_v49 = vpop.f32.mrf.mxu1  ;;  %5455 = vmatprep.mubr.msk.f32.mxu0 %vm258_vm1, %v5787_v26 }
  0xe4   : > { %v6440_v22 = vpop.f32.mrf.mxu0 }
  0xe5   : > { %v6442_v61 = vpop.f32.mrf.mxu1  ;;  %5406 = vmatmul.mubr.msk.f32.gmra.mxu1 %vm258_vm1, %v7585_v14 }
  0xe6   : > { %7584 = vst [vmem:[#allocation8_spill] sm:$0xff] %v6442_v61  ;;  %v6446_v9 = vpop.f32.mrf.mxu0  ;;  %5456 = vmatmul.mubr.msk.f32.gmra.mxu0 %vm258_vm1, %v5799_v28  ;;  %5408 = vmatprep.mubr.msk.f32.mxu1 %vm258_vm1, %v7586_v24  ;;  %v7590_v28 = vld [vmem:[#allocation34_spill] sm:$0xff] }
  0xe7   : > { %v6452_v19 = vpop.f32.mrf.mxu1  ;;  %5458 = vmatprep.mubr.msk.f32.mxu0 %vm258_vm1, %v5807_v30 }
  0xe8   : > { %7587 = vst [vmem:[#allocation9_spill] sm:$0xff] %v6452_v19  ;;  %v6456_v26 = vpop.f32.mrf.mxu0 }
  0xe9   : > { %v6458_v46 = vpop.f32.mrf.mxu1  ;;  %5409 = vmatmul.mubr.msk.f32.gmra.mxu1 %vm258_vm1, %v7589_v42 }
  0xea   : > { %7588 = vst [vmem:[#allocation10_spill] sm:$0xff] %v6458_v46  ;;  %v6462_v14 = vpop.f32.mrf.mxu0  ;;  %5459 = vmatmul.mubr.msk.f32.gmra.mxu0 %vm258_vm1, %v5819_v32  ;;  %5411 = vmatprep.mubr.msk.f32.mxu1 %vm258_vm1, %v7590_v28  ;;  %v7593_v32 = vld [vmem:[#allocation35_spill] sm:$0xff] }
  0xeb   : > { %v6468_v24 = vpop.f32.mrf.mxu1  ;;  %5461 = vmatprep.mubr.msk.f32.mxu0 %vm258_vm1, %v5827_v34  ;;  %v6489_v34 = vld [vmem:[%s5678_s24 + $0x182] sm:$0xff] }
  0xec   : > { %7591 = vst [vmem:[#allocation11_spill] sm:$0xff] %v6468_v24  ;;  %v6472_v30 = vpop.f32.mrf.mxu0  ;;  %7595 = vst [vmem:[#allocation14_spill] sm:$0xff] %v6489_v34  ;;  %v4652_v24 = vld [vmem:[%s5678_s24 + $0x198] sm:$0xff] }
  0xed   : > { %v6474_v46 = vpop.f32.mrf.mxu1  ;;  %5412 = vmatmul.mubr.msk.f32.gmra.mxu1 %vm258_vm1, %v6144_v51 }
  0xee   : > { %7592 = vst [vmem:[#allocation12_spill] sm:$0xff] %v6474_v46  ;;  %v6478_v42 = vpop.f32.mrf.mxu0  ;;  %5462 = vmatmul.mubr.msk.f32.gmra.mxu0 %vm258_vm1, %v7559_v44  ;;  %5414 = vmatprep.mubr.msk.f32.mxu1 %vm258_vm1, %v7593_v32  ;;  %v6505_v44 = vld [vmem:[%s5678_s24 + $0x18a] sm:$0xff]  ;;  %v4653_v32 = vld [vmem:[%s5678_s24 + $0x1a0] sm:$0xff] }
  0xef   : > { %v6484_v28 = vpop.f32.mrf.mxu1  ;;  %5464 = vmatprep.mubr.msk.f32.mxu0 %vm258_vm1, %v6301_v11  ;;  %7597 = vst [vmem:[#allocation16_spill] sm:$0xff] %v6505_v44 }
  0xf0   : > { %7594 = vst [vmem:[#allocation13_spill] sm:$0xff] %v6484_v28  ;;  %v6491_v46 = vpop.f32.mrf.mxu0 }
  0xf1   : > { %v6494_v51 = vpop.f32.mrf.mxu1  ;;  %5415 = vmatmul.mubr.msk.f32.gmra.mxu1 %vm258_vm1, %v6164_v47 }
  0xf2   : > { %7596 = vst [vmem:[#allocation15_spill] sm:$0xff] %v6494_v51  ;;  %v6498_v19 = vpop.f32.mrf.mxu0  ;;  %5465 = vmatmul.mubr.msk.f32.gmra.mxu0 %vm258_vm1, %v6313_v45  ;;  %5417 = vmatprep.mubr.msk.f32.mxu1 %vm258_vm1, %v6489_v34  ;;  %v6525_v45 = vld [vmem:[%s7474_s2] ss:$0 sm:$0xff] }
  0xf3   : > { %v6507_v11 = vpop.f32.mrf.mxu1  ;;  %5467 = vmatprep.mubr.msk.f32.mxu0 %vm258_vm1, %v4652_v24 }
  0xf4   : > { %7598 = vst [vmem:[#allocation17_spill] sm:$0xff] %v6507_v11  ;;  %v6511_v28 = vpop.f32.mrf.mxu0 }
  0xf5   : > { %v6513_v51 = vpop.f32.mrf.mxu1  ;;  %5418 = vmatmul.mubr.msk.f32.gmra.mxu1 %vm258_vm1, %v6505_v44 }
  0xf6   : > { %7599 = vst [vmem:[#allocation18_spill] sm:$0xff] %v6513_v51  ;;  %v6517_v47 = vpop.f32.mrf.mxu0  ;;  %5468 = vmatmul.mubr.msk.f32.gmra.mxu0 %vm258_vm1, %v4653_v32  ;;  %5472 = vmatprep.mubr.msk.f32.mxu1 %vm258_vm1, %v5883_v48  ;;  %v581_v51 = vadd.f32 %v6398_v57, %v6525_v45  ;;  %v580_v48 = vadd.f32 %v6525_v45, %v6408_v59 }
  0xf7   : > { %v6527_v24 = vpop.f32.mrf.mxu1  ;;  %5522 = vmatprep.mubr.msk.f32.mxu0 %vm258_vm1, %v7563_v53  ;;  %v583_v57 = vadd.f32 %v6414_v63, %v6525_v45 }
  0xf8   : > { %7600 = vst [vmem:[#allocation19_spill] sm:$0xff] %v6527_v24  ;;  %v6533_v44 = vpop.f32.mrf.mxu0 }
  0xf9   : > { %v5174_v11 = vpop.f32.mrf.mxu1  ;;  %5473 = vmatmul.mubr.msk.f32.vlgmr.msra.gmra.mxu1 %vm258_vm1, %v5899_v50 }
  0xfa   : > { %v968_v32 = vadd.f32 %v5174_v11, %v581_v51  ;;  %v5224_v34 = vpop.f32.mrf.mxu0  ;;  %5523 = vmatmul.mubr.msk.f32.vlgmr.msra.gmra.mxu0 %vm258_vm1, %v7564_v55  ;;  %5475 = vmatprep.mubr.msk.f32.mxu1 %vm258_vm1, %v5907_v52  ;;  %v582_v55 = vadd.f32 %v6525_v45, %v6424_v16 }
  0xfb   : > { %v808_v53 = vpop.f32.mrf.mxu1  ;;  %5525 = vmatprep.mubr.msk.f32.mxu0 %vm258_vm1, %v7565_v13 }
  0xfc   : > { %v6547_v24 = vadd.f32 %v5224_v34, %v968_v32  ;;  %v967_v50 = vadd.f32 %v808_v53, %v580_v48  ;;  %v1195_v61 = vpop.f32.mrf.mxu0 }
  0xfd   : > { %v5177_v59 = vpop.f32.mrf.mxu1  ;;  %5476 = vmatmul.mubr.msk.f32.gmra.mxu1 %vm258_vm1, %v5919_v54  ;;  %v585_v54 = vadd.f32 %v6430_v43, %v6525_v45 }
  0xfe   : > { %v6553_v51 = vadd.f32 %v1195_v61, %v967_v50  ;;  %v970_v52 = vadd.f32 %v5177_v59, %v583_v57  ;;  %v5227_v11 = vpop.f32.mrf.mxu0  ;;  %5526 = vmatmul.mubr.msk.f32.gmra.mxu0 %vm258_vm1, %v7566_v15  ;;  %5478 = vmatprep.mubr.msk.f32.mxu1 %vm258_vm1, %v5927_v56  ;;  %v584_v15 = vadd.f32 %v6525_v45, %v6440_v22 }
  0xff   : > { %v818_v13 = vpop.f32.mrf.mxu1  ;;  %5528 = vmatprep.mubr.msk.f32.mxu0 %vm258_vm1, %v7567_v36 }
 0x100   : > { %v6563_v63 = vadd.f32 %v5227_v11, %v970_v52  ;;  %v969_v16 = vadd.f32 %v818_v13, %v582_v55  ;;  %v1205_v61 = vpop.f32.mrf.mxu0 }
 0x101   : > { %v5180_v34 = vpop.f32.mrf.mxu1  ;;  %5479 = vmatmul.mubr.msk.f32.gmra.mxu1 %vm258_vm1, %v5939_v58  ;;  %v587_v58 = vadd.f32 %v6446_v9, %v6525_v45 }
 0x102   : > { %v6569_v48 = vadd.f32 %v1205_v61, %v969_v16  ;;  %v972_v56 = vadd.f32 %v5180_v34, %v585_v54  ;;  %v5230_v32 = vpop.f32.mrf.mxu0  ;;  %5529 = vmatmul.mubr.msk.f32.gmra.mxu0 %vm258_vm1, %v7568_v17  ;;  %5481 = vmatprep.mubr.msk.f32.mxu1 %vm258_vm1, %v5947_v60  ;;  %v586_v17 = vadd.f32 %v6525_v45, %v6456_v26 }
 0x103   : > { %v828_v36 = vpop.f32.mrf.mxu1  ;;  %5531 = vmatprep.mubr.msk.f32.mxu0 %vm258_vm1, %v7569_v21 }
 0x104   : > { %v6579_v43 = vadd.f32 %v5230_v32, %v972_v56  ;;  %v971_v22 = vadd.f32 %v828_v36, %v584_v15  ;;  %v1215_v53 = vpop.f32.mrf.mxu0 }
 0x105   : > { %v5183_v57 = vpop.f32.mrf.mxu1  ;;  %5482 = vmatmul.mubr.msk.f32.gmra.mxu1 %vm258_vm1, %v5959_v62  ;;  %v589_v62 = vadd.f32 %v6462_v14, %v6525_v45 }
 0x106   : > { %v6585_v50 = vadd.f32 %v1215_v53, %v971_v22  ;;  %v974_v60 = vadd.f32 %v5183_v57, %v587_v58  ;;  %v5233_v59 = vpop.f32.mrf.mxu0  ;;  %5532 = vmatmul.mubr.msk.f32.gmra.mxu0 %vm258_vm1, %v7570_v23  ;;  %5484 = vmatprep.mubr.msk.f32.mxu1 %vm258_vm1, %v5967_v0  ;;  %v588_v23 = vadd.f32 %v6525_v45, %v6472_v30  ;;  %v4769_v57 = vld [vmem:[%s5678_s24 + $0xfa] sm:$0xff] }
 0x107   : > { %v838_v21 = vpop.f32.mrf.mxu1  ;;  %5534 = vmatprep.mubr.msk.f32.mxu0 %vm258_vm1, %v7571_v25 }
 0x108   : > { %v6595_v9 = vadd.f32 %v5233_v59, %v974_v60  ;;  %v973_v26 = vadd.f32 %v838_v21, %v586_v17  ;;  %v1225_v55 = vpop.f32.mrf.mxu0 }
 0x109   : > { %v5186_v52 = vpop.f32.mrf.mxu1  ;;  %5485 = vmatmul.mubr.msk.f32.gmra.mxu1 %vm258_vm1, %v5979_v3  ;;  %v591_v3 = vadd.f32 %v6478_v42, %v6525_v45 }
 0x10a   : > { %v6601_v11 = vadd.f32 %v1225_v55, %v973_v26  ;;  %v976_v0 = vadd.f32 %v5186_v52, %v589_v62  ;;  %v5236_v13 = vpop.f32.mrf.mxu0  ;;  %5535 = vmatmul.mubr.msk.f32.gmra.mxu0 %vm258_vm1, %v7572_v27  ;;  %5487 = vmatprep.mubr.msk.f32.mxu1 %vm258_vm1, %v5987_v6  ;;  %v590_v27 = vadd.f32 %v6525_v45, %v6491_v46  ;;  %v4771_v52 = vld [vmem:[%s5678_s24 + $0x112] sm:$0xff] }
 0x10b   : > { %v848_v25 = vpop.f32.mrf.mxu1  ;;  %5537 = vmatprep.mubr.msk.f32.mxu0 %vm258_vm1, %v7573_v29 }
 0x10c   : > { %v6611_v14 = vadd.f32 %v5236_v13, %v976_v0  ;;  %v975_v30 = vadd.f32 %v848_v25, %v588_v23  ;;  %v1235_v54 = vpop.f32.mrf.mxu0  ;;  %v4707_v23 = vld [vmem:[%s5678_s24 + $0x121] sm:$0xff] }
 0x10d   : > { %v5189_v16 = vpop.f32.mrf.mxu1  ;;  %5488 = vmatmul.mubr.msk.f32.gmra.mxu1 %vm258_vm1, %v5999_v18  ;;  %v593_v18 = vadd.f32 %v6498_v19, %v6525_v45  ;;  %v4772_v25 = vld [vmem:[%s5678_s24 + $0x122] sm:$0xff] }
 0x10e   : > { %v6617_v61 = vadd.f32 %v1235_v54, %v975_v30  ;;  %v978_v6 = vadd.f32 %v5189_v16, %v591_v3  ;;  %v5239_v34 = vpop.f32.mrf.mxu0  ;;  %5538 = vmatmul.mubr.msk.f32.gmra.mxu0 %vm258_vm1, %v7574_v31  ;;  %5490 = vmatprep.mubr.msk.f32.mxu1 %vm258_vm1, %v6007_v38  ;;  %v592_v31 = vadd.f32 %v6525_v45, %v6511_v28 }
 0x10f   : > { %v858_v29 = vpop.f32.mrf.mxu1  ;;  %5540 = vmatprep.mubr.msk.f32.mxu0 %vm258_vm1, %v7575_v33  ;;  %v598_v30 = vadd.f32 %v6525_v45, %v6420_v5 }
 0x110   : > { %v6627_v42 = vadd.f32 %v5239_v34, %v978_v6  ;;  %v977_v46 = vadd.f32 %v858_v29, %v590_v27  ;;  %v1245_v15 = vpop.f32.mrf.mxu0  ;;  %v4773_v34 = vld [vmem:[%s5678_s24 + $0x12a] sm:$0xff]  ;;  %v4709_v29 = vld [vmem:[%s5678_s24 + $0x139] sm:$0xff] }
 0x111   : > { %v5192_v56 = vpop.f32.mrf.mxu1  ;;  %5491 = vmatmul.mubr.msk.f32.gmra.mxu1 %vm258_vm1, %v6019_v40  ;;  %v595_v40 = vadd.f32 %v6517_v47, %v6525_v45 }
 0x112   : > { %v6633_v32 = vadd.f32 %v1245_v15, %v977_v46  ;;  %v980_v38 = vadd.f32 %v5192_v56, %v593_v18  ;;  %v5242_v36 = vpop.f32.mrf.mxu0  ;;  %5541 = vmatmul.mubr.msk.f32.gmra.mxu0 %vm258_vm1, %v7576_v35  ;;  %5493 = vmatprep.mubr.msk.f32.mxu1 %vm258_vm1, %v6027_v7  ;;  %v594_v7 = vadd.f32 %v6525_v45, %v6533_v44  ;;  %v4774_v56 = vld [vmem:[%s5678_s24 + $0x13a] sm:$0xff] }
 0x113   : > { %v868_v33 = vpop.f32.mrf.mxu1  ;;  %5543 = vmatprep.mubr.msk.f32.mxu0 %vm258_vm1, %v7577_v37  ;;  %v597_v44 = vadd.f32 %v6394_v2, %v6525_v45  ;;  %v4706_v2 = vld [vmem:[%s5678_s24 + $0x111] sm:$0xff]  ;;  %v601_v18 = vadd.f32 %v6426_v39, %v6525_v45  ;;  %v4710_v39 = vld [vmem:[%s5678_s24 + $0x141] sm:$0xff] }
 0x114   : > { %v6643_v19 = vadd.f32 %v5242_v36, %v980_v38  ;;  %v979_v28 = vadd.f32 %v868_v33, %v592_v31  ;;  %v1255_v58 = vpop.f32.mrf.mxu0  ;;  %v600_v38 = vadd.f32 %v6525_v45, %v6436_v49 }
 0x115   : > { %v5195_v22 = vpop.f32.mrf.mxu1  ;;  %5494 = vmatmul.mubr.msk.f32.gmra.mxu1 %vm258_vm1, %v6039_v20  ;;  %v4705_v20 = vld [vmem:[%s5678_s24 + $0x109] sm:$0xff] }
 0x116   : > { %v6649_v35 = vadd.f32 %v1255_v58, %v979_v28  ;;  %v982_v53 = vadd.f32 %v5195_v22, %v595_v40  ;;  %v5245_v37 = vpop.f32.mrf.mxu0  ;;  %5544 = vmatmul.mubr.msk.f32.gmra.mxu0 %vm258_vm1, %v7578_v4  ;;  %5496 = vmatprep.mubr.msk.f32.mxu1 %vm258_vm1, %v6047_v1  ;;  %v4770_v4 = vld [vmem:[%s5678_s24 + $0x10a] sm:$0xff]  ;;  %v596_v1 = vadd.f32 %v6525_v45, %v6404_v10  ;;  %v4775_v58 = vld [vmem:[%s5678_s24 + $0x142] sm:$0xff] }
 0x117   : > { %v878_v47 = vpop.f32.mrf.mxu1  ;;  %5546 = vmatprep.mubr.msk.f32.mxu0 %vm258_vm1, %v7579_v8  ;;  %v4711_v22 = vld [vmem:[%s5678_s24 + $0x151] sm:$0xff] }
 0x118   : > { %v6661_v17 = vadd.f32 %v5245_v37, %v982_v53  ;;  %v981_v60 = vadd.f32 %v878_v47, %v594_v7  ;;  %v1265_v59 = vpop.f32.mrf.mxu0  ;;  %v7601_v7 = vld [vmem:[#allocation8_spill] sm:$0xff] }
 0x119   : > { %v5198_v21 = vpop.f32.mrf.mxu1  ;;  %5497 = vmatmul.mubr.msk.f32.gmra.mxu1 %vm258_vm1, %v6059_v41  ;;  %v599_v41 = vadd.f32 %v6410_v12, %v6525_v45  ;;  %v4708_v12 = vld [vmem:[%s5678_s24 + $0x129] sm:$0xff]  ;;  %v603_v53 = vadd.f32 %v7601_v7, %v6525_v45 }
 0x11a   : > { %v6668_v8 = vadd.f32 %v1265_v59, %v981_v60  ;;  %v984_v62 = vadd.f32 %v5198_v21, %v597_v44  ;;  %v5248_v26 = vpop.f32.mrf.mxu0  ;;  %5547 = vmatmul.mubr.msk.f32.gmra.mxu0 %vm258_vm1, %v4769_v57  ;;  %5499 = vmatprep.mubr.msk.f32.mxu1 %vm258_vm1, %v4705_v20  ;;  %v4776_v57 = vld [vmem:[%s5678_s24 + $0x152] sm:$0xff] }
 0x11b   : > { %v888_v55 = vpop.f32.mrf.mxu1  ;;  %5549 = vmatprep.mubr.msk.f32.mxu0 %vm258_vm1, %v4770_v4  ;;  %v7602_v44 = vld [vmem:[#allocation9_spill] sm:$0xff] }
 0x11c   : > { %v6678_v10 = vadd.f32 %v5248_v26, %v984_v62  ;;  %v983_v0 = vadd.f32 %v888_v55, %v596_v1  ;;  %v1275_v13 = vpop.f32.mrf.mxu0  ;;  %v602_v60 = vadd.f32 %v6525_v45, %v7602_v44  ;;  %v4712_v1 = vld [vmem:[%s5678_s24 + $0x159] sm:$0xff] }
 0x11d   : > { %v5201_v3 = vpop.f32.mrf.mxu1  ;;  %5500 = vmatmul.mubr.msk.f32.gmra.mxu1 %vm258_vm1, %v4706_v2  ;;  %v4777_v26 = vld [vmem:[%s5678_s24 + $0x15a] sm:$0xff]  ;;  %v4713_v2 = vld [vmem:[%s5678_s24 + $0x169] sm:$0xff] }
 0x11e   : > { %v6684_v54 = vadd.f32 %v1275_v13, %v983_v0  ;;  %v986_v16 = vadd.f32 %v5201_v3, %v599_v41  ;;  %v5251_v27 = vpop.f32.mrf.mxu0  ;;  %5550 = vmatmul.mubr.msk.f32.gmra.mxu0 %vm258_vm1, %v4771_v52  ;;  %5502 = vmatprep.mubr.msk.f32.mxu1 %vm258_vm1, %v4707_v23  ;;  %v7603_v55 = vld [vmem:[#allocation10_spill] sm:$0xff]  ;;  %v4778_v13 = vld [vmem:[%s5678_s24 + $0x16a] sm:$0xff]  ;;  %v7604_v3 = vld [vmem:[#allocation11_spill] sm:$0xff] }
 0x11f   : > { %v898_v6 = vpop.f32.mrf.mxu1  ;;  %5552 = vmatprep.mubr.msk.f32.mxu0 %vm258_vm1, %v4772_v25  ;;  %v605_v52 = vadd.f32 %v7603_v55, %v6525_v45 }
 0x120   : > { %v6694_v5 = vadd.f32 %v5251_v27, %v986_v16  ;;  %v985_v46 = vadd.f32 %v898_v6, %v598_v30  ;;  %v1285_v15 = vpop.f32.mrf.mxu0  ;;  %v604_v30 = vadd.f32 %v6525_v45, %v7604_v3  ;;  %v4714_v6 = vld [vmem:[%s5678_s24 + $0x171] sm:$0xff]  ;;  %v7613_v3 = vld [vmem:[#allocation18_spill] sm:$0xff] }
 0x121   : > { %v5204_v31 = vpop.f32.mrf.mxu1  ;;  %5503 = vmatmul.mubr.msk.f32.gmra.mxu1 %vm258_vm1, %v4708_v12 }
 0x122   : > { %v6700_v36 = vadd.f32 %v1285_v15, %v985_v46  ;;  %v988_v33 = vadd.f32 %v5204_v31, %v601_v18  ;;  %v5254_v40 = vpop.f32.mrf.mxu0  ;;  %5553 = vmatmul.mubr.msk.f32.gmra.mxu0 %vm258_vm1, %v4773_v34  ;;  %5505 = vmatprep.mubr.msk.f32.mxu1 %vm258_vm1, %v4709_v29  ;;  %v4779_v29 = vld [vmem:[%s5678_s24 + $0x172] sm:$0xff]  ;;  %v7605_v18 = vld [vmem:[#allocation12_spill] sm:$0xff] }
 0x123   : > { %v908_v28 = vpop.f32.mrf.mxu1  ;;  %5555 = vmatprep.mubr.msk.f32.mxu0 %vm258_vm1, %v4774_v56  ;;  %v607_v46 = vadd.f32 %v7605_v18, %v6525_v45 }
 0x124   : > { %v6710_v49 = vadd.f32 %v5254_v40, %v988_v33  ;;  %v987_v37 = vadd.f32 %v908_v28, %v600_v38  ;;  %v1295_v47 = vpop.f32.mrf.mxu0  ;;  %v7606_v33 = vld [vmem:[#allocation13_spill] sm:$0xff] }
 0x125   : > { %v5207_v20 = vpop.f32.mrf.mxu1  ;;  %5506 = vmatmul.mubr.msk.f32.gmra.mxu1 %vm258_vm1, %v4710_v39  ;;  %v606_v40 = vadd.f32 %v6525_v45, %v7606_v33 }
 0x126   : > { %v6716_v59 = vadd.f32 %v1295_v47, %v987_v37  ;;  %v990_v4 = vadd.f32 %v5207_v20, %v603_v53  ;;  %v5257_v21 = vpop.f32.mrf.mxu0  ;;  %5556 = vmatmul.mubr.msk.f32.gmra.mxu0 %vm258_vm1, %v4775_v58  ;;  %5508 = vmatprep.mubr.msk.f32.mxu1 %vm258_vm1, %v4711_v22  ;;  %v7607_v22 = vld [vmem:[#allocation36_spill] sm:$0xff]  ;;  %v7608_v53 = vld [vmem:[#allocation14_spill] sm:$0xff]  ;;  %v7609_v47 = vld [vmem:[#allocation15_spill] sm:$0xff] }
 0x127   : > { %v918_v62 = vpop.f32.mrf.mxu1  ;;  %5558 = vmatprep.mubr.msk.f32.mxu0 %vm258_vm1, %v4776_v57  ;;  %v4717_v37 = vld [vmem:[%s5678_s24 + $0x199] sm:$0xff]  ;;  %v609_v57 = vadd.f32 %v7609_v47, %v6525_v45 }
 0x128   : > { %v6726_v23 = vadd.f32 %v5257_v21, %v990_v4  ;;  %v989_v41 = vadd.f32 %v918_v62, %v602_v60  ;;  %v1305_v0 = vpop.f32.mrf.mxu0  ;;  %v4782_v4 = vld [vmem:[%s5678_s24 + $0x19a] sm:$0xff]  ;;  %v7611_v62 = vld [vmem:[#allocation17_spill] sm:$0xff] }
 0x129   : > { %v5210_v25 = vpop.f32.mrf.mxu1  ;;  %5509 = vmatmul.mubr.msk.f32.gmra.mxu1 %vm258_vm1, %v4712_v1  ;;  %v7610_v1 = vld [vmem:[#allocation7_spill] sm:$0xff] }
 0x12a   : > { %v6732_v16 = vadd.f32 %v1305_v0, %v989_v41  ;;  %v992_v27 = vadd.f32 %v5210_v25, %v605_v52  ;;  %v5260_v12 = vpop.f32.mrf.mxu0  ;;  %5559 = vmatmul.mubr.msk.f32.gmra.mxu0 %vm258_vm1, %v4777_v26  ;;  %5511 = vmatprep.mubr.msk.f32.mxu1 %vm258_vm1, %v4713_v2  ;;  %v608_v26 = vadd.f32 %v6525_v45, %v7611_v62  ;;  %v7612_v41 = vld [vmem:[#allocation16_spill] sm:$0xff]  ;;  %v4718_v0 = vld [vmem:[%s5678_s24 + $0x1a1] sm:$0xff] }
 0x12b   : > { %v928_v34 = vpop.f32.mrf.mxu1  ;;  %5561 = vmatprep.mubr.msk.f32.mxu0 %vm258_vm1, %v4778_v13  ;;  %v4783_v25 = vld [vmem:[%s5678_s24 + $0x1a2] sm:$0xff] }
 0x12c   : > { %v6741_v15 = vadd.f32 %v5260_v12, %v992_v27  ;;  %v991_v56 = vadd.f32 %v928_v34, %v604_v30  ;;  %v1315_v31 = vpop.f32.mrf.mxu0  ;;  %v611_v30 = vadd.f32 %v7613_v3, %v6525_v45 }
 0x12d   : > { %v5213_v38 = vpop.f32.mrf.mxu1  ;;  %5512 = vmatmul.mubr.msk.f32.gmra.mxu1 %vm258_vm1, %v4714_v6 }
 0x12e   : > { %v6746_v39 = vadd.f32 %v1315_v31, %v991_v56  ;;  %v994_v28 = vadd.f32 %v5213_v38, %v607_v46  ;;  %v5263_v58 = vpop.f32.mrf.mxu0  ;;  %5562 = vmatmul.mubr.msk.f32.gmra.mxu0 %vm258_vm1, %v4779_v29  ;;  %5514 = vmatprep.mubr.msk.f32.mxu1 %vm258_vm1, %v7607_v22  ;;  %v7614_v29 = vld [vmem:[#allocation19_spill] sm:$0xff] }
 0x12f   : > { %v938_v7 = vpop.f32.mrf.mxu1  ;;  %5564 = vmatprep.mubr.msk.f32.mxu0 %vm258_vm1, %v7608_v53  ;;  %v610_v18 = vadd.f32 %v6525_v45, %v7614_v29 }
 0x130   : > { %v6756_v20 = vadd.f32 %v5263_v58, %v994_v28  ;;  %v993_v44 = vadd.f32 %v938_v7, %v606_v40  ;;  %v1325_v60 = vpop.f32.mrf.mxu0 }
 0x131   : > { %v5216_v21 = vpop.f32.mrf.mxu1  ;;  %5515 = vmatmul.mubr.msk.f32.gmra.mxu1 %vm258_vm1, %v7610_v1 }
 0x132   : > { %v6763_v2 = vadd.f32 %v1325_v60, %v993_v44  ;;  %v996_v55 = vadd.f32 %v5216_v21, %v609_v57  ;;  %v5266_v52 = vpop.f32.mrf.mxu0  ;;  %5565 = vmatmul.mubr.msk.f32.gmra.mxu0 %vm258_vm1, %v7612_v41  ;;  %5517 = vmatprep.mubr.msk.f32.mxu1 %vm258_vm1, %v4717_v37 }
 0x133   : > { %v948_v13 = vpop.f32.mrf.mxu1  ;;  %5567 = vmatprep.mubr.msk.f32.mxu0 %vm258_vm1, %v4782_v4 }
 0x134   : > { %v6773_v27 = vadd.f32 %v5266_v52, %v996_v55  ;;  %v995_v12 = vadd.f32 %v948_v13, %v608_v26  ;;  %v1335_v6 = vpop.f32.mrf.mxu0 }
 0x135   : > { %v5219_v34 = vpop.f32.mrf.mxu1  ;;  %5518 = vmatmul.mubr.msk.f32.gmra.mxu1 %vm258_vm1, %v4718_v0 }
 0x136   : > { %v6778_v46 = vadd.f32 %v1335_v6, %v995_v12  ;;  %v998_v56 = vadd.f32 %v5219_v34, %v611_v30  ;;  %v5269_v31 = vpop.f32.mrf.mxu0  ;;  %5568 = vmatmul.mubr.msk.f32.gmra.mxu0 %vm258_vm1, %v4783_v25 }
 0x137   : > { %v958_v38 = vpop.f32.mrf.mxu1 }
 0x138   : > { %v6781_v33 = vadd.f32 %v5269_v31, %v998_v56  ;;  %v997_v40 = vadd.f32 %v958_v38, %v610_v18  ;;  %v1345_v28 = vpop.f32.mrf.mxu0 }
 0x139   : > { %v5274_v58 = vpop.f32.mrf.mxu1 }
 0x13a   : > { %v6783_v22 = vadd.f32 %v1345_v28, %v997_v40  ;;  %v1743_v7 = vadd.f32 %v5274_v58, %v6547_v24  ;;  %v5324_v53 = vpop.f32.mrf.mxu0 }
 0x13b   : > { %v1583_v37 = vpop.f32.mrf.mxu1 }
 0x13c   : > { %v6786_v47 = vadd.f32 %v5324_v53, %v1743_v7  ;;  %v1742_v45 = vadd.f32 %v1583_v37, %v6553_v51  ;;  %v1970_v57 = vpop.f32.mrf.mxu0 }
 0x13d   : > { %v5277_v44 = vpop.f32.mrf.mxu1 }
 0x13e   : > { %v6789_v60 = vadd.f32 %v1970_v57, %v1742_v45  ;;  %v1745_v4 = vadd.f32 %v5277_v44, %v6563_v63  ;;  %v5327_v21 = vpop.f32.mrf.mxu0 }
 0x13f   : > { %v1593_v1 = vpop.f32.mrf.mxu1 }
 0x140   : > { %v6792_v62 = vadd.f32 %v5327_v21, %v1745_v4  ;;  %v1744_v26 = vadd.f32 %v1593_v1, %v6569_v48  ;;  %v1980_v55 = vpop.f32.mrf.mxu0 }
 0x141   : > { %v5280_v24 = vpop.f32.mrf.mxu1 }
 0x142   : > { %v6795_v52 = vadd.f32 %v1980_v55, %v1744_v26  ;;  %v1747_v41 = vadd.f32 %v5280_v24, %v6579_v43  ;;  %v5330_v0 = vpop.f32.mrf.mxu0 }
 0x143   : > { %v1603_v51 = vpop.f32.mrf.mxu1 }
 0x144   : > { %v6798_v13 = vadd.f32 %v5330_v0, %v1747_v41  ;;  %v1746_v25 = vadd.f32 %v1603_v51, %v6585_v50  ;;  %v1990_v3 = vpop.f32.mrf.mxu0 }
 0x145   : > { %v5283_v63 = vpop.f32.mrf.mxu1 }
 0x146   : > { %v6801_v30 = vadd.f32 %v1990_v3, %v1746_v25  ;;  %v1749_v12 = vadd.f32 %v5283_v63, %v6595_v9  ;;  %v5333_v6 = vpop.f32.mrf.mxu0 }
 0x147   : > { %v1613_v48 = vpop.f32.mrf.mxu1 }
 0x148   : > { %v6804_v34 = vadd.f32 %v5333_v6, %v1749_v12  ;;  %v1748_v29 = vadd.f32 %v1613_v48, %v6601_v11  ;;  %v2000_v18 = vpop.f32.mrf.mxu0 }
 0x149   : > { %v5286_v43 = vpop.f32.mrf.mxu1 }
 0x14a   : > { %v6807_v56 = vadd.f32 %v2000_v18, %v1748_v29  ;;  %v1751_v31 = vadd.f32 %v5286_v43, %v6611_v14  ;;  %v5336_v38 = vpop.f32.mrf.mxu0 }
 0x14b   : > { %v1623_v50 = vpop.f32.mrf.mxu1 }
 0x14c   : > { %v6810_v40 = vadd.f32 %v5336_v38, %v1751_v31  ;;  %v1750_v28 = vadd.f32 %v1623_v50, %v6617_v61  ;;  %v2010_v58 = vpop.f32.mrf.mxu0 }
 0x14d   : > { %v5289_v9 = vpop.f32.mrf.mxu1 }
 0x14e   : > { %v6813_v7 = vadd.f32 %v2010_v58, %v1750_v28  ;;  %v1753_v53 = vadd.f32 %v5289_v9, %v6627_v42  ;;  %v5339_v37 = vpop.f32.mrf.mxu0 }
 0x14f   : > { %v1633_v11 = vpop.f32.mrf.mxu1 }
 0x150   : > { %v6816_v45 = vadd.f32 %v5339_v37, %v1753_v53  ;;  %v1752_v57 = vadd.f32 %v1633_v11, %v6633_v32  ;;  %v2020_v44 = vpop.f32.mrf.mxu0 }
 0x151   : > { %v5292_v14 = vpop.f32.mrf.mxu1 }
 0x152   : > { %v6819_v4 = vadd.f32 %v2020_v44, %v1752_v57  ;;  %v1755_v21 = vadd.f32 %v5292_v14, %v6643_v19  ;;  %v5342_v1 = vpop.f32.mrf.mxu0 }
 0x153   : > { %v1643_v61 = vpop.f32.mrf.mxu1 }
 0x154   : > { %v6822_v26 = vadd.f32 %v5342_v1, %v1755_v21  ;;  %v1754_v55 = vadd.f32 %v1643_v61, %v6649_v35  ;;  %v2030_v24 = vpop.f32.mrf.mxu0 }
 0x155   : > { %v5295_v42 = vpop.f32.mrf.mxu1 }
 0x156   : > { %v6825_v41 = vadd.f32 %v2030_v24, %v1754_v55  ;;  %v1757_v0 = vadd.f32 %v5295_v42, %v6661_v17  ;;  %v5345_v51 = vpop.f32.mrf.mxu0 }
 0x157   : > { %v1653_v32 = vpop.f32.mrf.mxu1 }
 0x158   : > { %v6828_v25 = vadd.f32 %v5345_v51, %v1757_v0  ;;  %v1756_v3 = vadd.f32 %v1653_v32, %v6668_v8  ;;  %v2040_v63 = vpop.f32.mrf.mxu0 }
 0x159   : > { %v5298_v19 = vpop.f32.mrf.mxu1 }
 0x15a   : > { %v6831_v12 = vadd.f32 %v2040_v63, %v1756_v3  ;;  %v1759_v6 = vadd.f32 %v5298_v19, %v6678_v10  ;;  %v5348_v48 = vpop.f32.mrf.mxu0 }
 0x15b   : > { %v1663_v35 = vpop.f32.mrf.mxu1 }
 0x15c   : > { %v6834_v29 = vadd.f32 %v5348_v48, %v1759_v6  ;;  %v1758_v18 = vadd.f32 %v1663_v35, %v6684_v54  ;;  %v2050_v43 = vpop.f32.mrf.mxu0 }
 0x15d   : > { %v5301_v17 = vpop.f32.mrf.mxu1 }
 0x15e   : > { %v6837_v31 = vadd.f32 %v2050_v43, %v1758_v18  ;;  %v1761_v38 = vadd.f32 %v5301_v17, %v6694_v5  ;;  %v5351_v50 = vpop.f32.mrf.mxu0 }
 0x15f   : > { %v1673_v8 = vpop.f32.mrf.mxu1 }
 0x160   : > { %v6840_v28 = vadd.f32 %v5351_v50, %v1761_v38  ;;  %v1760_v58 = vadd.f32 %v1673_v8, %v6700_v36  ;;  %v2060_v9 = vpop.f32.mrf.mxu0 }
 0x161   : > { %v5304_v10 = vpop.f32.mrf.mxu1 }
 0x162   : > { %v6843_v53 = vadd.f32 %v2060_v9, %v1760_v58  ;;  %v1763_v37 = vadd.f32 %v5304_v10, %v6710_v49  ;;  %v5354_v11 = vpop.f32.mrf.mxu0 }
 0x163   : > { %v1683_v54 = vpop.f32.mrf.mxu1 }
 0x164   : > { %v6846_v57 = vadd.f32 %v5354_v11, %v1763_v37  ;;  %v1762_v44 = vadd.f32 %v1683_v54, %v6716_v59  ;;  %v2070_v14 = vpop.f32.mrf.mxu0 }
 0x165   : > { %v5307_v5 = vpop.f32.mrf.mxu1 }
 0x166   : > { %7615 = vst [vmem:[#allocation20_spill] sm:$0xff] %v6846_v57  ;;  %v6849_v21 = vadd.f32 %v2070_v14, %v1762_v44  ;;  %v1765_v1 = vadd.f32 %v5307_v5, %v6726_v23  ;;  %v5357_v61 = vpop.f32.mrf.mxu0 }
 0x167   : > { %v1693_v36 = vpop.f32.mrf.mxu1 }
 0x168   : > { %7616 = vst [vmem:[#allocation21_spill] sm:$0xff] %v6849_v21  ;;  %v6852_v55 = vadd.f32 %v5357_v61, %v1765_v1  ;;  %v1764_v24 = vadd.f32 %v1693_v36, %v6732_v16  ;;  %v2080_v42 = vpop.f32.mrf.mxu0 }
 0x169   : > { %v5310_v49 = vpop.f32.mrf.mxu1 }
 0x16a   : > { %7617 = vst [vmem:[#allocation22_spill] sm:$0xff] %v6852_v55  ;;  %v6855_v0 = vadd.f32 %v2080_v42, %v1764_v24  ;;  %v1767_v51 = vadd.f32 %v5310_v49, %v6741_v15  ;;  %v5360_v32 = vpop.f32.mrf.mxu0 }
 0x16b   : > { %v1703_v59 = vpop.f32.mrf.mxu1 }
 0x16c   : > { %7618 = vst [vmem:[#allocation23_spill] sm:$0xff] %v6855_v0  ;;  %v6858_v3 = vadd.f32 %v5360_v32, %v1767_v51  ;;  %v1766_v63 = vadd.f32 %v1703_v59, %v6746_v39  ;;  %v2090_v19 = vpop.f32.mrf.mxu0 }
 0x16d   : > { %v5313_v23 = vpop.f32.mrf.mxu1 }
 0x16e   : > { %7619 = vst [vmem:[#allocation24_spill] sm:$0xff] %v6858_v3  ;;  %v6861_v6 = vadd.f32 %v2090_v19, %v1766_v63  ;;  %v1769_v48 = vadd.f32 %v5313_v23, %v6756_v20  ;;  %v5363_v35 = vpop.f32.mrf.mxu0 }
 0x16f   : > { %v1713_v16 = vpop.f32.mrf.mxu1 }
 0x170   : > { %7620 = vst [vmem:[#allocation25_spill] sm:$0xff] %v6861_v6  ;;  %v6864_v18 = vadd.f32 %v5363_v35, %v1769_v48  ;;  %v1768_v43 = vadd.f32 %v1713_v16, %v6763_v2  ;;  %v2100_v17 = vpop.f32.mrf.mxu0 }
 0x171   : > { %v5316_v15 = vpop.f32.mrf.mxu1 }
 0x172   : > { %7621 = vst [vmem:[#allocation26_spill] sm:$0xff] %v6864_v18  ;;  %v6867_v38 = vadd.f32 %v2100_v17, %v1768_v43  ;;  %v1771_v50 = vadd.f32 %v5316_v15, %v6773_v27  ;;  %v5366_v8 = vpop.f32.mrf.mxu0 }
 0x173   : > { %v1723_v39 = vpop.f32.mrf.mxu1 }
 0x174   : > { %7622 = vst [vmem:[#allocation27_spill] sm:$0xff] %v6867_v38  ;;  %v6870_v58 = vadd.f32 %v5366_v8, %v1771_v50  ;;  %v1770_v9 = vadd.f32 %v1723_v39, %v6778_v46  ;;  %v2110_v10 = vpop.f32.mrf.mxu0 }
 0x175   : > { %v5319_v20 = vpop.f32.mrf.mxu1 }
 0x176   : > { %7623 = vst [vmem:[#allocation28_spill] sm:$0xff] %v6870_v58  ;;  %v6873_v37 = vadd.f32 %v2110_v10, %v1770_v9  ;;  %v1773_v11 = vadd.f32 %v5319_v20, %v6781_v33  ;;  %v5369_v54 = vpop.f32.mrf.mxu0 }
 0x177   : > { %v1733_v2 = vpop.f32.mrf.mxu1 }
 0x178   : > { %7624 = vst [vmem:[#allocation29_spill] sm:$0xff] %v6873_v37  ;;  %v6876_v44 = vadd.f32 %v5369_v54, %v1773_v11  ;;  %v1772_v14 = vadd.f32 %v1733_v2, %v6783_v22  ;;  %v2120_v5 = vpop.f32.mrf.mxu0 }
 0x179   : > { %v5374_v27 = vpop.f32.mrf.mxu1 }
 0x17a   : > { %7625 = vst [vmem:[#allocation30_spill] sm:$0xff] %v6876_v44  ;;  %v6879_v1 = vadd.f32 %v2120_v5, %v1772_v14  ;;  %v6881_v61 = vpop.f32.mrf.mxu0 }
 0x17b   : > { %v2357_v36 = vpop.f32.mrf.mxu1 }
 0x17c   : > { %7626 = vst [vmem:[#allocation31_spill] sm:$0xff] %v6879_v1  ;;  %v6883_v46 = vpop.f32.mrf.mxu0 }
 0x17d   : > { %v5377_v24 = vpop.f32.mrf.mxu1 }
 0x17e   : > { %v6885_v42 = vpop.f32.mrf.mxu0 }
 0x17f   : > { %v2367_v49 = vpop.f32.mrf.mxu1 }
 0x180   : > { %v6887_v33 = vpop.f32.mrf.mxu0 }
 0x181   : > { %v5380_v51 = vpop.f32.mrf.mxu1 }
 0x182   : > { %v6889_v32 = vpop.f32.mrf.mxu0 }
 0x183   : > { %v2377_v59 = vpop.f32.mrf.mxu1 }
 0x184   : > { %v6891_v22 = vpop.f32.mrf.mxu0 }
 0x185   : > { %v5383_v63 = vpop.f32.mrf.mxu1 }
 0x186   : > { %v6893_v19 = vpop.f32.mrf.mxu0 }
 0x187   : > { %v2387_v23 = vpop.f32.mrf.mxu1 }
 0x188   : > { %v6895_v48 = vpop.f32.mrf.mxu0 }
 0x189   : > { %v5386_v35 = vpop.f32.mrf.mxu1 }
 0x18a   : > { %v6897_v16 = vpop.f32.mrf.mxu0 }
 0x18b   : > { %v2397_v43 = vpop.f32.mrf.mxu1 }
 0x18c   : > { %v6899_v17 = vpop.f32.mrf.mxu0 }
 0x18d   : > { %v5389_v15 = vpop.f32.mrf.mxu1 }
 0x18e   : > { %v6901_v50 = vpop.f32.mrf.mxu0 }
 0x18f   : > { %v2407_v8 = vpop.f32.mrf.mxu1 }
 0x190   : > { %v6903_v39 = vpop.f32.mrf.mxu0 }
 0x191   : > { %v5392_v9 = vpop.f32.mrf.mxu1 }
 0x192   : > { %v6905_v10 = vpop.f32.mrf.mxu0 }
 0x193   : > { %v6907_v20 = vpop.f32.mrf.mxu1 }
 0x194   : > { %v6909_v11 = vpop.f32.mrf.mxu0 }
 0x195   : > { %7627 = vst [vmem:[#allocation32_spill] sm:$0xff] %v6909_v11  ;;  %v6911_v54 = vpop.f32.mrf.mxu1 }
 0x196   : > { %v6913_v2 = vpop.f32.mrf.mxu0 }
 0x197   : > { %7628 = vst [vmem:[#allocation33_spill] sm:$0xff] %v6913_v2  ;;  %v6915_v14 = vpop.f32.mrf.mxu1 }
 0x198   : > { %v6917_v5 = vpop.f32.mrf.mxu0 }
 0x199   : > { %7629 = vst [vmem:[#allocation34_spill] sm:$0xff] %v6917_v5  ;;  %v6919_v1 = vpop.f32.mrf.mxu1 }
 0x19a   : > { %v6921_v44 = vpop.f32.mrf.mxu0 }
 0x19b   : > { %7630 = vst [vmem:[#allocation35_spill] sm:$0xff] %v6921_v44  ;;  %v6923_v37 = vpop.f32.mrf.mxu1 }
 0x19c   : > { %v6925_v58 = vpop.f32.mrf.mxu0 }
 0x19d   : > { %7631 = vst [vmem:[#allocation8_spill] sm:$0xff] %v6925_v58  ;;  %v6927_v38 = vpop.f32.mrf.mxu1 }
 0x19e   : > { %v6929_v18 = vpop.f32.mrf.mxu0 }
 0x19f   : > { %7632 = vst [vmem:[#allocation9_spill] sm:$0xff] %v6929_v18  ;;  %v6931_v6 = vpop.f32.mrf.mxu1 }
 0x1a0   : > { %v6933_v3 = vpop.f32.mrf.mxu0 }
 0x1a1   : > { %7633 = vst [vmem:[#allocation10_spill] sm:$0xff] %v6933_v3  ;;  %v6935_v0 = vpop.f32.mrf.mxu1 }
 0x1a2   : > { %7634 = vst [vmem:[#allocation11_spill] sm:$0xff] %v6935_v0  ;;  %v6937_v55 = vpop.f32.mrf.mxu0 }
 0x1a3   : > { %7635 = vst [vmem:[#allocation12_spill] sm:$0xff] %v6937_v55  ;;  %v6939_v21 = vpop.f32.mrf.mxu1 }
 0x1a4   : > { %7636 = vst [vmem:[#allocation13_spill] sm:$0xff] %v6939_v21  ;;  %v6941_v57 = vpop.f32.mrf.mxu0 }
 0x1a5   : > { %7637 = vst [vmem:[#allocation36_spill] sm:$0xff] %v6941_v57  ;;  %v6943_v44 = vpop.f32.mrf.mxu1 }
 0x1a6   : > { %7638 = vst [vmem:[#allocation14_spill] sm:$0xff] %v6943_v44  ;;  %v6945_v5 = vpop.f32.mrf.mxu0 }
 0x1a7   : > { %7639 = vst [vmem:[#allocation15_spill] sm:$0xff] %v6945_v5  ;;  %v6947_v58 = vpop.f32.mrf.mxu1 }
 0x1a8   : > { %7640 = vst [vmem:[#allocation7_spill] sm:$0xff] %v6947_v58  ;;  %v6949_v2 = vpop.f32.mrf.mxu0 }
 0x1a9   : > { %7641 = vst [vmem:[#allocation17_spill] sm:$0xff] %v6949_v2  ;;  %v6951_v18 = vpop.f32.mrf.mxu1 }
 0x1aa   : > { %7642 = vst [vmem:[#allocation16_spill] sm:$0xff] %v6951_v18  ;;  %v6953_v11 = vpop.f32.mrf.mxu0 }
 0x1ab   : > { %7643 = vst [vmem:[#allocation18_spill] sm:$0xff] %v6953_v11  ;;  %v6955_v3 = vpop.f32.mrf.mxu1  ;;  %v2517_v11 = vadd.f32 %v5374_v27, %v6786_v47  ;;  %v2523_v27 = vadd.f32 %v5383_v63, %v6804_v34 }
 0x1ac   : > { %7644 = vst [vmem:[#allocation19_spill] sm:$0xff] %v6955_v3  ;;  %v6957_v0 = vpop.f32.mrf.mxu0 }
 0x1ad   : > { %7645 = vst [vmem:[#allocation37_spill] sm:$0xff] %v6957_v0  ;;  %v6959_v55 = vpop.f32.mrf.mxu1  ;;  %v2905_v47 = vadd.f32 %v6881_v61, %v2517_v11  ;;  %v2529_v61 = vadd.f32 %v5392_v9, %v6822_v26 }
 0x1ae   : > { %7646 = vst [vmem:[#allocation38_spill] sm:$0xff] %v6959_v55  ;;  %v6961_v21 = vpop.f32.mrf.mxu0  ;;  %v2516_v55 = vadd.f32 %v2357_v36, %v6789_v60  ;;  %v2525_v60 = vadd.f32 %v5386_v35, %v6810_v40  ;;  %v2533_v35 = vadd.f32 %v6919_v1, %v6834_v29  ;;  %v2534_v1 = vadd.f32 %v6931_v6, %v6843_v53  ;;  %v7656_v53 = vld [vmem:[#allocation34_spill] sm:$0xff] }
 0x1af   : > { %7647 = vst [vmem:[#allocation39_spill] sm:$0xff] %v6961_v21  ;;  %v6963_v57 = vpop.f32.mrf.mxu1 }
 0x1b0   : > { %7648 = vst [vmem:[#allocation40_spill] sm:$0xff] %v6963_v57  ;;  %v6965_v44 = vpop.f32.mrf.mxu0  ;;  %v2519_v57 = vadd.f32 %v5377_v24, %v6792_v62  ;;  %v2524_v62 = vadd.f32 %v2397_v43, %v6813_v7  ;;  %v2904_v36 = vadd.f32 %v6883_v46, %v2516_v55 }
 0x1b1   : > { %7649 = vst [vmem:[#allocation41_spill] sm:$0xff] %v6965_v44  ;;  %v6967_v5 = vpop.f32.mrf.mxu1  ;;  %v2518_v44 = vadd.f32 %v2367_v49, %v6795_v52  ;;  %v2527_v52 = vadd.f32 %v5389_v15, %v6816_v45  ;;  %v7004_v45 = vadd.f32 %v6893_v19, %v2523_v27  ;;  %v2528_v19 = vadd.f32 %v6907_v20, %v6825_v41 }
 0x1b2   : > { %7650 = vst [vmem:[#allocation42_spill] sm:$0xff] %v6967_v5  ;;  %v6969_v58 = vpop.f32.mrf.mxu0  ;;  %v2521_v5 = vadd.f32 %v5380_v51, %v6798_v13  ;;  %v2526_v13 = vadd.f32 %v2407_v8, %v6819_v4 }
 0x1b3   : > { %7651 = vst [vmem:[#allocation43_spill] sm:$0xff] %v6969_v58  ;;  %v6971_v2 = vpop.f32.mrf.mxu1  ;;  %v2520_v58 = vadd.f32 %v2377_v59, %v6801_v30  ;;  %v2906_v49 = vadd.f32 %v6887_v33, %v2518_v44  ;;  %v7010_v59 = vadd.f32 %v6897_v16, %v2525_v60  ;;  %v7016_v44 = vadd.f32 %v6901_v50, %v2527_v52  ;;  %v7657_v52 = vld [vmem:[#allocation35_spill] sm:$0xff] }
 0x1b4   : > { %v6974_v3 = vpop.f32.mrf.mxu0  ;;  %v2909_v40 = vadd.f32 %v6889_v32, %v2521_v5  ;;  %v7022_v33 = vadd.f32 %v6905_v10, %v2529_v61 }
 0x1b5   : > { %7652 = vst [vmem:[#allocation44_spill] sm:$0xff] %v6974_v3  ;;  %v6976_v0 = vpop.f32.mrf.mxu1  ;;  %v2522_v3 = vadd.f32 %v2387_v23, %v6807_v56  ;;  %v2907_v56 = vadd.f32 %v6885_v42, %v2519_v57  ;;  %v2908_v7 = vadd.f32 %v6891_v22, %v2520_v58  ;;  %v7013_v57 = vadd.f32 %v6899_v17, %v2524_v62 }
 0x1b6   : > { %7653 = vst [vmem:[#allocation45_spill] sm:$0xff] %v6976_v0  ;;  %v6979_v21 = vpop.f32.mrf.mxu0  ;;  %v7019_v58 = vadd.f32 %v6903_v39, %v2526_v13  ;;  %v2531_v23 = vadd.f32 %v6911_v54, %v6828_v25  ;;  %v2532_v25 = vadd.f32 %v6923_v37, %v6837_v31  ;;  %v7654_v54 = vld [vmem:[#allocation32_spill] sm:$0xff]  ;;  %v7655_v37 = vld [vmem:[#allocation33_spill] sm:$0xff]  ;;  %v7060_v13 = vadd.f32 %v7657_v52, %v2533_v35 }
 0x1b7   : > { %v6985_v18 = vpop.f32.mrf.mxu1  ;;  %v7007_v4 = vadd.f32 %v6895_v48, %v2522_v3  ;;  %v2530_v48 = vadd.f32 %v6915_v14, %v6831_v12  ;;  %v2535_v12 = vadd.f32 %v6927_v38, %v6840_v28  ;;  %v7051_v31 = vadd.f32 %v7654_v54, %v2528_v19 }
 0x1b8   : > { %v6990_v0 = vpop.f32.mrf.mxu0  ;;  %v7054_v28 = vadd.f32 %v7655_v37, %v2531_v23 }
 0x1b9   : > { %v5474_v30 = vpop.f32.mrf.mxu1  ;;  %v7057_v6 = vadd.f32 %v7656_v53, %v2530_v48 }
 0x1ba   : > { %v3292_v24 = vadd.f32 %v5474_v30, %v2905_v47  ;;  %v5524_v34 = vpop.f32.mrf.mxu0  ;;  %v7658_v30 = vld [vmem:[#allocation8_spill] sm:$0xff] }
 0x1bb   : > { %v3132_v51 = vpop.f32.mrf.mxu1 }
 0x1bc   : > { %v3679_v55 = vadd.f32 %v5524_v34, %v3292_v24  ;;  %v3291_v26 = vadd.f32 %v3132_v51, %v2904_v36  ;;  %v3519_v46 = vpop.f32.mrf.mxu0  ;;  %v7063_v36 = vadd.f32 %v7658_v30, %v2532_v25  ;;  %v7666_v30 = vld [vmem:[#allocation36_spill] sm:$0xff] }
 0x1bd   : > { %v5477_v42 = vpop.f32.mrf.mxu1 }
 0x1be   : > { %v3786_v3 = vmul.f32 %v3679_v55, %v3679_v55  ;;  %3891 = vst.msk [vmem:[%s7024_s23 + $0x8] sm:$0xff] %vm3711_vm2, %v3679_v55  ;;  %v3678_v32 = vadd.f32 %v3519_v46, %v3291_v26  ;;  %v3294_v22 = vadd.f32 %v5477_v42, %v2907_v56  ;;  %v5527_v63 = vpop.f32.mrf.mxu0  ;;  %v3713_v43 = vsel %vm3711_vm2, %v3679_v55, 0.0  ;;  %v7659_v56 = vld [vmem:[#allocation9_spill] sm:$0xff]  ;;  %v7661_v46 = vld [vmem:[#allocation20_spill] sm:$0xff]  ;;  %v7662_v42 = vld [vmem:[#allocation11_spill] sm:$0xff] }
 0x1bf   : > { %v3142_v16 = vpop.f32.mrf.mxu1 }
 0x1c0   : > { %v3712_v17 = vsel %vm3711_vm2, %v3678_v32, 0.0  ;;  %v3785_v15 = vmul.f32 %v3678_v32, %v3678_v32  ;;  %3890 = vst.msk [vmem:[%s7024_s23] sm:$0xff] %vm3711_vm2, %v3678_v32  ;;  %v3681_v50 = vadd.f32 %v5527_v63, %v3294_v22  ;;  %v3529_v41 = vpop.f32.mrf.mxu0  ;;  %v3293_v39 = vadd.f32 %v3142_v16, %v2906_v49 }
 0x1c1   : > { %v3714_v8 = vadd.f32 %v3713_v43, %v3712_v17  ;;  %v5480_v29 = vpop.f32.mrf.mxu1  ;;  %v3818_v9 = vsel %vm3711_vm2, %v3786_v3, 0.0  ;;  %v7069_v49 = vadd.f32 %v7659_v56, %v2535_v12  ;;  %v2537_v3 = vadd.f32 %v7662_v42, %v7661_v46  ;;  %v7663_v12 = vld [vmem:[#allocation21_spill] sm:$0xff] }
 0x1c2   : > { %v3817_v10 = vsel %vm3711_vm2, %v3785_v15, 0.0  ;;  %3893 = vst.msk [vmem:[%s7024_s23 + $0x18] sm:$0xff] %vm3711_vm2, %v3681_v50  ;;  %v3296_v20 = vadd.f32 %v5480_v29, %v2909_v40  ;;  %v5530_v11 = vpop.f32.mrf.mxu0  ;;  %v3680_v14 = vadd.f32 %v3529_v41, %v3293_v39  ;;  %v3788_v47 = vmul.f32 %v3681_v50, %v3681_v50  ;;  %v7660_v40 = vld [vmem:[#allocation10_spill] sm:$0xff] }
 0x1c3   : > { %v3819_v38 = vadd.f32 %v3818_v9, %v3817_v10  ;;  %v3152_v5 = vpop.f32.mrf.mxu1  ;;  %v7072_v51 = vadd.f32 %v7660_v40, %v2534_v1  ;;  %v3717_v32 = vsel %vm3711_vm2, %v3681_v50, 0.0 }
 0x1c4   : > { %v3683_v27 = vadd.f32 %v5530_v11, %v3296_v20  ;;  %v3295_v60 = vadd.f32 %v3152_v5, %v2908_v7  ;;  %v3539_v62 = vpop.f32.mrf.mxu0  ;;  %v3715_v61 = vsel %vm3711_vm2, %v3680_v14, 0.0  ;;  %v3787_v24 = vmul.f32 %v3680_v14, %v3680_v14  ;;  %3892 = vst.msk [vmem:[%s7024_s23 + $0x10] sm:$0xff] %vm3711_vm2, %v3680_v14 }
 0x1c5   : > { %v5483_v34 = vpop.f32.mrf.mxu1  ;;  %v3716_v7 = vadd.f32 %v3715_v61, %v3714_v8  ;;  %v3822_v23 = vsel %vm3711_vm2, %v3788_v47, 0.0  ;;  %v7664_v8 = vld [vmem:[#allocation13_spill] sm:$0xff]  ;;  %v7665_v47 = vld [vmem:[#allocation12_spill] sm:$0xff] }
 0x1c6   : > { %3895 = vst.msk [vmem:[%s7024_s23 + $0x28] sm:$0xff] %vm3711_vm2, %v3683_v27  ;;  %v3682_v55 = vadd.f32 %v3539_v62, %v3295_v60  ;;  %v5533_v26 = vpop.f32.mrf.mxu0  ;;  %v3820_v22 = vsel %vm3711_vm2, %v3787_v24, 0.0  ;;  %v3298_v63 = vadd.f32 %v5483_v34, %v7004_v45  ;;  %v3790_v17 = vmul.f32 %v3683_v27, %v3683_v27  ;;  %v7667_v24 = vld [vmem:[#allocation22_spill] sm:$0xff] }
 0x1c7   : > { %v3162_v19 = vpop.f32.mrf.mxu1  ;;  %v3821_v48 = vadd.f32 %v3820_v22, %v3819_v38  ;;  %v3718_v35 = vadd.f32 %v3717_v32, %v3716_v7  ;;  %v2536_v45 = vadd.f32 %v7664_v8, %v7663_v12  ;;  %v3721_v10 = vsel %vm3711_vm2, %v3683_v27, 0.0  ;;  %v7668_v34 = vld [vmem:[#allocation14_spill] sm:$0xff]  ;;  %v7669_v12 = vld [vmem:[#allocation23_spill] sm:$0xff] }
 0x1c8   : > { %v3719_v16 = vsel %vm3711_vm2, %v3682_v55, 0.0  ;;  %3894 = vst.msk [vmem:[%s7024_s23 + $0x20] sm:$0xff] %vm3711_vm2, %v3682_v55  ;;  %v3549_v43 = vpop.f32.mrf.mxu0  ;;  %v3789_v15 = vmul.f32 %v3682_v55, %v3682_v55  ;;  %v3685_v41 = vadd.f32 %v5533_v26, %v3298_v63  ;;  %v3297_v50 = vadd.f32 %v3162_v19, %v7007_v4  ;;  %v7670_v8 = vld [vmem:[#allocation7_spill] sm:$0xff] }
 0x1c9   : > { %v5486_v25 = vpop.f32.mrf.mxu1  ;;  %v3720_v39 = vadd.f32 %v3719_v16, %v3718_v35  ;;  %v3823_v29 = vadd.f32 %v3822_v23, %v3821_v48  ;;  %v3826_v60 = vsel %vm3711_vm2, %v3790_v17, 0.0  ;;  %v7102_v61 = vadd.f32 %v7666_v30, %v2536_v45  ;;  %v7671_v45 = vld [vmem:[#allocation24_spill] sm:$0xff]  ;;  %v7673_v30 = vld [vmem:[#allocation15_spill] sm:$0xff] }
 0x1ca   : > { %v3300_v1 = vadd.f32 %v5486_v25, %v7010_v59  ;;  %v5536_v9 = vpop.f32.mrf.mxu0  ;;  %v3824_v20 = vsel %vm3711_vm2, %v3789_v15, 0.0  ;;  %v3792_v11 = vmul.f32 %v3685_v41, %v3685_v41  ;;  %3897 = vst.msk [vmem:[%s7024_s23 + $0x38] sm:$0xff] %vm3711_vm2, %v3685_v41  ;;  %v3684_v54 = vadd.f32 %v3549_v43, %v3297_v50 }
 0x1cb   : > { %v3172_v37 = vpop.f32.mrf.mxu1  ;;  %v3825_v4 = vadd.f32 %v3824_v20, %v3823_v29  ;;  %v3722_v38 = vadd.f32 %v3721_v10, %v3720_v39  ;;  %v7095_v59 = vadd.f32 %v7665_v47, %v2537_v3  ;;  %v2539_v56 = vadd.f32 %v7668_v34, %v7667_v24  ;;  %v7672_v39 = vld [vmem:[#allocation16_spill] sm:$0xff] }
 0x1cc   : > { %v3687_v14 = vadd.f32 %v5536_v9, %v3300_v1  ;;  %v3299_v5 = vadd.f32 %v3172_v37, %v7013_v57  ;;  %v3559_v53 = vpop.f32.mrf.mxu0  ;;  %v3723_v27 = vsel %vm3711_vm2, %v3684_v54, 0.0  ;;  %v3791_v62 = vmul.f32 %v3684_v54, %v3684_v54  ;;  %3896 = vst.msk [vmem:[%s7024_s23 + $0x30] sm:$0xff] %vm3711_vm2, %v3684_v54 }
 0x1cd   : > { %v5489_v52 = vpop.f32.mrf.mxu1  ;;  %v3724_v40 = vadd.f32 %v3723_v27, %v3722_v38  ;;  %v3827_v57 = vadd.f32 %v3826_v60, %v3825_v4  ;;  %v3725_v55 = vsel %vm3711_vm2, %v3685_v41, 0.0  ;;  %v3830_v32 = vsel %vm3711_vm2, %v3792_v11, 0.0 }
 0x1ce   : > { %3899 = vst.msk [vmem:[%s7024_s23 + $0x48] sm:$0xff] %vm3711_vm2, %v3687_v14  ;;  %v5539_v7 = vpop.f32.mrf.mxu0  ;;  %v3828_v26 = vsel %vm3711_vm2, %v3791_v62, 0.0  ;;  %v3686_v46 = vadd.f32 %v3559_v53, %v3299_v5  ;;  %v3302_v42 = vadd.f32 %v5489_v52, %v7016_v44  ;;  %v3794_v48 = vmul.f32 %v3687_v14, %v3687_v14 }
 0x1cf   : > { %v3182_v3 = vpop.f32.mrf.mxu1  ;;  %v3829_v22 = vadd.f32 %v3828_v26, %v3827_v57  ;;  %v3726_v63 = vadd.f32 %v3725_v55, %v3724_v40  ;;  %v2541_v29 = vadd.f32 %v7672_v39, %v7671_v45  ;;  %v3729_v1 = vsel %vm3711_vm2, %v3687_v14, 0.0 }
 0x1d0   : > { %v3301_v19 = vadd.f32 %v3182_v3, %v7019_v58  ;;  %v3569_v23 = vpop.f32.mrf.mxu0  ;;  %v3727_v35 = vsel %vm3711_vm2, %v3686_v46, 0.0  ;;  %v3793_v16 = vmul.f32 %v3686_v46, %v3686_v46  ;;  %3898 = vst.msk [vmem:[%s7024_s23 + $0x40] sm:$0xff] %vm3711_vm2, %v3686_v46  ;;  %v3689_v43 = vadd.f32 %v5539_v7, %v3302_v42 }
 0x1d1   : > { %v5492_v17 = vpop.f32.mrf.mxu1  ;;  %v3728_v15 = vadd.f32 %v3727_v35, %v3726_v63  ;;  %v3831_v44 = vadd.f32 %v3830_v32, %v3829_v22  ;;  %v2538_v58 = vadd.f32 %v7670_v8, %v7669_v12  ;;  %v3834_v4 = vsel %vm3711_vm2, %v3794_v48, 0.0  ;;  %v7676_v48 = vld [vmem:[#allocation25_spill] sm:$0xff]  ;;  %v7677_v35 = vld [vmem:[#allocation19_spill] sm:$0xff] }
 0x1d2   : > { %v3688_v41 = vadd.f32 %v3569_v23, %v3301_v19  ;;  %v3304_v50 = vadd.f32 %v5492_v17, %v7022_v33  ;;  %v5542_v25 = vpop.f32.mrf.mxu0  ;;  %v3832_v9 = vsel %vm3711_vm2, %v3793_v16, 0.0  ;;  %3901 = vst.msk [vmem:[%s7024_s23 + $0x58] sm:$0xff] %vm3711_vm2, %v3689_v43  ;;  %v3796_v38 = vmul.f32 %v3689_v43, %v3689_v43  ;;  %v7675_v19 = vld [vmem:[#allocation18_spill] sm:$0xff] }
 0x1d3   : > { %v3192_v10 = vpop.f32.mrf.mxu1  ;;  %v3833_v20 = vadd.f32 %v3832_v9, %v3831_v44  ;;  %v3730_v11 = vadd.f32 %v3729_v1, %v3728_v15  ;;  %v7133_v24 = vadd.f32 %v7673_v30, %v2539_v56  ;;  %v3733_v34 = vsel %vm3711_vm2, %v3689_v43, 0.0 }
 0x1d4   : > { %v3731_v54 = vsel %vm3711_vm2, %v3688_v41, 0.0  ;;  %v3795_v37 = vmul.f32 %v3688_v41, %v3688_v41  ;;  %3900 = vst.msk [vmem:[%s7024_s23 + $0x50] sm:$0xff] %vm3711_vm2, %v3688_v41  ;;  %v3579_v33 = vpop.f32.mrf.mxu0  ;;  %v3691_v5 = vadd.f32 %v5542_v25, %v3304_v50  ;;  %v3303_v14 = vadd.f32 %v3192_v10, %v7051_v31 }
 0x1d5   : > { %v5495_v53 = vpop.f32.mrf.mxu1  ;;  %v3732_v47 = vadd.f32 %v3731_v54, %v3730_v11  ;;  %v3835_v60 = vadd.f32 %v3834_v4, %v3833_v20  ;;  %v3838_v56 = vsel %vm3711_vm2, %v3796_v38, 0.0  ;;  %v7147_v23 = vadd.f32 %v7675_v19, %v2541_v29  ;;  %v7678_v4 = vld [vmem:[#allocation26_spill] sm:$0xff] }
 0x1d6   : > { %v3836_v27 = vsel %vm3711_vm2, %v3795_v37, 0.0  ;;  %v3306_v62 = vadd.f32 %v5495_v53, %v7054_v28  ;;  %v5545_v52 = vpop.f32.mrf.mxu0  ;;  %v3798_v40 = vmul.f32 %v3691_v5, %v3691_v5  ;;  %3903 = vst.msk [vmem:[%s7024_s23 + $0x68] sm:$0xff] %vm3711_vm2, %v3691_v5  ;;  %v3690_v57 = vadd.f32 %v3579_v33, %v3303_v14  ;;  %v7674_v28 = vld [vmem:[#allocation17_spill] sm:$0xff]  ;;  %v7679_v38 = vld [vmem:[#allocation38_spill] sm:$0xff]  ;;  %v7681_v14 = vld [vmem:[#allocation40_spill] sm:$0xff] }
 0x1d7   : > { %v3202_v7 = vpop.f32.mrf.mxu1  ;;  %v3837_v31 = vadd.f32 %v3836_v27, %v3835_v60  ;;  %v3734_v55 = vadd.f32 %v3733_v34, %v3732_v47  ;;  %v7140_v3 = vadd.f32 %v7674_v28, %v2538_v58  ;;  %v2540_v16 = vadd.f32 %v7677_v35, %v7676_v48 }
 0x1d8   : > { %v3693_v26 = vadd.f32 %v5545_v52, %v3306_v62  ;;  %v3305_v46 = vadd.f32 %v3202_v7, %v7057_v6  ;;  %v3589_v42 = vpop.f32.mrf.mxu0  ;;  %v3735_v32 = vsel %vm3711_vm2, %v3690_v57, 0.0  ;;  %v3797_v22 = vmul.f32 %v3690_v57, %v3690_v57  ;;  %3902 = vst.msk [vmem:[%s7024_s23 + $0x60] sm:$0xff] %vm3711_vm2, %v3690_v57 }
 0x1d9   : > { %v5498_v63 = vpop.f32.mrf.mxu1  ;;  %v3736_v43 = vadd.f32 %v3735_v32, %v3734_v55  ;;  %v3839_v6 = vadd.f32 %v3838_v56, %v3837_v31  ;;  %v3737_v15 = vsel %vm3711_vm2, %v3691_v5, 0.0  ;;  %v3842_v12 = vsel %vm3711_vm2, %v3798_v40, 0.0  ;;  %v7680_v5 = vld [vmem:[#allocation27_spill] sm:$0xff]  ;;  %v7682_v32 = vld [vmem:[#allocation37_spill] sm:$0xff] }
 0x1da   : > { %3905 = vst.msk [vmem:[%s7024_s23 + $0x78] sm:$0xff] %vm3711_vm2, %v3693_v26  ;;  %v5548_v17 = vpop.f32.mrf.mxu0  ;;  %v3840_v44 = vsel %vm3711_vm2, %v3797_v22, 0.0  ;;  %v3692_v41 = vadd.f32 %v3589_v42, %v3305_v46  ;;  %v3308_v50 = vadd.f32 %v5498_v63, %v7060_v13  ;;  %v3800_v29 = vmul.f32 %v3693_v26, %v3693_v26 }
 0x1db   : > { %v3212_v25 = vpop.f32.mrf.mxu1  ;;  %v3841_v8 = vadd.f32 %v3840_v44, %v3839_v6  ;;  %v3738_v58 = vadd.f32 %v3737_v15, %v3736_v43  ;;  %v2542_v53 = vadd.f32 %v7681_v14, %v7680_v5  ;;  %v3741_v47 = vsel %vm3711_vm2, %v3693_v26, 0.0  ;;  %v7683_v44 = vld [vmem:[#allocation39_spill] sm:$0xff] }
 0x1dc   : > { %v3307_v45 = vadd.f32 %v3212_v25, %v7063_v36  ;;  %v3599_v39 = vpop.f32.mrf.mxu0  ;;  %v3739_v1 = vsel %vm3711_vm2, %v3692_v41, 0.0  ;;  %v3799_v9 = vmul.f32 %v3692_v41, %v3692_v41  ;;  %3904 = vst.msk [vmem:[%s7024_s23 + $0x70] sm:$0xff] %vm3711_vm2, %v3692_v41  ;;  %v3695_v10 = vadd.f32 %v5548_v17, %v3308_v50 }
 0x1dd   : > { %v5501_v20 = vpop.f32.mrf.mxu1  ;;  %v3740_v11 = vadd.f32 %v3739_v1, %v3738_v58  ;;  %v3843_v13 = vadd.f32 %v3842_v12, %v3841_v8  ;;  %v2543_v36 = vadd.f32 %v7679_v38, %v7678_v4  ;;  %v3846_v40 = vsel %vm3711_vm2, %v3800_v29, 0.0  ;;  %v7684_v12 = vld [vmem:[#allocation41_spill] sm:$0xff]  ;;  %v7685_v58 = vld [vmem:[#allocation28_spill] sm:$0xff] }
 0x1de   : > { %v3694_v54 = vadd.f32 %v3599_v39, %v3307_v45  ;;  %v3310_v37 = vadd.f32 %v5501_v20, %v7069_v49  ;;  %v5551_v33 = vpop.f32.mrf.mxu0  ;;  %v3844_v60 = vsel %vm3711_vm2, %v3799_v9, 0.0  ;;  %3907 = vst.msk [vmem:[%s7024_s23 + $0x88] sm:$0xff] %vm3711_vm2, %v3695_v10  ;;  %v3802_v57 = vmul.f32 %v3695_v10, %v3695_v10  ;;  %v7686_v45 = vld [vmem:[#allocation42_spill] sm:$0xff] }
 0x1df   : > { %v3222_v27 = vpop.f32.mrf.mxu1  ;;  %v3845_v62 = vadd.f32 %v3844_v60, %v3843_v13  ;;  %v3742_v52 = vadd.f32 %v3741_v47, %v3740_v11  ;;  %v2928_v22 = vadd.f32 %v7682_v32, %v2540_v16  ;;  %v3745_v63 = vsel %vm3711_vm2, %v3695_v10, 0.0 }
 0x1e0   : > { %v3743_v30 = vsel %vm3711_vm2, %v3694_v54, 0.0  ;;  %v3801_v34 = vmul.f32 %v3694_v54, %v3694_v54  ;;  %3906 = vst.msk [vmem:[%s7024_s23 + $0x80] sm:$0xff] %vm3711_vm2, %v3694_v54  ;;  %v3609_v49 = vpop.f32.mrf.mxu0  ;;  %v3697_v7 = vadd.f32 %v5551_v33, %v3310_v37  ;;  %v3309_v31 = vadd.f32 %v3222_v27, %v7072_v51 }
 0x1e1   : > { %v5504_v55 = vpop.f32.mrf.mxu1  ;;  %v3744_v26 = vadd.f32 %v3743_v30, %v3742_v52  ;;  %v3847_v46 = vadd.f32 %v3846_v40, %v3845_v62  ;;  %v3850_v41 = vsel %vm3711_vm2, %v3802_v57, 0.0  ;;  %v2930_v8 = vadd.f32 %v7684_v12, %v2542_v53  ;;  %v7687_v30 = vld [vmem:[#allocation29_spill] sm:$0xff] }
 0x1e2   : > { %v3848_v42 = vsel %vm3711_vm2, %v3801_v34, 0.0  ;;  %v3312_v28 = vadd.f32 %v5504_v55, %v7095_v59  ;;  %v5554_v56 = vpop.f32.mrf.mxu0  ;;  %v3804_v19 = vmul.f32 %v3697_v7, %v3697_v7  ;;  %3909 = vst.msk [vmem:[%s7024_s23 + $0x98] sm:$0xff] %vm3711_vm2, %v3697_v7  ;;  %v3696_v48 = vadd.f32 %v3609_v49, %v3309_v31  ;;  %v7688_v34 = vld [vmem:[#allocation30_spill] sm:$0xff]  ;;  %v7689_v49 = vld [vmem:[#allocation45_spill] sm:$0xff] }
 0x1e3   : > { %v3232_v35 = vpop.f32.mrf.mxu1  ;;  %v3849_v51 = vadd.f32 %v3848_v42, %v3847_v46  ;;  %v3746_v43 = vadd.f32 %v3745_v63, %v3744_v26  ;;  %v2931_v59 = vadd.f32 %v7683_v44, %v2543_v36  ;;  %v2545_v39 = vadd.f32 %v7686_v45, %v7685_v58  ;;  %v7691_v45 = vld [vmem:[#allocation44_spill] sm:$0xff] }
 0x1e4   : > { %v3699_v6 = vadd.f32 %v5554_v56, %v3312_v28  ;;  %v3311_v17 = vadd.f32 %v3232_v35, %v7102_v61  ;;  %v3619_v15 = vpop.f32.mrf.mxu0  ;;  %v3747_v16 = vsel %vm3711_vm2, %v3696_v48, 0.0  ;;  %v3803_v50 = vmul.f32 %v3696_v48, %v3696_v48  ;;  %3908 = vst.msk [vmem:[%s7024_s23 + $0x90] sm:$0xff] %vm3711_vm2, %v3696_v48 }
 0x1e5   : > { %v5507_v25 = vpop.f32.mrf.mxu1  ;;  %v3748_v29 = vadd.f32 %v3747_v16, %v3746_v43  ;;  %v3851_v1 = vadd.f32 %v3850_v41, %v3849_v51  ;;  %v3749_v9 = vsel %vm3711_vm2, %v3697_v7, 0.0  ;;  %v3854_v54 = vsel %vm3711_vm2, %v3804_v19, 0.0 }
 0x1e6   : > { %3911 = vst.msk [vmem:[%s7024_s23 + $0xa8] sm:$0xff] %vm3711_vm2, %v3699_v6  ;;  %v5557_v61 = vpop.f32.mrf.mxu0  ;;  %v3852_v10 = vsel %vm3711_vm2, %v3803_v50, 0.0  ;;  %v3698_v20 = vadd.f32 %v3619_v15, %v3311_v17  ;;  %v3314_v11 = vadd.f32 %v5507_v25, %v7133_v24  ;;  %v3806_v36 = vmul.f32 %v3699_v6, %v3699_v6 }
 0x1e7   : > { %v3242_v13 = vpop.f32.mrf.mxu1  ;;  %v3853_v37 = vadd.f32 %v3852_v10, %v3851_v1  ;;  %v3750_v33 = vadd.f32 %v3749_v9, %v3748_v29  ;;  %v2547_v40 = vadd.f32 %v7689_v49, %v7688_v34  ;;  %v3753_v57 = vsel %vm3711_vm2, %v3699_v6, 0.0  ;;  %v7690_v6 = vld [vmem:[#allocation43_spill] sm:$0xff] }
 0x1e8   : > { %v3313_v4 = vadd.f32 %v3242_v13, %v7140_v3  ;;  %v3629_v38 = vpop.f32.mrf.mxu0  ;;  %v3751_v5 = vsel %vm3711_vm2, %v3698_v20, 0.0  ;;  %v3805_v14 = vmul.f32 %v3698_v20, %v3698_v20  ;;  %3910 = vst.msk [vmem:[%s7024_s23 + $0xa0] sm:$0xff] %vm3711_vm2, %v3698_v20  ;;  %v3701_v53 = vadd.f32 %v5557_v61, %v3314_v11  ;;  %v7692_v10 = vld [vmem:[#allocation31_spill] sm:$0xff] }
 0x1e9   : > { %v5510_v47 = vpop.f32.mrf.mxu1  ;;  %v3752_v60 = vadd.f32 %v3751_v5, %v3750_v33  ;;  %v3855_v24 = vadd.f32 %v3854_v54, %v3853_v37  ;;  %v2544_v3 = vadd.f32 %v6971_v2, %v7687_v30  ;;  %v3858_v2 = vsel %vm3711_vm2, %v3806_v36, 0.0 }
 0x1ea   : > { %v3700_v27 = vadd.f32 %v3629_v38, %v3313_v4  ;;  %v3316_v62 = vadd.f32 %v5510_v47, %v7147_v23  ;;  %v5560_v52 = vpop.f32.mrf.mxu0  ;;  %v3856_v7 = vsel %vm3711_vm2, %v3805_v14, 0.0  ;;  %3913 = vst.msk [vmem:[%s7024_s23 + $0xb8] sm:$0xff] %vm3711_vm2, %v3701_v53  ;;  %v3808_v28 = vmul.f32 %v3701_v53, %v3701_v53 }
 0x1eb   : > { %v3252_v31 = vpop.f32.mrf.mxu1  ;;  %v3857_v55 = vadd.f32 %v3856_v7, %v3855_v24  ;;  %v3754_v26 = vadd.f32 %v3753_v57, %v3752_v60  ;;  %v2933_v17 = vadd.f32 %v7690_v6, %v2545_v39  ;;  %v3757_v15 = vsel %vm3711_vm2, %v3701_v53, 0.0 }
 0x1ec   : > { %v3755_v46 = vsel %vm3711_vm2, %v3700_v27, 0.0  ;;  %v3807_v42 = vmul.f32 %v3700_v27, %v3700_v27  ;;  %3912 = vst.msk [vmem:[%s7024_s23 + $0xb0] sm:$0xff] %vm3711_vm2, %v3700_v27  ;;  %v3639_v23 = vpop.f32.mrf.mxu0  ;;  %v3703_v56 = vadd.f32 %v5560_v52, %v3316_v62  ;;  %v3315_v32 = vadd.f32 %v3252_v31, %v2928_v22 }
 0x1ed   : > { %v5513_v63 = vpop.f32.mrf.mxu1  ;;  %v3756_v19 = vadd.f32 %v3755_v46, %v3754_v26  ;;  %v3859_v48 = vadd.f32 %v3858_v2, %v3857_v55  ;;  %v2932_v29 = vadd.f32 %v7691_v45, %v2544_v3  ;;  %v2935_v9 = vadd.f32 %v6979_v21, %v2547_v40 }
 0x1ee   : > { %v3860_v35 = vsel %vm3711_vm2, %v3807_v42, 0.0  ;;  %v3318_v51 = vadd.f32 %v5513_v63, %v2931_v59  ;;  %v5563_v43 = vpop.f32.mrf.mxu0  ;;  %v3810_v44 = vmul.f32 %v3703_v56, %v3703_v56  ;;  %3915 = vst.msk [vmem:[%s7024_s23 + $0xc8] sm:$0xff] %vm3711_vm2, %v3703_v56  ;;  %v3702_v41 = vadd.f32 %v3639_v23, %v3315_v32 }
 0x1ef   : > { %v3262_v16 = vpop.f32.mrf.mxu1  ;;  %v3861_v50 = vadd.f32 %v3860_v35, %v3859_v48  ;;  %v3758_v22 = vadd.f32 %v3757_v15, %v3756_v19  ;;  %v3862_v59 = vsel %vm3711_vm2, %v3808_v28, 0.0  ;;  %v2546_v20 = vadd.f32 %v6985_v18, %v7692_v10 }
 0x1f0   : > { %v3705_v25 = vadd.f32 %v5563_v43, %v3318_v51  ;;  %v3317_v12 = vadd.f32 %v3262_v16, %v2930_v8  ;;  %v3649_v58 = vpop.f32.mrf.mxu0  ;;  %v3759_v1 = vsel %vm3711_vm2, %v3702_v41, 0.0  ;;  %v3809_v39 = vmul.f32 %v3702_v41, %v3702_v41  ;;  %3914 = vst.msk [vmem:[%s7024_s23 + $0xc0] sm:$0xff] %vm3711_vm2, %v3702_v41 }
 0x1f1   : > { %v5516_v61 = vpop.f32.mrf.mxu1  ;;  %v3760_v11 = vadd.f32 %v3759_v1, %v3758_v22  ;;  %v3863_v13 = vadd.f32 %v3862_v59, %v3861_v50  ;;  %v3761_v54 = vsel %vm3711_vm2, %v3703_v56, 0.0  ;;  %v3866_v36 = vsel %vm3711_vm2, %v3810_v44, 0.0 }
 0x1f2   : > { %3917 = vst.msk [vmem:[%s7024_s23 + $0xd8] sm:$0xff] %vm3711_vm2, %v3705_v25  ;;  %v5566_v8 = vpop.f32.mrf.mxu0  ;;  %v3864_v37 = vsel %vm3711_vm2, %v3809_v39, 0.0  ;;  %v3704_v33 = vadd.f32 %v3649_v58, %v3317_v12  ;;  %v3320_v4 = vadd.f32 %v5516_v61, %v2933_v17  ;;  %v3812_v53 = vmul.f32 %v3705_v25, %v3705_v25 }
 0x1f3   : > { %v3272_v38 = vpop.f32.mrf.mxu1  ;;  %v3865_v5 = vadd.f32 %v3864_v37, %v3863_v13  ;;  %v3762_v21 = vadd.f32 %v3761_v54, %v3760_v11  ;;  %v2934_v49 = vadd.f32 %v6990_v0, %v2546_v20  ;;  %v3765_v40 = vsel %vm3711_vm2, %v3705_v25, 0.0  ;;  %v3710_v11 = vld [vmem:[#allocation2] sm:$0x1]  ;;  %v3784_v54 = vld [vmem:[#allocation3] sm:$0x1] }
 0x1f4   : > { %v3319_v14 = vadd.f32 %v3272_v38, %v2932_v29  ;;  %v3659_v18 = vpop.f32.mrf.mxu0  ;;  %v3763_v47 = vsel %vm3711_vm2, %v3704_v33, 0.0  ;;  %v3811_v60 = vmul.f32 %v3704_v33, %v3704_v33  ;;  %3916 = vst.msk [vmem:[%s7024_s23 + $0xd0] sm:$0xff] %vm3711_vm2, %v3704_v33  ;;  %v3707_v24 = vadd.f32 %v5566_v8, %v3320_v4 }
 0x1f5   : > { %v5519_v27 = vpop.f32.mrf.mxu1  ;;  %v3764_v62 = vadd.f32 %v3763_v47, %v3762_v21  ;;  %v3867_v52 = vadd.f32 %v3866_v36, %v3865_v5  ;;  %v3870_v42 = vsel %vm3711_vm2, %v3812_v53, 0.0 }
 0x1f6   : > { %v3706_v30 = vadd.f32 %v3659_v18, %v3319_v14  ;;  %v3322_v3 = vadd.f32 %v5519_v27, %v2935_v9  ;;  %v5569_v34 = vpop.f32.mrf.mxu0  ;;  %v3868_v57 = vsel %vm3711_vm2, %v3811_v60, 0.0  ;;  %3919 = vst.msk [vmem:[%s7024_s23 + $0xe8] sm:$0xff] %vm3711_vm2, %v3707_v24  ;;  %v3814_v23 = vmul.f32 %v3707_v24, %v3707_v24 }
 0x1f7   : > { %v3282_v7 = vpop.f32.mrf.mxu1  ;;  %v3869_v31 = vadd.f32 %v3868_v57, %v3867_v52  ;;  %v3766_v55 = vadd.f32 %v3765_v40, %v3764_v62  ;;  %v3769_v19 = vsel %vm3711_vm2, %v3707_v24, 0.0 }
 0x1f8   : > { %v3767_v26 = vsel %vm3711_vm2, %v3706_v30, 0.0  ;;  %v3813_v46 = vmul.f32 %v3706_v30, %v3706_v30  ;;  %3918 = vst.msk [vmem:[%s7024_s23 + $0xe0] sm:$0xff] %vm3711_vm2, %v3706_v30  ;;  %v3709_v0 = vadd.f32 %v5569_v34, %v3322_v3  ;;  %v3321_v2 = vadd.f32 %v3282_v7, %v2934_v49  ;;  %v3669_v63 = vpop.f32.mrf.mxu0 }
 0x1f9   : > { %v3768_v28 = vadd.f32 %v3767_v26, %v3766_v55  ;;  %v3871_v56 = vadd.f32 %v3870_v42, %v3869_v31  ;;  %v3874_v43 = vsel %vm3711_vm2, %v3814_v23, 0.0 }
 0x1fa   : > { %v3872_v32 = vsel %vm3711_vm2, %v3813_v46, 0.0  ;;  %3921 = vst.msk [vmem:[%s7024_s23 + $0xf8] sm:$0xff] %vm3711_vm2, %v3709_v0  ;;  %v3708_v48 = vadd.f32 %v3669_v63, %v3321_v2  ;;  %v3816_v6 = vmul.f32 %v3709_v0, %v3709_v0  ;;  %v3773_v16 = vsel %vm3711_vm2, %v3709_v0, 0.0 }
 0x1fb   : > { %v3873_v35 = vadd.f32 %v3872_v32, %v3871_v56  ;;  %v3770_v51 = vadd.f32 %v3769_v19, %v3768_v28 }
 0x1fc   : > { %v3771_v17 = vsel %vm3711_vm2, %v3708_v48, 0.0  ;;  %v3815_v15 = vmul.f32 %v3708_v48, %v3708_v48  ;;  %3920 = vst.msk [vmem:[%s7024_s23 + $0xf0] sm:$0xff] %vm3711_vm2, %v3708_v48  ;;  %v3878_v12 = vsel %vm3711_vm2, %v3816_v6, 0.0 }
 0x1fd   : > { %v3772_v44 = vadd.f32 %v3771_v17, %v3770_v51  ;;  %v3875_v41 = vadd.f32 %v3874_v43, %v3873_v35 }
 0x1fe   : > { %v3876_v50 = vsel %vm3711_vm2, %v3815_v15, 0.0 }
 0x1ff   : > { %v3774_v22 = vadd.f32 %v3773_v16, %v3772_v44  ;;  %v3877_v25 = vadd.f32 %v3876_v50, %v3875_v41 }
 0x201   : > { %v3775_v58 = vrot.slane %v3774_v22, 4  ;;  %v3879_v45 = vadd.f32 %v3878_v12, %v3877_v25 }
 0x203   : > { %v3776_v29 = vadd.f32 %v3775_v58, %v3774_v22  ;;  %v3880_v59 = vrot.slane %v3879_v45, 4 }
 0x205   : > { %v3777_v1 = vrot.slane %v3776_v29, 2  ;;  %v3881_v39 = vadd.f32 %v3880_v59, %v3879_v45 }
 0x207   : > { %v3778_v61 = vadd.f32 %v3777_v1, %v3776_v29  ;;  %v3882_v9 = vrot.slane %v3881_v39, 2 }
 0x209   : > { %v3779_v10 = vrot.slane %v3778_v61, 1  ;;  %v3883_v20 = vadd.f32 %v3882_v9, %v3881_v39 }
 0x20b   : > { %v3780_v13 = vadd.f32 %v3779_v10, %v3778_v61  ;;  %v3884_v8 = vrot.slane %v3883_v20, 1 }
 0x20d   : > { %v3781_v37 = vadd.f32 %v3780_v13, %v3710_v11  ;;  %v3885_v33 = vadd.f32 %v3884_v8, %v3883_v20  ;;  %3925 = sbr.rel (%p4818_p5) target bundleno = 617 (0x269), region = 48 }
 0x20f   : > { %3783 = vst.msk [vmem:[#allocation2] sm:$0x1] %vm3782_vm3, %v3781_v37  ;;  %v3886_v4 = vadd.f32 %v3885_v33, %v3784_v54 }
 0x211   : > { %3887 = vst.msk [vmem:[#allocation3] sm:$0x1] %vm3782_vm3, %v3886_v4 }
 0x212   : > { %v4005_v47 = vlaneseq  ;;  %v3934_v60 = vld [vmem:[%s7475_s3] sm:$0x1]  ;;  %v3940_v49 = vld [vmem:[#allocation4] sm:$0xff]  ;;  %v3941_v40 = vld [vmem:[#allocation4 + $0x8] sm:$0xff] }
 0x213   : > { %v3936_v30 = vld [vmem:[%s7476_s4] sm:$0x1]  ;;  %v3942_v57 = vld [vmem:[#allocation4 + $0x10] sm:$0xff]  ;;  %v3944_v26 = vld [vmem:[#allocation4 + $0x20] sm:$0xff] }
 0x214   : > { %v4006_v24 = vshrl.u32 %v4005_v47, 7  ;;  %v3943_v7 = vld [vmem:[#allocation4 + $0x18] sm:$0xff]  ;;  %v3945_v46 = vld [vmem:[#allocation4 + $0x28] sm:$0xff]  ;;  %v3946_v42 = vld [vmem:[#allocation4 + $0x30] sm:$0xff] }
 0x215   : > { %v3947_v23 = vld [vmem:[#allocation4 + $0x38] sm:$0xff]  ;;  %v3948_v17 = vld [vmem:[#allocation4 + $0x40] sm:$0xff]  ;;  %v3949_v50 = vld [vmem:[#allocation4 + $0x48] sm:$0xff] }
 0x216   : > { %v3926_v38 = vld [vmem:[#allocation2] sm:$0x1]  ;;  %v4007_v62 = vsub.s32 0, %v4006_v24  ;;  %v3950_v22 = vld [vmem:[#allocation4 + $0x50] sm:$0xff]  ;;  %v3952_v59 = vld [vmem:[#allocation4 + $0x60] sm:$0xff] }
 0x217   : > { %v3927_v5 = vmul.f32 0.001953125, %v3926_v38  ;;  %v3951_v25 = vld [vmem:[#allocation4 + $0x58] sm:$0xff]  ;;  %v3953_v1 = vld [vmem:[#allocation4 + $0x68] sm:$0xff]  ;;  %v3954_v39 = vld [vmem:[#allocation4 + $0x70] sm:$0xff] }
 0x218   : > { %v3928_v36 = vld [vmem:[#allocation3] sm:$0x1] }
 0x219   : > { %v3929_v21 = vmul.f32 0.001953125, %v3928_v36  ;;  %v3930_v14 = vmul.f32 %v3927_v5, %v3927_v5  ;;  %v3937_v27 = vmul.f32 %v3934_v60, %v3927_v5  ;;  %v3955_v11 = vld [vmem:[#allocation4 + $0x78] sm:$0xff] }
 0x21b   : > { %v3931_v18 = vsub.f32 %v3929_v21, %v3930_v14 }
 0x21d   : > { %v3932_v53 = vadd.f32 1e-05, %v3931_v18 }
 0x21f   : > { %5591 = vrsqrt.f32 %v3932_v53  ;;  %v3956_v53 = vld [vmem:[#allocation4 + $0x80] sm:$0xff] }
 0x22c   : > { %v5592_v52 = vpop.eup %5591 }
 0x22d   : > { %v3935_v3 = vmul.f32 %v5592_v52, %v3934_v60  ;;  %v3938_v34 = vmul.f32 %v5592_v52, %v3937_v27  ;;  %v3958_v52 = vld [vmem:[#allocation4 + $0x90] sm:$0xff] }
 0x22f   : > { %v3939_v31 = vsub.f32 %v3936_v30, %v3938_v34  ;;  %v7261_v55 = vrot.slane %v3935_v3, %v4007_v62  ;;  %v3959_v30 = vld [vmem:[#allocation4 + $0x98] sm:$0xff] }
 0x231   : > { %v4010_v0 = vmul.f32 %v7261_v55, %v3940_v49  ;;  %v7264_v2 = vrot.slane %v3939_v31, %v4007_v62  ;;  %v4011_v28 = vmul.f32 %v7261_v55, %v3941_v40  ;;  %v4012_v56 = vmul.f32 %v7261_v55, %v3942_v57  ;;  %v3957_v62 = vld [vmem:[#allocation4 + $0x88] sm:$0xff]  ;;  %v3960_v57 = vld [vmem:[#allocation4 + $0xa0] sm:$0xff]  ;;  %v3962_v31 = vld [vmem:[#allocation4 + $0xb0] sm:$0xff] }
 0x232   : > { %v4013_v32 = vmul.f32 %v7261_v55, %v3943_v7  ;;  %v4014_v63 = vmul.f32 %v7261_v55, %v3944_v26  ;;  %v4015_v19 = vmul.f32 %v7261_v55, %v3945_v46  ;;  %v4016_v48 = vmul.f32 %v7261_v55, %v3946_v42  ;;  %v3961_v7 = vld [vmem:[#allocation4 + $0xa8] sm:$0xff] }
 0x233   : > { %v4080_v35 = vadd.f32 %v7264_v2, %v4010_v0  ;;  %v4081_v51 = vadd.f32 %v7264_v2, %v4011_v28  ;;  %v4082_v43 = vadd.f32 %v7264_v2, %v4012_v56  ;;  %v4017_v6 = vmul.f32 %v7261_v55, %v3947_v23  ;;  %v3963_v0 = vld [vmem:[#allocation4 + $0xb8] sm:$0xff] }
 0x234   : > { %v4083_v15 = vadd.f32 %v7264_v2, %v4013_v32  ;;  %v4084_v44 = vadd.f32 %v7264_v2, %v4014_v63  ;;  %v4085_v41 = vadd.f32 %v7264_v2, %v4015_v19  ;;  %v4086_v16 = vadd.f32 %v7264_v2, %v4016_v48 }
 0x235   : > { %v4144_v12 = vmax.f32 %v4080_v35, 0.0  ;;  %v4145_v58 = vmax.f32 %v4081_v51, 0.0  ;;  %v4146_v45 = vmax.f32 %v4082_v43, 0.0  ;;  %v4087_v29 = vadd.f32 %v7264_v2, %v4017_v6 }
 0x236   : > { %v4147_v61 = vmax.f32 %v4083_v15, 0.0  ;;  %v4148_v9 = vmax.f32 %v4084_v44, 0.0  ;;  %v4149_v10 = vmax.f32 %v4085_v41, 0.0  ;;  %v4150_v20 = vmax.f32 %v4086_v16, 0.0  ;;  %v3964_v44 = vld [vmem:[#allocation4 + $0xc0] sm:$0xff] }
 0x237   : > { %4208 = vst.msk [vmem:[#allocation4] sm:$0xff] %vm3711_vm2, %v4144_v12  ;;  %4209 = vst.msk [vmem:[#allocation4 + $0x8] sm:$0xff] %vm3711_vm2, %v4145_v58  ;;  %v4151_v13 = vmax.f32 %v4087_v29, 0.0  ;;  %v4018_v8 = vmul.f32 %v7261_v55, %v3948_v17  ;;  %v4019_v54 = vmul.f32 %v7261_v55, %v3949_v50  ;;  %v4020_v37 = vmul.f32 %v7261_v55, %v3950_v22  ;;  %v3966_v12 = vld [vmem:[#allocation4 + $0xd0] sm:$0xff]  ;;  %v3967_v58 = vld [vmem:[#allocation4 + $0xd8] sm:$0xff] }
 0x238   : > { %4210 = vst.msk [vmem:[#allocation4 + $0x10] sm:$0xff] %vm3711_vm2, %v4146_v45  ;;  %4211 = vst.msk [vmem:[#allocation4 + $0x18] sm:$0xff] %vm3711_vm2, %v4147_v61  ;;  %v4021_v33 = vmul.f32 %v7261_v55, %v3951_v25  ;;  %v4022_v4 = vmul.f32 %v7261_v55, %v3952_v59  ;;  %v4023_v38 = vmul.f32 %v7261_v55, %v3953_v1  ;;  %v3965_v25 = vld [vmem:[#allocation4 + $0xc8] sm:$0xff] }
 0x239   : > { %4212 = vst.msk [vmem:[#allocation4 + $0x20] sm:$0xff] %vm3711_vm2, %v4148_v9  ;;  %4213 = vst.msk [vmem:[#allocation4 + $0x28] sm:$0xff] %vm3711_vm2, %v4149_v10  ;;  %v4024_v36 = vmul.f32 %v7261_v55, %v3954_v39  ;;  %v4088_v5 = vadd.f32 %v7264_v2, %v4018_v8  ;;  %v4089_v21 = vadd.f32 %v7264_v2, %v4019_v54  ;;  %v3968_v39 = vld [vmem:[#allocation4 + $0xe0] sm:$0xff]  ;;  %v3969_v61 = vld [vmem:[#allocation4 + $0xe8] sm:$0xff] }
 0x23a   : > { %4214 = vst.msk [vmem:[#allocation4 + $0x30] sm:$0xff] %vm3711_vm2, %v4150_v20  ;;  %4215 = vst.msk [vmem:[#allocation4 + $0x38] sm:$0xff] %vm3711_vm2, %v4151_v13  ;;  %v4090_v14 = vadd.f32 %v7264_v2, %v4020_v37  ;;  %v4025_v18 = vmul.f32 %v7261_v55, %v3955_v11  ;;  %v4091_v47 = vadd.f32 %v7264_v2, %v4021_v33  ;;  %v3970_v9 = vld [vmem:[#allocation4 + $0xf0] sm:$0xff]  ;;  %v3971_v8 = vld [vmem:[#allocation4 + $0xf8] sm:$0xff] }
 0x23b   : > { %v4092_v60 = vadd.f32 %v7264_v2, %v4022_v4  ;;  %v4093_v24 = vadd.f32 %v7264_v2, %v4023_v38  ;;  %v4094_v27 = vadd.f32 %v7264_v2, %v4024_v36  ;;  %v4152_v3 = vmax.f32 %v4088_v5, 0.0 }
 0x23c   : > { %v4153_v34 = vmax.f32 %v4089_v21, 0.0  ;;  %v4154_v49 = vmax.f32 %v4090_v14, 0.0  ;;  %v4095_v40 = vadd.f32 %v7264_v2, %v4025_v18  ;;  %v4155_v26 = vmax.f32 %v4091_v47, 0.0 }
 0x23d   : > { %v4156_v46 = vmax.f32 %v4092_v60, 0.0  ;;  %v4157_v42 = vmax.f32 %v4093_v24, 0.0  ;;  %v4158_v23 = vmax.f32 %v4094_v27, 0.0  ;;  %4216 = vst.msk [vmem:[#allocation4 + $0x40] sm:$0xff] %vm3711_vm2, %v4152_v3  ;;  %v4026_v56 = vmul.f32 %v7261_v55, %v3956_v53  ;;  %v3972_v60 = vld [vmem:[#allocation4 + $0x100] sm:$0xff]  ;;  %v3974_v3 = vld [vmem:[#allocation4 + $0x110] sm:$0xff] }
 0x23e   : > { %4217 = vst.msk [vmem:[#allocation4 + $0x48] sm:$0xff] %vm3711_vm2, %v4153_v34  ;;  %4218 = vst.msk [vmem:[#allocation4 + $0x50] sm:$0xff] %vm3711_vm2, %v4154_v49  ;;  %v4159_v28 = vmax.f32 %v4095_v40, 0.0  ;;  %v4027_v32 = vmul.f32 %v7261_v55, %v3957_v62  ;;  %v4028_v63 = vmul.f32 %v7261_v55, %v3958_v52  ;;  %v4029_v19 = vmul.f32 %v7261_v55, %v3959_v30  ;;  %v3973_v30 = vld [vmem:[#allocation4 + $0x108] sm:$0xff]  ;;  %v3975_v34 = vld [vmem:[#allocation4 + $0x118] sm:$0xff] }
 0x23f   : > { %4219 = vst.msk [vmem:[#allocation4 + $0x58] sm:$0xff] %vm3711_vm2, %v4155_v26  ;;  %4220 = vst.msk [vmem:[#allocation4 + $0x60] sm:$0xff] %vm3711_vm2, %v4156_v46  ;;  %v4030_v48 = vmul.f32 %v7261_v55, %v3960_v57  ;;  %v4031_v35 = vmul.f32 %v7261_v55, %v3961_v7  ;;  %v4032_v51 = vmul.f32 %v7261_v55, %v3962_v31  ;;  %v3976_v31 = vld [vmem:[#allocation4 + $0x120] sm:$0xff]  ;;  %v3977_v26 = vld [vmem:[#allocation4 + $0x128] sm:$0xff] }
 0x240   : > { %4221 = vst.msk [vmem:[#allocation4 + $0x68] sm:$0xff] %vm3711_vm2, %v4157_v42  ;;  %4222 = vst.msk [vmem:[#allocation4 + $0x70] sm:$0xff] %vm3711_vm2, %v4158_v23  ;;  %v4096_v43 = vadd.f32 %v7264_v2, %v4026_v56  ;;  %v4097_v6 = vadd.f32 %v7264_v2, %v4027_v32  ;;  %v4098_v17 = vadd.f32 %v7264_v2, %v4028_v63  ;;  %v3978_v46 = vld [vmem:[#allocation4 + $0x130] sm:$0xff]  ;;  %v3979_v56 = vld [vmem:[#allocation4 + $0x138] sm:$0xff] }
 0x241   : > { %4223 = vst.msk [vmem:[#allocation4 + $0x78] sm:$0xff] %vm3711_vm2, %v4159_v28  ;;  %v4033_v15 = vmul.f32 %v7261_v55, %v3963_v0  ;;  %v4099_v41 = vadd.f32 %v7264_v2, %v4029_v19  ;;  %v4100_v16 = vadd.f32 %v7264_v2, %v4030_v48  ;;  %v4101_v50 = vadd.f32 %v7264_v2, %v4031_v35 }
 0x242   : > { %v4102_v22 = vadd.f32 %v7264_v2, %v4032_v51  ;;  %v4160_v45 = vmax.f32 %v4096_v43, 0.0  ;;  %v4161_v29 = vmax.f32 %v4097_v6, 0.0  ;;  %v4162_v59 = vmax.f32 %v4098_v17, 0.0 }
 0x243   : > { %v4103_v1 = vadd.f32 %v7264_v2, %v4033_v15  ;;  %v4163_v10 = vmax.f32 %v4099_v41, 0.0  ;;  %v4164_v20 = vmax.f32 %v4100_v16, 0.0  ;;  %v4165_v11 = vmax.f32 %v4101_v50, 0.0  ;;  %v3980_v16 = vld [vmem:[#allocation4 + $0x140] sm:$0xff] }
 0x244   : > { %v4166_v13 = vmax.f32 %v4102_v22, 0.0  ;;  %4224 = vst.msk [vmem:[#allocation4 + $0x80] sm:$0xff] %vm3711_vm2, %v4160_v45  ;;  %4225 = vst.msk [vmem:[#allocation4 + $0x88] sm:$0xff] %vm3711_vm2, %v4161_v29  ;;  %v4034_v37 = vmul.f32 %v7261_v55, %v3964_v44  ;;  %v4035_v33 = vmul.f32 %v7261_v55, %v3965_v25  ;;  %v4036_v4 = vmul.f32 %v7261_v55, %v3966_v12  ;;  %v3982_v45 = vld [vmem:[#allocation4 + $0x150] sm:$0xff]  ;;  %v3983_v29 = vld [vmem:[#allocation4 + $0x158] sm:$0xff] }
 0x245   : > { %4226 = vst.msk [vmem:[#allocation4 + $0x90] sm:$0xff] %vm3711_vm2, %v4162_v59  ;;  %v4167_v54 = vmax.f32 %v4103_v1, 0.0  ;;  %4227 = vst.msk [vmem:[#allocation4 + $0x98] sm:$0xff] %vm3711_vm2, %v4163_v10  ;;  %v4037_v38 = vmul.f32 %v7261_v55, %v3967_v58  ;;  %v4038_v36 = vmul.f32 %v7261_v55, %v3968_v39  ;;  %v4039_v5 = vmul.f32 %v7261_v55, %v3969_v61  ;;  %v3981_v58 = vld [vmem:[#allocation4 + $0x148] sm:$0xff] }
 0x246   : > { %4228 = vst.msk [vmem:[#allocation4 + $0xa0] sm:$0xff] %vm3711_vm2, %v4164_v20  ;;  %4229 = vst.msk [vmem:[#allocation4 + $0xa8] sm:$0xff] %vm3711_vm2, %v4165_v11  ;;  %v4040_v21 = vmul.f32 %v7261_v55, %v3970_v9  ;;  %v4104_v14 = vadd.f32 %v7264_v2, %v4034_v37  ;;  %v4105_v18 = vadd.f32 %v7264_v2, %v4035_v33  ;;  %v3984_v9 = vld [vmem:[#allocation4 + $0x160] sm:$0xff]  ;;  %v3985_v10 = vld [vmem:[#allocation4 + $0x168] sm:$0xff] }
 0x247   : > { %4230 = vst.msk [vmem:[#allocation4 + $0xb0] sm:$0xff] %vm3711_vm2, %v4166_v13  ;;  %4231 = vst.msk [vmem:[#allocation4 + $0xb8] sm:$0xff] %vm3711_vm2, %v4167_v54  ;;  %v4106_v53 = vadd.f32 %v7264_v2, %v4036_v4  ;;  %v4041_v47 = vmul.f32 %v7261_v55, %v3971_v8  ;;  %v4107_v24 = vadd.f32 %v7264_v2, %v4037_v38  ;;  %v3986_v20 = vld [vmem:[#allocation4 + $0x170] sm:$0xff]  ;;  %v3987_v37 = vld [vmem:[#allocation4 + $0x178] sm:$0xff] }
 0x248   : > { %v4108_v27 = vadd.f32 %v7264_v2, %v4038_v36  ;;  %v4109_v62 = vadd.f32 %v7264_v2, %v4039_v5  ;;  %v4110_v52 = vadd.f32 %v7264_v2, %v4040_v21  ;;  %v4168_v49 = vmax.f32 %v4104_v14, 0.0 }
 0x249   : > { %v4169_v40 = vmax.f32 %v4105_v18, 0.0  ;;  %v4170_v57 = vmax.f32 %v4106_v53, 0.0  ;;  %v4111_v7 = vadd.f32 %v7264_v2, %v4041_v47  ;;  %v4171_v42 = vmax.f32 %v4107_v24, 0.0 }
 0x24a   : > { %v4172_v23 = vmax.f32 %v4108_v27, 0.0  ;;  %v4173_v0 = vmax.f32 %v4109_v62, 0.0  ;;  %v4174_v28 = vmax.f32 %v4110_v52, 0.0  ;;  %4232 = vst.msk [vmem:[#allocation4 + $0xc0] sm:$0xff] %vm3711_vm2, %v4168_v49  ;;  %v4042_v63 = vmul.f32 %v7261_v55, %v3972_v60  ;;  %v3988_v27 = vld [vmem:[#allocation4 + $0x180] sm:$0xff]  ;;  %v3990_v49 = vld [vmem:[#allocation4 + $0x190] sm:$0xff] }
 0x24b   : > { %4233 = vst.msk [vmem:[#allocation4 + $0xc8] sm:$0xff] %vm3711_vm2, %v4169_v40  ;;  %4234 = vst.msk [vmem:[#allocation4 + $0xd0] sm:$0xff] %vm3711_vm2, %v4170_v57  ;;  %v4175_v32 = vmax.f32 %v4111_v7, 0.0  ;;  %v4043_v19 = vmul.f32 %v7261_v55, %v3973_v30  ;;  %v4044_v48 = vmul.f32 %v7261_v55, %v3974_v3  ;;  %v4045_v35 = vmul.f32 %v7261_v55, %v3975_v34  ;;  %v3989_v34 = vld [vmem:[#allocation4 + $0x188] sm:$0xff]  ;;  %v3991_v40 = vld [vmem:[#allocation4 + $0x198] sm:$0xff] }
 0x24c   : > { %4235 = vst.msk [vmem:[#allocation4 + $0xd8] sm:$0xff] %vm3711_vm2, %v4171_v42  ;;  %4236 = vst.msk [vmem:[#allocation4 + $0xe0] sm:$0xff] %vm3711_vm2, %v4172_v23  ;;  %v4046_v51 = vmul.f32 %v7261_v55, %v3976_v31  ;;  %v4047_v43 = vmul.f32 %v7261_v55, %v3977_v26  ;;  %v4048_v6 = vmul.f32 %v7261_v55, %v3978_v46  ;;  %v3992_v46 = vld [vmem:[#allocation4 + $0x1a0] sm:$0xff]  ;;  %v3993_v42 = vld [vmem:[#allocation4 + $0x1a8] sm:$0xff] }
 0x24d   : > { %4237 = vst.msk [vmem:[#allocation4 + $0xe8] sm:$0xff] %vm3711_vm2, %v4173_v0  ;;  %4238 = vst.msk [vmem:[#allocation4 + $0xf0] sm:$0xff] %vm3711_vm2, %v4174_v28  ;;  %v4112_v17 = vadd.f32 %v7264_v2, %v4042_v63  ;;  %v4113_v15 = vadd.f32 %v7264_v2, %v4043_v19  ;;  %v4114_v44 = vadd.f32 %v7264_v2, %v4044_v48  ;;  %v3994_v23 = vld [vmem:[#allocation4 + $0x1b0] sm:$0xff]  ;;  %v3995_v63 = vld [vmem:[#allocation4 + $0x1b8] sm:$0xff] }
 0x24e   : > { %4239 = vst.msk [vmem:[#allocation4 + $0xf8] sm:$0xff] %vm3711_vm2, %v4175_v32  ;;  %v4049_v41 = vmul.f32 %v7261_v55, %v3979_v56  ;;  %v4115_v50 = vadd.f32 %v7264_v2, %v4045_v35  ;;  %v4116_v22 = vadd.f32 %v7264_v2, %v4046_v51  ;;  %v4117_v25 = vadd.f32 %v7264_v2, %v4047_v43 }
 0x24f   : > { %v4118_v12 = vadd.f32 %v7264_v2, %v4048_v6  ;;  %v4176_v59 = vmax.f32 %v4112_v17, 0.0  ;;  %v4177_v1 = vmax.f32 %v4113_v15, 0.0  ;;  %v4178_v39 = vmax.f32 %v4114_v44, 0.0 }
 0x250   : > { %v4119_v61 = vadd.f32 %v7264_v2, %v4049_v41  ;;  %v4179_v11 = vmax.f32 %v4115_v50, 0.0  ;;  %v4180_v13 = vmax.f32 %v4116_v22, 0.0  ;;  %v4181_v8 = vmax.f32 %v4117_v25, 0.0  ;;  %v3996_v22 = vld [vmem:[#allocation4 + $0x1c0] sm:$0xff] }
 0x251   : > { %v4182_v54 = vmax.f32 %v4118_v12, 0.0  ;;  %4240 = vst.msk [vmem:[#allocation4 + $0x100] sm:$0xff] %vm3711_vm2, %v4176_v59  ;;  %4241 = vst.msk [vmem:[#allocation4 + $0x108] sm:$0xff] %vm3711_vm2, %v4177_v1  ;;  %v4050_v4 = vmul.f32 %v7261_v55, %v3980_v16  ;;  %v4051_v38 = vmul.f32 %v7261_v55, %v3981_v58  ;;  %v4052_v36 = vmul.f32 %v7261_v55, %v3982_v45  ;;  %v3998_v59 = vld [vmem:[#allocation4 + $0x1d0] sm:$0xff]  ;;  %v3999_v1 = vld [vmem:[#allocation4 + $0x1d8] sm:$0xff] }
 0x252   : > { %4242 = vst.msk [vmem:[#allocation4 + $0x110] sm:$0xff] %vm3711_vm2, %v4178_v39  ;;  %v4183_v33 = vmax.f32 %v4119_v61, 0.0  ;;  %4243 = vst.msk [vmem:[#allocation4 + $0x118] sm:$0xff] %vm3711_vm2, %v4179_v11  ;;  %v4053_v5 = vmul.f32 %v7261_v55, %v3983_v29  ;;  %v4054_v21 = vmul.f32 %v7261_v55, %v3984_v9  ;;  %v4055_v14 = vmul.f32 %v7261_v55, %v3985_v10  ;;  %v3997_v29 = vld [vmem:[#allocation4 + $0x1c8] sm:$0xff] }
 0x253   : > { %4244 = vst.msk [vmem:[#allocation4 + $0x120] sm:$0xff] %vm3711_vm2, %v4180_v13  ;;  %4245 = vst.msk [vmem:[#allocation4 + $0x128] sm:$0xff] %vm3711_vm2, %v4181_v8  ;;  %v4056_v18 = vmul.f32 %v7261_v55, %v3986_v20  ;;  %v4120_v53 = vadd.f32 %v7264_v2, %v4050_v4  ;;  %v4121_v47 = vadd.f32 %v7264_v2, %v4051_v38  ;;  %v4000_v20 = vld [vmem:[#allocation4 + $0x1e0] sm:$0xff]  ;;  %v4001_v11 = vld [vmem:[#allocation4 + $0x1e8] sm:$0xff] }
 0x254   : > { %4246 = vst.msk [vmem:[#allocation4 + $0x130] sm:$0xff] %vm3711_vm2, %v4182_v54  ;;  %4247 = vst.msk [vmem:[#allocation4 + $0x138] sm:$0xff] %vm3711_vm2, %v4183_v33  ;;  %v4122_v60 = vadd.f32 %v7264_v2, %v4052_v36  ;;  %v4057_v24 = vmul.f32 %v7261_v55, %v3987_v37  ;;  %v4123_v62 = vadd.f32 %v7264_v2, %v4053_v5  ;;  %v4002_v13 = vld [vmem:[#allocation4 + $0x1f0] sm:$0xff]  ;;  %v4003_v4 = vld [vmem:[#allocation4 + $0x1f8] sm:$0xff] }
 0x255   : > { %v4124_v52 = vadd.f32 %v7264_v2, %v4054_v21  ;;  %v4125_v30 = vadd.f32 %v7264_v2, %v4055_v14  ;;  %v4126_v3 = vadd.f32 %v7264_v2, %v4056_v18  ;;  %v4184_v57 = vmax.f32 %v4120_v53, 0.0 }
 0x256   : > { %v4185_v7 = vmax.f32 %v4121_v47, 0.0  ;;  %v4186_v31 = vmax.f32 %v4122_v60, 0.0  ;;  %v4127_v26 = vadd.f32 %v7264_v2, %v4057_v24  ;;  %v4187_v0 = vmax.f32 %v4123_v62, 0.0 }
 0x257   : > { %v4188_v28 = vmax.f32 %v4124_v52, 0.0  ;;  %v4189_v56 = vmax.f32 %v4125_v30, 0.0  ;;  %v4190_v32 = vmax.f32 %v4126_v3, 0.0  ;;  %4248 = vst.msk [vmem:[#allocation4 + $0x140] sm:$0xff] %vm3711_vm2, %v4184_v57  ;;  %v4058_v48 = vmul.f32 %v7261_v55, %v3988_v27 }
 0x258   : > { %4249 = vst.msk [vmem:[#allocation4 + $0x148] sm:$0xff] %vm3711_vm2, %v4185_v7  ;;  %4250 = vst.msk [vmem:[#allocation4 + $0x150] sm:$0xff] %vm3711_vm2, %v4186_v31  ;;  %v4191_v19 = vmax.f32 %v4127_v26, 0.0  ;;  %v4059_v35 = vmul.f32 %v7261_v55, %v3989_v34  ;;  %v4060_v51 = vmul.f32 %v7261_v55, %v3990_v49  ;;  %v4061_v43 = vmul.f32 %v7261_v55, %v3991_v40 }
 0x259   : > { %4251 = vst.msk [vmem:[#allocation4 + $0x158] sm:$0xff] %vm3711_vm2, %v4187_v0  ;;  %4252 = vst.msk [vmem:[#allocation4 + $0x160] sm:$0xff] %vm3711_vm2, %v4188_v28  ;;  %v4062_v6 = vmul.f32 %v7261_v55, %v3992_v46  ;;  %v4063_v17 = vmul.f32 %v7261_v55, %v3993_v42  ;;  %v4064_v15 = vmul.f32 %v7261_v55, %v3994_v23 }
 0x25a   : > { %4253 = vst.msk [vmem:[#allocation4 + $0x168] sm:$0xff] %vm3711_vm2, %v4189_v56  ;;  %4254 = vst.msk [vmem:[#allocation4 + $0x170] sm:$0xff] %vm3711_vm2, %v4190_v32  ;;  %v4128_v44 = vadd.f32 %v7264_v2, %v4058_v48  ;;  %v4129_v41 = vadd.f32 %v7264_v2, %v4059_v35  ;;  %v4130_v16 = vadd.f32 %v7264_v2, %v4060_v51 }
 0x25b   : > { %4255 = vst.msk [vmem:[#allocation4 + $0x178] sm:$0xff] %vm3711_vm2, %v4191_v19  ;;  %v4065_v50 = vmul.f32 %v7261_v55, %v3995_v63  ;;  %v4131_v25 = vadd.f32 %v7264_v2, %v4061_v43  ;;  %v4132_v12 = vadd.f32 %v7264_v2, %v4062_v6  ;;  %v4133_v58 = vadd.f32 %v7264_v2, %v4063_v17 }
 0x25c   : > { %v4134_v45 = vadd.f32 %v7264_v2, %v4064_v15  ;;  %v4192_v39 = vmax.f32 %v4128_v44, 0.0  ;;  %v4193_v61 = vmax.f32 %v4129_v41, 0.0  ;;  %v4194_v9 = vmax.f32 %v4130_v16, 0.0 }
 0x25d   : > { %v4135_v10 = vadd.f32 %v7264_v2, %v4065_v50  ;;  %v4195_v8 = vmax.f32 %v4131_v25, 0.0  ;;  %v4196_v54 = vmax.f32 %v4132_v12, 0.0  ;;  %v4197_v37 = vmax.f32 %v4133_v58, 0.0 }
 0x25e   : > { %v4198_v33 = vmax.f32 %v4134_v45, 0.0  ;;  %4256 = vst.msk [vmem:[#allocation4 + $0x180] sm:$0xff] %vm3711_vm2, %v4192_v39  ;;  %4257 = vst.msk [vmem:[#allocation4 + $0x188] sm:$0xff] %vm3711_vm2, %v4193_v61  ;;  %v4066_v36 = vmul.f32 %v7261_v55, %v3996_v22  ;;  %v4067_v5 = vmul.f32 %v7261_v55, %v3997_v29  ;;  %v4068_v21 = vmul.f32 %v7261_v55, %v3998_v59 }
 0x25f   : > { %4258 = vst.msk [vmem:[#allocation4 + $0x190] sm:$0xff] %vm3711_vm2, %v4194_v9  ;;  %v4199_v38 = vmax.f32 %v4135_v10, 0.0  ;;  %4259 = vst.msk [vmem:[#allocation4 + $0x198] sm:$0xff] %vm3711_vm2, %v4195_v8  ;;  %v4069_v14 = vmul.f32 %v7261_v55, %v3999_v1  ;;  %v4070_v18 = vmul.f32 %v7261_v55, %v4000_v20  ;;  %v4071_v53 = vmul.f32 %v7261_v55, %v4001_v11 }
 0x260   : > { %4260 = vst.msk [vmem:[#allocation4 + $0x1a0] sm:$0xff] %vm3711_vm2, %v4196_v54  ;;  %4261 = vst.msk [vmem:[#allocation4 + $0x1a8] sm:$0xff] %vm3711_vm2, %v4197_v37  ;;  %v4072_v47 = vmul.f32 %v7261_v55, %v4002_v13  ;;  %v4136_v60 = vadd.f32 %v7264_v2, %v4066_v36  ;;  %v4137_v24 = vadd.f32 %v7264_v2, %v4067_v5 }
 0x261   : > { %4262 = vst.msk [vmem:[#allocation4 + $0x1b0] sm:$0xff] %vm3711_vm2, %v4198_v33  ;;  %4263 = vst.msk [vmem:[#allocation4 + $0x1b8] sm:$0xff] %vm3711_vm2, %v4199_v38  ;;  %v4138_v27 = vadd.f32 %v7264_v2, %v4068_v21  ;;  %v4073_v62 = vmul.f32 %v7261_v55, %v4003_v4  ;;  %v4139_v52 = vadd.f32 %v7264_v2, %v4069_v14 }
 0x262   : > { %v4140_v30 = vadd.f32 %v7264_v2, %v4070_v18  ;;  %v4141_v3 = vadd.f32 %v7264_v2, %v4071_v53  ;;  %v4142_v34 = vadd.f32 %v7264_v2, %v4072_v47  ;;  %v4200_v49 = vmax.f32 %v4136_v60, 0.0 }
 0x263   : > { %v4201_v40 = vmax.f32 %v4137_v24, 0.0  ;;  %v4202_v57 = vmax.f32 %v4138_v27, 0.0  ;;  %v4143_v7 = vadd.f32 %v7264_v2, %v4073_v62  ;;  %v4203_v31 = vmax.f32 %v4139_v52, 0.0 }
 0x264   : > { %v4204_v26 = vmax.f32 %v4140_v30, 0.0  ;;  %v4205_v46 = vmax.f32 %v4141_v3, 0.0  ;;  %v4206_v42 = vmax.f32 %v4142_v34, 0.0  ;;  %4264 = vst.msk [vmem:[#allocation4 + $0x1c0] sm:$0xff] %vm3711_vm2, %v4200_v49 }
 0x265   : > { %4265 = vst.msk [vmem:[#allocation4 + $0x1c8] sm:$0xff] %vm3711_vm2, %v4201_v40  ;;  %4266 = vst.msk [vmem:[#allocation4 + $0x1d0] sm:$0xff] %vm3711_vm2, %v4202_v57  ;;  %v4207_v55 = vmax.f32 %v4143_v7, 0.0 }
 0x266   : > { %4267 = vst.msk [vmem:[#allocation4 + $0x1d8] sm:$0xff] %vm3711_vm2, %v4203_v31  ;;  %4268 = vst.msk [vmem:[#allocation4 + $0x1e0] sm:$0xff] %vm3711_vm2, %v4204_v26 }
 0x267   : > { %4269 = vst.msk [vmem:[#allocation4 + $0x1e8] sm:$0xff] %vm3711_vm2, %v4205_v46  ;;  %4270 = vst.msk [vmem:[#allocation4 + $0x1f0] sm:$0xff] %vm3711_vm2, %v4206_v42 }
 0x268   : > { %4271 = vst.msk [vmem:[#allocation4 + $0x1f8] sm:$0xff] %vm3711_vm2, %v4207_v55 }
 0x269 PF: > { %p5577_p6 = scmp.eq.s32.totalorder %s5669_s19, 1  ;;  %s5630_s28 = smov [#allocation4]  }
 0x26a   : > { %s4278_s29 = sshll.u32 %s5630_s28, 4  ;;  %s4279_s29 = int_to_ptr.vmem [resolvable:$true] %s4278_s29 }
 0x26b   : > { %s5593_s30 = scalar_lea.vmem %s4279_s29, 8192  ;;  %p5600_p10 = scmp.lt.s32.totalorder %s4279_s29, %s4279_s29 }
 0x26c   : > { %p5594_p7 = scmp.ne.s32.totalorder %s4279_s29, %s5593_s30  ;;  %p5601_p11 = scmp.lt.s32.totalorder %s5593_s30, %s5593_s30 }
 0x26e   : > { %p5595_p8 = pnand %p5594_p7, %p5577_p6  ;;  %p5602_p12 = por %p5601_p11, %p5600_p10 }
 0x270   : > { %p5596_p9 = pneg %p5595_p8 }
 0x272   : > { %p5603_p13 = pnand %p5602_p12, %p5596_p9 }
 0x274   : > { %5606 = shalt.err (!%p5603_p13)
}
 0x275   : > { %s5631_s6 = smov 128   ;;  %s5632_s7 = smov 8  }
 0x276   : > { %5574 = dma.vmem_to_hbm [thread:$0]  (%p5577_p6), %s4279_s29, 8192, %s7477_s5, [#allocation5], %s5631_s6, %s5631_s6, %s5632_s7  }
 0x277   : > { %5622 = dma.done.wait (%p5577_p6), [#allocation5], 8192  }
 0x278   : > { %5624 = vsyncadd (%p5577_p6), [#allocation5], 4294959104 }
 0x279 PF: > { %s16_s18 = sadd.s32 1, %s5627_s18  }
 0x27a   : > { %p13_p0 = scmp.ge.s32.totalorder %s16_s18, 4  }
 0x27c   :  { %15 = sbr.rel (!%p13_p0) target bundleno = 1 (0x1), region = 86 }
 0x281   :  { %4294 = vsyncpa [#allocation5], 1 }
 0x282   :  { %4296 = vsyncpa [#allocation5 + $0x1], 1 }

</bundles_post_ra>
